<compile_context>
chip_gen: v7x
topology: tpu7x:2x2x1
jax: 0.10.0
libtpu: 0.0.40
codegen_flags: <defaults>
</compile_context>

<pallas_src>
import jax
import jax.numpy as jnp
from jax.experimental import pallas as pl
from jax.experimental.pallas import tpu as pltpu

_N_K = 5
_LANES = 128
_MIN_TILE_ROWS = 256     # keeps >=2 grid steps alive for medium N
_MAX_TILE_ROWS = 4096    # 8 MiB/step -> 16 MiB double-buffered (v7x-safe)


def _compute_xy(params_ref, alt, az):
    """Shared math: (alt, az) tiles -> (x, y) photo-coordinate tiles.

    params layout (SMEM, shape (1, 13)):
      [0:4]  = R row-major (r00, r01, r10, r11)
      [4:6]  = t (t0, t1)
      [6:8]  = (x0, y0)
      [8:13] = scale * k[0..4]   (scale pre-folded on the host)
    """
    r00 = params_ref[0, 0]
    r01 = params_ref[0, 1]
    r10 = params_ref[0, 2]
    r11 = params_ref[0, 3]
    t0 = params_ref[0, 4]
    t1 = params_ref[0, 5]
    x0 = params_ref[0, 6]
    y0 = params_ref[0, 7]
    sk0 = params_ref[0, 8]
    sk1 = params_ref[0, 9]
    sk2 = params_ref[0, 10]
    sk3 = params_ref[0, 11]
    sk4 = params_ref[0, 12]

    # Step 1: rotation + translation in (rho, theta) space.
    rho = alt * r00 + az * r01 + t0
    theta = alt * r10 + az * r11 + t1
    # NOTE: the module's `theta % (2*pi)` is intentionally dropped: cos/sin are
    # periodic so x/y are unchanged; it only adds VALU work.

    # Step 2: Kannala-Brandt polynomial, Horner in rho^2, with scale*k folded:
    #   rho * (sk0 + rho2*(sk1 + rho2*(sk2 + rho2*(sk3 + rho2*sk4))))
    rho2 = rho * rho
    poly = sk3 + rho2 * sk4
    poly = sk2 + rho2 * poly
    poly = sk1 + rho2 * poly
    poly = sk0 + rho2 * poly
    rho_s = rho * poly

    # Step 3: polar -> cartesian.
    # TODO(synk): if the bundle dump shows cos/sin expanding to a VALU
    # polynomial with generic range reduction (not EUP), swap in a shared
    # bounded-range sincos (theta is bounded by construction).
    x = rho_s * jnp.cos(theta) + x0
    y = rho_s * jnp.sin(theta) + y0
    return x, y


def _interleaved_kernel(params_ref, alt_ref, az_ref, out_ref):
    """Lane-dense (tile_rows, 256) block: lanes 2j / 2j+1 hold x_j / y_j.

    Row-major flattening of the (rows, 256) output is exactly the (N, 2)
    contract, so the wrapper needs only a free reshape (no HBM transpose pass).
    """
    x, y = _compute_xy(params_ref, alt_ref[...], az_ref[...])
    rows, lanes = x.shape
    out_ref[...] = jnp.stack([x, y], axis=-1).reshape(rows, 2 * lanes)


def _planar_kernel(params_ref, alt_ref, az_ref, out_ref):
    """Planar (2, tile_rows, 128) output: plane 0 = x, plane 1 = y."""
    x, y = _compute_xy(params_ref, alt_ref[...], az_ref[...])
    out_ref[0] = x
    out_ref[1] = y


def _pack_params(R, t, scale, k, x0, y0):
    scale = jnp.asarray(scale, jnp.float32).reshape(())
    return jnp.concatenate([
        jnp.asarray(R, jnp.float32).reshape(4),
        jnp.asarray(t, jnp.float32).reshape(2),
        jnp.asarray(x0, jnp.float32).reshape(1),
        jnp.asarray(y0, jnp.float32).reshape(1),
        scale * jnp.asarray(k, jnp.float32).reshape(_N_K),  # fold scale into k
    ]).reshape(1, 4 + 2 + 2 + _N_K)


def _pick_tile_rows(rows):
    """>= ~8 grid steps for large inputs, tiles a multiple of 8 sublanes,
    capped so double-buffered blocks stay well under the default scoped-VMEM
    limit on every generation (incl. v7x's 32 MiB default / 64 MiB physical)."""
    if rows <= _MIN_TILE_ROWS:
        return rows  # single full-extent block (exempt from the 8-row rule)
    tile = 8 * pl.cdiv(pl.cdiv(rows, 8), 8)
    return int(min(max(_MIN_TILE_ROWS, tile), _MAX_TILE_ROWS))


def _prep_inputs(alt, az):
    alt = jnp.asarray(alt, jnp.float32).reshape(-1)
    az = jnp.asarray(az, jnp.float32).reshape(-1)
    n = alt.shape[0]
    n_pad = ((n + _LANES - 1) // _LANES) * _LANES
    if n_pad != n:
        # Ragged N: tail-pad with zeros (one extra copy). Lane-aligned N is the
        # zero-copy fast path.
        # TODO(synk): v5e could also take bf16 HBM inputs (cast to f32 in-kernel)
        # to cut input bytes; kept f32 to preserve the module's interface.
        alt = jnp.pad(alt, (0, n_pad - n))
        az = jnp.pad(az, (0, n_pad - n))
    rows = n_pad // _LANES
    return alt.reshape(rows, _LANES), az.reshape(rows, _LANES), n, rows


def _run(kernel, out_shape, out_spec, params, alt2, az2, tile_rows, num_tiles, n):
    return pl.pallas_call(
        kernel,
        out_shape=out_shape,
        grid=(num_tiles,),
        in_specs=[
            pl.BlockSpec(memory_space=pltpu.MemorySpace.SMEM),     # params
            pl.BlockSpec((tile_rows, _LANES), lambda i: (i, 0)),   # alt
            pl.BlockSpec((tile_rows, _LANES), lambda i: (i, 0)),   # az
        ],
        out_specs=out_spec,
        compiler_params=pltpu.CompilerParams(
            # TODO(synk): on v7x switch to pltpu.CORE_PARALLEL if xprof shows a
            # single TensorCore doing all row tiles.
            dimension_semantics=("parallel",)),
        cost_estimate=pl.CostEstimate(
            flops=25 * n, transcendentals=2 * n, bytes_accessed=16 * n),
    )(params, alt2, az2)


def altaz_to_photo_planar(alt, az, R, t, scale, k, x0, y0):
    """Fast path: photo coordinates as a lane-dense (2, N) array (row0=x, row1=y)."""
    alt2, az2, n, rows = _prep_inputs(alt, az)
    params = _pack_params(R, t, scale, k, x0, y0)
    tile_rows = _pick_tile_rows(rows)
    num_tiles = pl.cdiv(rows, tile_rows)
    out = _run(
        _planar_kernel,
        jax.ShapeDtypeStruct((2, rows, _LANES), jnp.float32),
        pl.BlockSpec((2, tile_rows, _LANES), lambda i: (0, i, 0)),
        params, alt2, az2, tile_rows, num_tiles, n)
    out = out.reshape(2, rows * _LANES)
    return out if out.shape[1] == n else out[:, :n]


def _interleaved_forward(alt, az, R, t, scale, k, x0, y0):
    alt2, az2, n, rows = _prep_inputs(alt, az)
    params = _pack_params(R, t, scale, k, x0, y0)
    tile_rows = _pick_tile_rows(rows)
    num_tiles = pl.cdiv(rows, tile_rows)
    out = _run(
        _interleaved_kernel,
        jax.ShapeDtypeStruct((rows, 2 * _LANES), jnp.float32),
        pl.BlockSpec((tile_rows, 2 * _LANES), lambda i: (i, 0)),
        params, alt2, az2, tile_rows, num_tiles, n)
    out = out.reshape(rows * _LANES, 2)  # free: row-major order already matches
    return out if out.shape[0] == n else out[:n]


_INTERLEAVE_OK = None  # tri-state: None = untried, True/False = probed result


def altaz_to_photo(alt, az, R, t, scale, k, x0, y0):
    """Matches AltAzToPhoto.forward: returns (N, 2) = stack([x, y], dim=1).

    Primary path builds the interleaved (N, 2) layout inside the kernel (zero
    post-kernel HBM passes for lane-aligned N). If that interleave fails to
    lower on this Mosaic build, fall back once to the planar kernel plus a
    single XLA transpose (the previous, always-lowering implementation).
    """
    global _INTERLEAVE_OK
    if _INTERLEAVE_OK is not False:
        try:
            out = _interleaved_forward(alt, az, R, t, scale, k, x0, y0)
            _INTERLEAVE_OK = True
            return out
        except Exception:
            if _INTERLEAVE_OK is True:   # kernel known-good -> genuine error
                raise
            _INTERLEAVE_OK = False       # interleave didn't lower; use fallback
    return altaz_to_photo_planar(alt, az, R, t, scale, k, x0, y0).T


def _reference(alt, az, R, t, scale, k, x0, y0):
    """Pure-JAX reference matching the PyTorch module semantics."""
    rho = alt * R[0, 0] + az * R[0, 1] + t[0]
    theta = alt * R[1, 0] + az * R[1, 1] + t[1]
    theta = jnp.mod(theta, 2.0 * jnp.pi)
    proj = jnp.zeros_like(rho)
    for ik in range(k.shape[0]):
        proj = proj + k[ik] * rho ** (2 * ik + 1)
    rho_s = scale[0] * proj
    x = rho_s * jnp.cos(theta) + x0[0]
    y = rho_s * jnp.sin(theta) + y0[0]
    return jnp.stack([x, y], axis=1)


if __name__ == "__main__":
    key = jax.random.PRNGKey(0)
    k_t, k_k, k_alt, k_az, k_alt2, k_az2 = jax.random.split(key, 6)

    # Deterministic camera parameters (shapes mirror the module's __init__).
    R = jnp.array([[1.0, 0.0], [0.0, 1.0]], jnp.float32)            # (2, 2)
    t = 0.1 * jax.random.normal(k_t, (2,), jnp.float32)              # (2,)
    scale = jnp.array([0.5], jnp.float32)                            # (1,)
    # Fisheye-style distortion coefficients: leading term O(1), higher decay.
    k = jax.random.normal(k_k, (_N_K,), jnp.float32) * jnp.array(
        [1.0, 1e-1, 1e-2, 1e-3, 1e-4], jnp.float32)                  # (5,)
    x0 = jnp.array([0.5], jnp.float32)                               # (1,)
    y0 = jnp.array([0.5], jnp.float32)                               # (1,)

    # Case 1: lane-aligned N (zero-copy wrapper path).
    N = 1024
    alt = jax.random.uniform(k_alt, (N,), jnp.float32, 0.0, jnp.pi / 2)
    az = jax.random.uniform(k_az, (N,), jnp.float32, 0.0, 2.0 * jnp.pi)
    out = jax.block_until_ready(altaz_to_photo(alt, az, R, t, scale, k, x0, y0))
    ref = _reference(alt, az, R, t, scale, k, x0, y0)
    assert out.shape == (N, 2), out.shape
    assert jnp.allclose(out, ref, atol=1e-4, rtol=1e-4), \
        float(jnp.max(jnp.abs(out - ref)))

    # Case 2: ragged N (not a multiple of 128) exercises tail pad + masking.
    N2 = 300
    alt2 = jax.random.uniform(k_alt2, (N2,), jnp.float32, 0.0, jnp.pi / 2)
    az2 = jax.random.uniform(k_az2, (N2,), jnp.float32, 0.0, 2.0 * jnp.pi)
    out2 = jax.block_until_ready(altaz_to_photo(alt2, az2, R, t, scale, k, x0, y0))
    ref2 = _reference(alt2, az2, R, t, scale, k, x0, y0)
    assert out2.shape == (N2, 2), out2.shape
    assert jnp.allclose(out2, ref2, atol=1e-4, rtol=1e-4), \
        float(jnp.max(jnp.abs(out2 - ref2)))

    # Case 3: planar (2, N) fast path for layout-flexible consumers.
    out_pl = jax.block_until_ready(
        altaz_to_photo_planar(alt, az, R, t, scale, k, x0, y0))
    assert out_pl.shape == (2, N), out_pl.shape
    assert jnp.allclose(out_pl.T, ref, atol=1e-4, rtol=1e-4), \
        float(jnp.max(jnp.abs(out_pl.T - ref)))

    print("KERNEL_OK")
</pallas_src>

<mosaic_0001>
module attributes {stable_mosaic.version = 11 : i64} {
  func.func @_interleaved_kernel(%arg0: i32, %arg1: memref<1x13xf32, #tpu.memory_space<smem>>, %arg2: memref<8x128xf32, #tpu.memory_space<vmem>>, %arg3: memref<8x128xf32, #tpu.memory_space<vmem>>, %arg4: memref<8x256xf32, #tpu.memory_space<vmem>>) attributes {dimension_semantics = [#tpu.dimension_semantics<parallel>], iteration_bounds = array<i64: 1>, scalar_prefetch = 0 : i64, scratch_operands = 0 : i64, tpu.core_type = #tpu.core_type<tc>, window_params = [{transform_indices = @transform_0, window_bounds = array<i64: 1, 13>}, {transform_indices = @transform_1, window_bounds = array<i64: 8, 128>}, {transform_indices = @transform_2, window_bounds = array<i64: 8, 128>}, {transform_indices = @transform_3, window_bounds = array<i64: 8, 256>}]} {
    %c0 = arith.constant 0 : index
    %c0_0 = arith.constant 0 : index
    %0 = vector.load %arg2[%c0, %c0_0] : memref<8x128xf32, #tpu.memory_space<vmem>>, vector<8x128xf32>
    %c0_1 = arith.constant 0 : index
    %c0_2 = arith.constant 0 : index
    %1 = vector.load %arg3[%c0_1, %c0_2] : memref<8x128xf32, #tpu.memory_space<vmem>>, vector<8x128xf32>
    %c0_3 = arith.constant 0 : index
    %c0_4 = arith.constant 0 : index
    %2 = memref.load %arg1[%c0_3, %c0_4] : memref<1x13xf32, #tpu.memory_space<smem>>
    %c0_5 = arith.constant 0 : index
    %c1 = arith.constant 1 : index
    %3 = memref.load %arg1[%c0_5, %c1] : memref<1x13xf32, #tpu.memory_space<smem>>
    %c0_6 = arith.constant 0 : index
    %c2 = arith.constant 2 : index
    %4 = memref.load %arg1[%c0_6, %c2] : memref<1x13xf32, #tpu.memory_space<smem>>
    %c0_7 = arith.constant 0 : index
    %c3 = arith.constant 3 : index
    %5 = memref.load %arg1[%c0_7, %c3] : memref<1x13xf32, #tpu.memory_space<smem>>
    %c0_8 = arith.constant 0 : index
    %c4 = arith.constant 4 : index
    %6 = memref.load %arg1[%c0_8, %c4] : memref<1x13xf32, #tpu.memory_space<smem>>
    %c0_9 = arith.constant 0 : index
    %c5 = arith.constant 5 : index
    %7 = memref.load %arg1[%c0_9, %c5] : memref<1x13xf32, #tpu.memory_space<smem>>
    %c0_10 = arith.constant 0 : index
    %c6 = arith.constant 6 : index
    %8 = memref.load %arg1[%c0_10, %c6] : memref<1x13xf32, #tpu.memory_space<smem>>
    %c0_11 = arith.constant 0 : index
    %c7 = arith.constant 7 : index
    %9 = memref.load %arg1[%c0_11, %c7] : memref<1x13xf32, #tpu.memory_space<smem>>
    %c0_12 = arith.constant 0 : index
    %c8 = arith.constant 8 : index
    %10 = memref.load %arg1[%c0_12, %c8] : memref<1x13xf32, #tpu.memory_space<smem>>
    %c0_13 = arith.constant 0 : index
    %c9 = arith.constant 9 : index
    %11 = memref.load %arg1[%c0_13, %c9] : memref<1x13xf32, #tpu.memory_space<smem>>
    %c0_14 = arith.constant 0 : index
    %c10 = arith.constant 10 : index
    %12 = memref.load %arg1[%c0_14, %c10] : memref<1x13xf32, #tpu.memory_space<smem>>
    %c0_15 = arith.constant 0 : index
    %c11 = arith.constant 11 : index
    %13 = memref.load %arg1[%c0_15, %c11] : memref<1x13xf32, #tpu.memory_space<smem>>
    %c0_16 = arith.constant 0 : index
    %c12 = arith.constant 12 : index
    %14 = memref.load %arg1[%c0_16, %c12] : memref<1x13xf32, #tpu.memory_space<smem>>
    %15 = vector.broadcast %2 : f32 to vector<8x128xf32>
    %16 = arith.mulf %0, %15 : vector<8x128xf32>
    %17 = vector.broadcast %3 : f32 to vector<8x128xf32>
    %18 = arith.mulf %1, %17 : vector<8x128xf32>
    %19 = arith.addf %16, %18 : vector<8x128xf32>
    %20 = vector.broadcast %6 : f32 to vector<8x128xf32>
    %21 = arith.addf %19, %20 : vector<8x128xf32>
    %22 = vector.broadcast %4 : f32 to vector<8x128xf32>
    %23 = arith.mulf %0, %22 : vector<8x128xf32>
    %24 = vector.broadcast %5 : f32 to vector<8x128xf32>
    %25 = arith.mulf %1, %24 : vector<8x128xf32>
    %26 = arith.addf %23, %25 : vector<8x128xf32>
    %27 = vector.broadcast %7 : f32 to vector<8x128xf32>
    %28 = arith.addf %26, %27 : vector<8x128xf32>
    %29 = arith.mulf %21, %21 : vector<8x128xf32>
    %30 = vector.broadcast %14 : f32 to vector<8x128xf32>
    %31 = arith.mulf %29, %30 : vector<8x128xf32>
    %32 = vector.broadcast %13 : f32 to vector<8x128xf32>
    %33 = arith.addf %32, %31 : vector<8x128xf32>
    %34 = arith.mulf %29, %33 : vector<8x128xf32>
    %35 = vector.broadcast %12 : f32 to vector<8x128xf32>
    %36 = arith.addf %35, %34 : vector<8x128xf32>
    %37 = arith.mulf %29, %36 : vector<8x128xf32>
    %38 = vector.broadcast %11 : f32 to vector<8x128xf32>
    %39 = arith.addf %38, %37 : vector<8x128xf32>
    %40 = arith.mulf %29, %39 : vector<8x128xf32>
    %41 = vector.broadcast %10 : f32 to vector<8x128xf32>
    %42 = arith.addf %41, %40 : vector<8x128xf32>
    %43 = arith.mulf %21, %42 : vector<8x128xf32>
    %44 = math.cos %28 : vector<8x128xf32>
    %45 = arith.mulf %43, %44 : vector<8x128xf32>
    %46 = vector.broadcast %8 : f32 to vector<8x128xf32>
    %47 = arith.addf %45, %46 : vector<8x128xf32>
    %48 = math.sin %28 : vector<8x128xf32>
    %49 = arith.mulf %43, %48 : vector<8x128xf32>
    %50 = vector.broadcast %9 : f32 to vector<8x128xf32>
    %51 = arith.addf %49, %50 : vector<8x128xf32>
    %52 = vector.shape_cast %47 : vector<8x128xf32> to vector<8x128x1xf32>
    %53 = vector.shape_cast %51 : vector<8x128xf32> to vector<8x128x1xf32>
    %54 = tpu.concatenate %52, %53 in 2 : vector<8x128x1xf32>, vector<8x128x1xf32> -> vector<8x128x2xf32>
    %55 = vector.shape_cast %54 : vector<8x128x2xf32> to vector<8x256xf32>
    %c0_17 = arith.constant 0 : index
    %c0_18 = arith.constant 0 : index
    %56 = vector.load %arg4[%c0_17, %c0_18] : memref<8x256xf32, #tpu.memory_space<vmem>>, vector<8x256xf32>
    tpu.vector_store %arg4[%c0_17, %c0_18], %55 {strides = array<i32>} : memref<8x256xf32, #tpu.memory_space<vmem>>, vector<8x256xf32>,
    return
  }
  func.func @transform_0(%arg0: i32) -> (i32, i32) {
    %c0_i32 = arith.constant 0 : i32
    %c0_i32_0 = arith.constant 0 : i32
    %c0_i32_1 = arith.constant 0 : i32
    return %c0_i32, %c0_i32_0 : i32, i32
  }
  func.func @transform_1(%arg0: i32) -> (i32, i32) {
    %c0_i32 = arith.constant 0 : i32
    %c0_i32_0 = arith.constant 0 : i32
    return %arg0, %c0_i32 : i32, i32
  }
  func.func @transform_2(%arg0: i32) -> (i32, i32) {
    %c0_i32 = arith.constant 0 : i32
    %c0_i32_0 = arith.constant 0 : i32
    return %arg0, %c0_i32 : i32, i32
  }
  func.func @transform_3(%arg0: i32) -> (i32, i32) {
    %c0_i32 = arith.constant 0 : i32
    %c0_i32_0 = arith.constant 0 : i32
    return %arg0, %c0_i32 : i32, i32
  }
}

module attributes {stable_mosaic.version = 11 : i64} {
  func.func @_planar_kernel(%arg0: i32, %arg1: memref<1x13xf32, #tpu.memory_space<smem>>, %arg2: memref<8x128xf32, #tpu.memory_space<vmem>>, %arg3: memref<8x128xf32, #tpu.memory_space<vmem>>, %arg4: memref<2x8x128xf32, #tpu.memory_space<vmem>>) attributes {dimension_semantics = [#tpu.dimension_semantics<parallel>], iteration_bounds = array<i64: 1>, scalar_prefetch = 0 : i64, scratch_operands = 0 : i64, tpu.core_type = #tpu.core_type<tc>, window_params = [{transform_indices = @transform_0, window_bounds = array<i64: 1, 13>}, {transform_indices = @transform_1, window_bounds = array<i64: 8, 128>}, {transform_indices = @transform_2, window_bounds = array<i64: 8, 128>}, {transform_indices = @transform_3, window_bounds = array<i64: 2, 8, 128>}]} {
    %c0 = arith.constant 0 : index
    %c0_0 = arith.constant 0 : index
    %0 = vector.load %arg2[%c0, %c0_0] : memref<8x128xf32, #tpu.memory_space<vmem>>, vector<8x128xf32>
    %c0_1 = arith.constant 0 : index
    %c0_2 = arith.constant 0 : index
    %1 = vector.load %arg3[%c0_1, %c0_2] : memref<8x128xf32, #tpu.memory_space<vmem>>, vector<8x128xf32>
    %c0_3 = arith.constant 0 : index
    %c0_4 = arith.constant 0 : index
    %2 = memref.load %arg1[%c0_3, %c0_4] : memref<1x13xf32, #tpu.memory_space<smem>>
    %c0_5 = arith.constant 0 : index
    %c1 = arith.constant 1 : index
    %3 = memref.load %arg1[%c0_5, %c1] : memref<1x13xf32, #tpu.memory_space<smem>>
    %c0_6 = arith.constant 0 : index
    %c2 = arith.constant 2 : index
    %4 = memref.load %arg1[%c0_6, %c2] : memref<1x13xf32, #tpu.memory_space<smem>>
    %c0_7 = arith.constant 0 : index
    %c3 = arith.constant 3 : index
    %5 = memref.load %arg1[%c0_7, %c3] : memref<1x13xf32, #tpu.memory_space<smem>>
    %c0_8 = arith.constant 0 : index
    %c4 = arith.constant 4 : index
    %6 = memref.load %arg1[%c0_8, %c4] : memref<1x13xf32, #tpu.memory_space<smem>>
    %c0_9 = arith.constant 0 : index
    %c5 = arith.constant 5 : index
    %7 = memref.load %arg1[%c0_9, %c5] : memref<1x13xf32, #tpu.memory_space<smem>>
    %c0_10 = arith.constant 0 : index
    %c6 = arith.constant 6 : index
    %8 = memref.load %arg1[%c0_10, %c6] : memref<1x13xf32, #tpu.memory_space<smem>>
    %c0_11 = arith.constant 0 : index
    %c7 = arith.constant 7 : index
    %9 = memref.load %arg1[%c0_11, %c7] : memref<1x13xf32, #tpu.memory_space<smem>>
    %c0_12 = arith.constant 0 : index
    %c8 = arith.constant 8 : index
    %10 = memref.load %arg1[%c0_12, %c8] : memref<1x13xf32, #tpu.memory_space<smem>>
    %c0_13 = arith.constant 0 : index
    %c9 = arith.constant 9 : index
    %11 = memref.load %arg1[%c0_13, %c9] : memref<1x13xf32, #tpu.memory_space<smem>>
    %c0_14 = arith.constant 0 : index
    %c10 = arith.constant 10 : index
    %12 = memref.load %arg1[%c0_14, %c10] : memref<1x13xf32, #tpu.memory_space<smem>>
    %c0_15 = arith.constant 0 : index
    %c11 = arith.constant 11 : index
    %13 = memref.load %arg1[%c0_15, %c11] : memref<1x13xf32, #tpu.memory_space<smem>>
    %c0_16 = arith.constant 0 : index
    %c12 = arith.constant 12 : index
    %14 = memref.load %arg1[%c0_16, %c12] : memref<1x13xf32, #tpu.memory_space<smem>>
    %15 = vector.broadcast %2 : f32 to vector<8x128xf32>
    %16 = arith.mulf %0, %15 : vector<8x128xf32>
    %17 = vector.broadcast %3 : f32 to vector<8x128xf32>
    %18 = arith.mulf %1, %17 : vector<8x128xf32>
    %19 = arith.addf %16, %18 : vector<8x128xf32>
    %20 = vector.broadcast %6 : f32 to vector<8x128xf32>
    %21 = arith.addf %19, %20 : vector<8x128xf32>
    %22 = vector.broadcast %4 : f32 to vector<8x128xf32>
    %23 = arith.mulf %0, %22 : vector<8x128xf32>
    %24 = vector.broadcast %5 : f32 to vector<8x128xf32>
    %25 = arith.mulf %1, %24 : vector<8x128xf32>
    %26 = arith.addf %23, %25 : vector<8x128xf32>
    %27 = vector.broadcast %7 : f32 to vector<8x128xf32>
    %28 = arith.addf %26, %27 : vector<8x128xf32>
    %29 = arith.mulf %21, %21 : vector<8x128xf32>
    %30 = vector.broadcast %14 : f32 to vector<8x128xf32>
    %31 = arith.mulf %29, %30 : vector<8x128xf32>
    %32 = vector.broadcast %13 : f32 to vector<8x128xf32>
    %33 = arith.addf %32, %31 : vector<8x128xf32>
    %34 = arith.mulf %29, %33 : vector<8x128xf32>
    %35 = vector.broadcast %12 : f32 to vector<8x128xf32>
    %36 = arith.addf %35, %34 : vector<8x128xf32>
    %37 = arith.mulf %29, %36 : vector<8x128xf32>
    %38 = vector.broadcast %11 : f32 to vector<8x128xf32>
    %39 = arith.addf %38, %37 : vector<8x128xf32>
    %40 = arith.mulf %29, %39 : vector<8x128xf32>
    %41 = vector.broadcast %10 : f32 to vector<8x128xf32>
    %42 = arith.addf %41, %40 : vector<8x128xf32>
    %43 = arith.mulf %21, %42 : vector<8x128xf32>
    %44 = math.cos %28 : vector<8x128xf32>
    %45 = arith.mulf %43, %44 : vector<8x128xf32>
    %46 = vector.broadcast %8 : f32 to vector<8x128xf32>
    %47 = arith.addf %45, %46 : vector<8x128xf32>
    %48 = math.sin %28 : vector<8x128xf32>
    %49 = arith.mulf %43, %48 : vector<8x128xf32>
    %50 = vector.broadcast %9 : f32 to vector<8x128xf32>
    %51 = arith.addf %49, %50 : vector<8x128xf32>
    %c0_17 = arith.constant 0 : index
    %c0_18 = arith.constant 0 : index
    %c0_19 = arith.constant 0 : index
    %52 = vector.load %arg4[%c0_17, %c0_18, %c0_19] : memref<2x8x128xf32, #tpu.memory_space<vmem>>, vector<1x8x128xf32>
    %53 = vector.shape_cast %52 : vector<1x8x128xf32> to vector<8x128xf32>
    %54 = vector.shape_cast %47 : vector<8x128xf32> to vector<1x8x128xf32>
    tpu.vector_store %arg4[%c0_17, %c0_18, %c0_19], %54 {strides = array<i32>} : memref<2x8x128xf32, #tpu.memory_space<vmem>>, vector<1x8x128xf32>,
    %c1_20 = arith.constant 1 : index
    %c0_21 = arith.constant 0 : index
    %c0_22 = arith.constant 0 : index
    %55 = vector.load %arg4[%c1_20, %c0_21, %c0_22] : memref<2x8x128xf32, #tpu.memory_space<vmem>>, vector<1x8x128xf32>
    %56 = vector.shape_cast %55 : vector<1x8x128xf32> to vector<8x128xf32>
    %57 = vector.shape_cast %51 : vector<8x128xf32> to vector<1x8x128xf32>
    tpu.vector_store %arg4[%c1_20, %c0_21, %c0_22], %57 {strides = array<i32>} : memref<2x8x128xf32, #tpu.memory_space<vmem>>, vector<1x8x128xf32>,
    return
  }
  func.func @transform_0(%arg0: i32) -> (i32, i32) {
    %c0_i32 = arith.constant 0 : i32
    %c0_i32_0 = arith.constant 0 : i32
    %c0_i32_1 = arith.constant 0 : i32
    return %c0_i32, %c0_i32_0 : i32, i32
  }
  func.func @transform_1(%arg0: i32) -> (i32, i32) {
    %c0_i32 = arith.constant 0 : i32
    %c0_i32_0 = arith.constant 0 : i32
    return %arg0, %c0_i32 : i32, i32
  }
  func.func @transform_2(%arg0: i32) -> (i32, i32) {
    %c0_i32 = arith.constant 0 : i32
    %c0_i32_0 = arith.constant 0 : i32
    return %arg0, %c0_i32 : i32, i32
  }
  func.func @transform_3(%arg0: i32) -> (i32, i32, i32) {
    %c0_i32 = arith.constant 0 : i32
    %c0_i32_0 = arith.constant 0 : i32
    %c0_i32_1 = arith.constant 0 : i32
    return %c0_i32, %arg0, %c0_i32_0 : i32, i32, i32
  }
}

</mosaic_0001>

<bundles_post_ra>
// kernel: tpu_custom_call.1
= control target key start
LH: loop header
LB: loop body
LE: loop exit
PB: predicated region body
PF: predicated region fallthrough
CT: control target
= control target key end

     0   :  { %8 = vsyncpa [#allocation5], 0  ;;  %s6652_s0 = inlined_call_operand.hbm [shape: f32[1,13], index: 0, kind: input, shape index: {}]   ;;  %s6653_s1 = inlined_call_operand.hbm [shape: f32[8,128], index: 1, kind: input, shape index: {}]   ;;  %s6654_s2 = inlined_call_operand.hbm [shape: f32[8,128], index: 2, kind: input, shape index: {}]   ;;  %s6655_s3 = inlined_call_operand.hbm [shape: f32[8,256], index: 3, kind: output, shape index: {}]  }
   0x1   :  { %9 = vsyncpa [#allocation3], 0 }
   0x2   :  { %10 = vsyncpa [#allocation8], 0 }
   0x3   :  { %11 = vsyncpa [#allocation4], 0  ;;  %s4499_s14 = scalar_lea.hbm %s6652_s0, 16 }
   0x4   :  { %p4500_p0 = scmp.ne.s32.totalorder %s6652_s0, %s4499_s14  ;;  %p4503_p1 = scmp.lt.u32.totalorder %s4499_s14, %s6652_s0 }
   0x6   :  { %p4505_p2 = pnand %p4503_p1, %p4500_p0 }
   0x8   :  { %4508 = shalt.err (!%p4505_p2)
}
   0x9   :  { %s4583_s19 = smov [#allocation2]   ;;  %s4584_s22 = smov [#allocation6]  }
   0xa   :  { %19 = dma.hbm_to_smem %s6652_s0, 16, %s4583_s19, [#allocation5]  }
   0xb   :  { %s26_s23 = sshll.u32 %s4584_s22, 4  ;;  %s4585_s24 = smov [#allocation7]   ;;  %s27_s23 = int_to_ptr.vmem [resolvable:$true] %s26_s23 }
   0xc   :  { %s36_s25 = sshll.u32 %s4585_s24, 4  ;;  %s4509_s28 = scalar_lea.hbm %s6653_s1, 128  ;;  %s37_s25 = int_to_ptr.vmem [resolvable:$true] %s36_s25 }
   0xd   :  { %p4510_p3 = scmp.ne.s32.totalorder %s6653_s1, %s4509_s28  ;;  %p4513_p4 = scmp.lt.u32.totalorder %s4509_s28, %s6653_s1 }
   0xf   :  { %p4515_p5 = pnand %p4513_p4, %p4510_p3 }
  0x11   :  { %4518 = shalt.err (!%p4515_p5)
}
  0x12   :  { %s4519_s0 = scalar_lea.vmem %s27_s23, 128  ;;  %p4524_p7 = scmp.lt.s32.totalorder %s27_s23, %s27_s23 }
  0x13   :  { %p4520_p6 = scmp.ne.s32.totalorder %s27_s23, %s4519_s0  ;;  %p4525_p8 = scmp.lt.s32.totalorder %s4519_s0, %s4519_s0 }
  0x15   :  { %p4526_p9 = por %p4525_p8, %p4524_p7 }
  0x17   :  { %p4527_p10 = pnand %p4526_p9, %p4520_p6 }
  0x19   :  { %4530 = shalt.err (!%p4527_p10)
}
  0x1a   :  { %29 = dma.hbm_to_vmem [thread:$0]  %s6653_s1, 128, %s27_s23, [#allocation3]  }
  0x1b   :  { %s4531_s10 = scalar_lea.hbm %s6654_s2, 128 }
  0x1c   :  { %p4532_p11 = scmp.ne.s32.totalorder %s6654_s2, %s4531_s10  ;;  %p4535_p12 = scmp.lt.u32.totalorder %s4531_s10, %s6654_s2 }
  0x1e   :  { %p4537_p13 = pnand %p4535_p12, %p4532_p11 }
  0x20   :  { %4540 = shalt.err (!%p4537_p13)
}
  0x21   :  { %s4541_s15 = scalar_lea.vmem %s37_s25, 128  ;;  %p4546_p1 = scmp.lt.s32.totalorder %s37_s25, %s37_s25 }
  0x22   :  { %p4542_p0 = scmp.ne.s32.totalorder %s37_s25, %s4541_s15  ;;  %p4547_p2 = scmp.lt.s32.totalorder %s4541_s15, %s4541_s15 }
  0x24   :  { %p4548_p3 = por %p4547_p2, %p4546_p1 }
  0x26   :  { %p4549_p4 = pnand %p4548_p3, %p4542_p0 }
  0x28   :  { %4552 = shalt.err (!%p4549_p4)
}
  0x29   :  { %39 = dma.hbm_to_vmem [thread:$0]  %s6654_s2, 128, %s37_s25, [#allocation8]  }
  0x2a   :  { %4575 = dma.done.wait [#allocation5], 16  }
  0x2b   :  { %4576 = vsyncadd [#allocation5], 4294967280 }
  0x2c   :  { %4577 = dma.done.wait [#allocation3], 128  }
  0x2d   :  { %4578 = vsyncadd [#allocation3], 4294967168 }
  0x2e   :  { %4579 = dma.done.wait [#allocation8], 128  }
  0x2f   :  { %4580 = vsyncadd [#allocation8], 4294967168 }
  0x30   :  { %49 = sfence }
  0x31   :  { %s4397_s17 = sld [smem:[#allocation2 + $0x2]]  ;;  %s4398_s18 = sld [smem:[#allocation2 + $0x3]]  ;;  %v4714_v0 = vld [vmem:[#allocation6] sm:$0xff]  ;;  %v4716_v1 = vld [vmem:[#allocation7] sm:$0xff]  ;;  %v4586_v20 = vmov 683565275  }
  0x32   :  { %s4400_s19 = sld [smem:[#allocation2 + $0x5]]  ;;  %v4587_v22 = vmov 2475754826   ;;  %v4588_v24 = vmov 2131351028   ;;  %s52_s2 = sld [smem:[#allocation2]] }
  0x33   :  { %v4589_v26 = vmov 2102212464   ;;  %v4590_v28 = vmov 920167782   ;;  %v4591_v35 = vmov 1326507024  }
  0x34   :  { %s4396_s20 = sld [smem:[#allocation2 + $0x1]]  ;;  %s4399_s21 = sld [smem:[#allocation2 + $0x4]] }
  0x35   :  { %s4407_s22 = sld [smem:[#allocation2 + $0xc]]  ;;  %s4406_s23 = sld [smem:[#allocation2 + $0xb]] }
  0x36   :  { %s4405_s24 = sld [smem:[#allocation2 + $0xa]]  ;;  %s4404_s25 = sld [smem:[#allocation2 + $0x9]] }
  0x37   :  { %v72_v2 = vstv %s4397_s17  ;;  %v74_v3 = vstv %s4398_s18  ;;  %s4403_s26 = sld [smem:[#allocation2 + $0x8]]  ;;  %s4401_s27 = sld [smem:[#allocation2 + $0x6]] }
  0x38   :  { %v73_v4 = vmul.f32 %v72_v2, %v4714_v0  ;;  %v75_v5 = vmul.f32 %v74_v3, %v4716_v1  ;;  %v77_v6 = vstv %s4400_s19  ;;  %v65_v61 = vstv %s52_s2  ;;  %s4402_s28 = sld [smem:[#allocation2 + $0x7]]  ;;  %s4594_s29 = smov 4  }
  0x39   :  { %v66_v3 = vmul.f32 %v65_v61, %v4714_v0  ;;  %s4595_s30 = smov 2   ;;  %s4596_s4 = smov 8  }
  0x3a   :  { %v76_v7 = vadd.f32 %v75_v5, %v73_v4  ;;  %v67_v62 = vstv %s4396_s20  ;;  %s4597_s5 = smov 6   ;;  %s4598_s0 = smov 12  }
  0x3b   :  { %v68_v4 = vmul.f32 %v67_v62, %v4716_v1  ;;  %v82_v0 = vstv %s4406_s23  ;;  %s4599_s6 = smov 10   ;;  %s4600_s7 = smov 16  }
  0x3c   :  { %v4720_v8 = vadd.f32 %v77_v6, %v76_v7  ;;  %s4601_s8 = smov 14   ;;  %s4602_s9 = smov 20  }
  0x3d   :  { %v69_v7 = vadd.f32 %v68_v4, %v66_v3  ;;  %s4603_s10 = smov 18   ;;  %s4604_s11 = smov 24  }
  0x3e   :  { %v97_v9 = vand.u32 2139095040, %v4720_v8  ;;  %v94_v11 = vand.u32 2147483647, %v4720_v8  ;;  %vm96_vm7 = vcmp.lt.s32.totalorder %v4720_v8, 0  ;;  %vm186_vm12 = vweird.f32 %v4720_v8  ;;  %s4605_s12 = smov 22   ;;  %s4606_s13 = smov 28  }
  0x3f   :  { %s4607_s14 = smov 26   ;;  %s4608_s15 = smov 32  }
  0x40   :  { %v98_v10 = vshrl.u32 %v97_v9, 23  ;;  %v101_v14 = vand.u32 8388607, %v94_v11  ;;  %v70_v9 = vstv %s4399_s21  ;;  %vm95_vm8 = vcmp.le.f32.partialorder %v94_v11, 0.7853982  ;;  %s4609_s1 = smov 30  }
  0x41   :  { %s4610_s16 = smov 36   ;;  %s4611_s17 = smov 34  }
  0x42   :  { %v4408_v12 = vadd.s32 4294967169, %v98_v10  ;;  %v102_v17 = vor.u32 8388608, %v101_v14  ;;  %s4612_s18 = smov 40   ;;  %s4613_s19 = smov 38  }
  0x43   :  { %s4614_s2 = smov 44   ;;  %s4615_s20 = smov 42  }
  0x44   :  { %v104_v13 = vadd.s32 1, %v4408_v12  ;;  %v142_v37 = vshll.u32 %v102_v17, 8  ;;  %v80_v17 = vstv %s4407_s22  ;;  %s4616_s21 = smov 48   ;;  %s4617_s22 = smov 46  }
  0x45   :  { %s4618_s23 = smov 52  }
  0x46   :  { %vm105_vm0 = vcmp.gt.s32.totalorder %v104_v13, 0 }
  0x47   :  { %v106_v15 = vsel %vm105_vm0, %v104_v13, 0  ;;  %v71_v13 = vadd.f32 %v70_v9, %v69_v7  ;;  %vm1379_vm0 = vcmask 7168  }
  0x48   :  { %v108_v16 = vand.u32 31, %v106_v15  ;;  %v107_v18 = vshrl.u32 %v106_v15, 5 }
  0x4a   :  { %v109_v19 = vsub.s32 32, %v108_v16  ;;  %v111_v21 = vshll.u32 %v4586_v20, %v108_v16  ;;  %v114_v23 = vshll.u32 %v4587_v22, %v108_v16  ;;  %v117_v25 = vshll.u32 %v4588_v24, %v108_v16 }
  0x4b   :  { %v120_v27 = vshll.u32 %v4589_v26, %v108_v16  ;;  %v123_v29 = vshll.u32 %v4590_v28, %v108_v16  ;;  %vm126_vm1 = vcmp.lt.s32.totalorder %v107_v18, 1  ;;  %vm127_vm2 = vcmp.lt.s32.totalorder %v107_v18, 2 }
  0x4c   :  { %v110_v30 = vshrl.u32 %v4586_v20, %v109_v19  ;;  %v112_v31 = vshrl.u32 %v4587_v22, %v109_v19  ;;  %v115_v32 = vshrl.u32 %v4588_v24, %v109_v19  ;;  %v118_v33 = vshrl.u32 %v4589_v26, %v109_v19 }
  0x4d   :  { %v121_v34 = vshrl.u32 %v4590_v28, %v109_v19  ;;  %v124_v36 = vshrl.u32 %v4591_v35, %v109_v19  ;;  %vm128_vm3 = vcmp.lt.s32.totalorder %v107_v18, 3  ;;  %vm129_vm4 = vcmp.lt.s32.totalorder %v107_v18, 4 }
  0x4e   :  { %v113_v38 = vor.u32 %v112_v31, %v111_v21  ;;  %v116_v39 = vor.u32 %v115_v32, %v114_v23  ;;  %v119_v40 = vor.u32 %v118_v33, %v117_v25  ;;  %v79_v16 = vmul.f32 %v71_v13, %v71_v13 }
  0x4f   :  { %v122_v41 = vor.u32 %v121_v34, %v120_v27  ;;  %v125_v42 = vor.u32 %v124_v36, %v123_v29  ;;  %v85_v31 = vstv %s4405_s24  ;;  %s4619_s24 = smov 50  }
  0x50   :  { %v130_v43 = vsel %vm126_vm1, %v110_v30, %v113_v38  ;;  %v131_v44 = vsel %vm129_vm4, %v119_v40, 2102212464  ;;  %v134_v45 = vsel %vm126_vm1, %v113_v38, %v116_v39  ;;  %v138_v46 = vsel %vm126_vm1, %v116_v39, %v119_v40 }
  0x51   :  { %v132_v47 = vsel %vm128_vm3, %v116_v39, %v131_v44  ;;  %v135_v48 = vsel %vm129_vm4, %v122_v41, 920167782  ;;  %v139_v49 = vsel %vm129_vm4, %v125_v42, 1326507024  ;;  %v81_v20 = vmul.f32 %v80_v17, %v79_v16 }
  0x52   :  { %v136_v50 = vsel %vm128_vm3, %v119_v40, %v135_v48  ;;  %v140_v51 = vsel %vm128_vm3, %v122_v41, %v139_v49  ;;  %v133_v52 = vsel %vm127_vm2, %v130_v43, %v132_v47  ;;  %v88_v40 = vstv %s4404_s25  ;;  %s6667_s25 = smov 56  }
  0x53   :  { %v137_v53 = vsel %vm127_vm2, %v134_v45, %v136_v50  ;;  %v141_v54 = vsel %vm127_vm2, %v138_v46, %v140_v51  ;;  %v149_v59 = vmul.u32 %v142_v37, %v133_v52  ;;  %v83_v25 = vadd.f32 %v82_v0, %v81_v20 }
  0x54   :  { %v4729_v55 = vmul.u32.u64.low %v142_v37, %v141_v54  ;;  %v4730_v56 = vmul.u32.u64.high %v142_v37, %v141_v54, %v4729_v55  ;;  %v4732_v57 = vmul.u32.u64.low %v142_v37, %v137_v53  ;;  %v4733_v58 = vmul.u32.u64.high %v142_v37, %v137_v53, %v4732_v57 }
  0x55   :  { %v84_v30 = vmul.f32 %v83_v25, %v79_v16  ;;  %v91_v47 = vstv %s4403_s26  ;;  %v307_v49 = vlaneseq  ;;  %s4621_s26 = smov 54   ;;  %vm4188_vm1 = vcmask 15360  }
  0x56   :  { %vm151_vm5 = vc.u32 %v4730_v56, %v4732_v57  ;;  %v152_v60 = vadd.s32 1, %v4733_v58  ;;  %v150_v1 = vadd.s32 %v4732_v57, %v4730_v56  ;;  %vm4190_vm2 = vcmask 31744  }
  0x57   :  { %v86_v35 = vadd.f32 %v85_v31, %v84_v30  ;;  %v4760_v56 = vshrl.u32 %v307_v49, 7  ;;  %vm4192_vm3 = vcmask 48128   ;;  %vm4194_vm4 = vcmask 64512  }
  0x58   :  { %v153_v63 = vsel %vm151_vm5, %v152_v60, %v4733_v58  ;;  %v198_v60 = vstv %s4401_s27  ;;  %s6666_s27 = smov 60   ;;  %vm4196_vm5 = vcmask 80896  }
  0x59   :  { %v154_v2 = vadd.s32 %v153_v63, %v149_v59  ;;  %v87_v39 = vmul.f32 %v86_v35, %v79_v16  ;;  %v6662_v62 = vsub.s32 0, %v4760_v56  ;;  %v6661_v3 = vsub.s32 1, %v4760_v56 }
  0x5a   :  { %v6659_v7 = vsub.s32 3, %v4760_v56  ;;  %v6657_v31 = vsub.s32 5, %v4760_v56  ;;  %v6656_v49 = vsub.s32 6, %v4760_v56 }
  0x5b   :  { %v155_v5 = vadd.s32 536870912, %v154_v2  ;;  %v89_v44 = vadd.f32 %v88_v40, %v87_v39 }
  0x5d   :  { %v156_v6 = vshrl.u32 %v155_v5, 30  ;;  %v90_v46 = vmul.f32 %v89_v44, %v79_v16  ;;  %v6660_v5 = vsub.s32 2, %v4760_v56 }
  0x5f   :  { %v157_v10 = vshll.u32 %v156_v6, 30  ;;  %v180_v38 = vsub.s32 4, %v156_v6  ;;  %v92_v11 = vadd.f32 %v91_v47, %v90_v46 }
  0x61   :  { %v158_v12 = vsub.s32 %v154_v2, %v157_v10  ;;  %v181_v43 = vsel %vm96_vm7, %v180_v38, %v156_v6  ;;  %v4754_v54 = vmul.f32 %v92_v11, %v71_v13 }
  0x62   :  { %v4745_v45 = vsel %vm95_vm8, 0, %v181_v43 }
  0x63   :  { %v160_v14 = vsub.s32 0, %v158_v12  ;;  %v187_v48 = vand.u32 3, %v4745_v45 }
  0x65   :  { %v4409_v15 = vmin.u32 %v160_v14, %v158_v12  ;;  %vm192_vm9 = vcmp.eq.s32.totalorder %v187_v48, 2  ;;  %vm189_vm10 = vcmp.eq.s32.totalorder %v187_v48, 0  ;;  %vm188_vm11 = vcmp.lt.s32.totalorder %v187_v48, 2 }
  0x67   :  { %v162_v18 = vclz %v4409_v15  ;;  %v6658_v15 = vsub.s32 4, %v4760_v56 }
  0x69   :  { %v4410_v19 = vadd.s32 4294967294, %v162_v18 }
  0x6b   :  { %vm4411_vm6 = vcmp.lt.s32.totalorder %v4410_v19, 0 }
  0x6c   :  { %v165_v21 = vsel %vm4411_vm6, 0, %v4410_v19  ;;  %vm4198_vm6 = vcmask 97280  }
  0x6d   :  { %v166_v22 = vsub.s32 32, %v165_v21  ;;  %v167_v23 = vshll.u32 %v158_v12, %v165_v21  ;;  %v170_v24 = vsub.s32 4294967266, %v165_v21 }
  0x6f   :  { %v168_v26 = vshrl.u32 %v150_v1, %v166_v22  ;;  %v171_v27 = vadd.s32 127, %v170_v24 }
  0x71   :  { %v169_v28 = vor.u32 %v168_v26, %v167_v23  ;;  %v172_v29 = vshll.u32 %v171_v27, 23 }
  0x73   :  { %v173_v32 = vor.u32 4788187, %v172_v29  ;;  %v176_v33 = vcvt.s32.f32 %v169_v28 }
  0x75   :  { %v174_v34 = vand.u32 2147483647, %v173_v32 }
  0x77   :  { %v177_v36 = vmul.f32 %v176_v33, %v174_v34 }
  0x79   :  { %v178_v37 = vxor.u32 2147483648, %v177_v36 }
  0x7b   :  { %v179_v41 = vsel %vm96_vm7, %v178_v37, %v177_v36  ;;  %vm4200_vm7 = vcmask 113664  }
  0x7c   :  { %v182_v42 = vsel %vm95_vm8, %v4720_v8, %v179_v41  ;;  %vm4202_vm8 = vcmask 130048  }
  0x7d   :  { %4495 = vcosq.f32 %v182_v42 }
  0x7e   :  { %4497 = vsinq.f32 %v182_v42 }
  0x87   :  { %v4748_v50 = vpop.eup %4495 }
  0x88   :  { %v4750_v51 = vpop.eup %4497  ;;  %v6663_v52 = vxor.u32 2147483648, %v4748_v50 }
  0x89   :  { %v6664_v53 = vxor.u32 2147483648, %v4750_v51 }
  0x8a   :  { %v194_v55 = vsel %vm192_vm9, %v6663_v52, %v4750_v51  ;;  %vm4204_vm9 = vcmask 146432  }
  0x8b   :  { %v191_v57 = vsel %vm189_vm10, %v4748_v50, %v6664_v53  ;;  %vm4206_vm10 = vcmask 162816  }
  0x8c   :  { %v195_v58 = vsel %vm188_vm11, %v191_v57, %v194_v55  ;;  %vm4208_vm11 = vcmask 179200  }
  0x8d   :  { %v196_v59 = vsel %vm186_vm12, nan, %v195_v58 }
  0x8e   :  { %v197_v61 = vmul.f32 %v196_v59, %v4754_v54 }
  0x90   :  { %v4769_v63 = vadd.f32 %v198_v60, %v197_v61 }
  0x92   :  { %v310_v2 = vrot.slane %v4769_v63, %v6662_v62  ;;  %v377_v4 = vrot.slane %v4769_v63, %v6661_v3  ;;  %v444_v6 = vrot.slane %v4769_v63, %v6660_v5  ;;  %v511_v9 = vrot.slane %v4769_v63, %v6659_v7 }
  0x93   :  { %v578_v18 = vrot.slane %v4769_v63, %v6658_v15  ;;  %v645_v34 = vrot.slane %v4769_v63, %v6657_v31  ;;  %v712_v58 = vrot.slane %v4769_v63, %v6656_v49  ;;  %v6665_v3 = vsub.s32 7, %v4760_v56 }
  0x94   :  { %320 = vbcast.lane.b32.xlu1 %v310_v2, 272  ;;  %312 = vbcast.lane.b32.xlu0 %v310_v2, 256 }
  0x95   :  { %v779_v53 = vrot.slane %v4769_v63, %v6665_v3 }
  0x98   :  { %324 = vbcast.lane.b32.xlu1 %v310_v2, 280  ;;  %316 = vbcast.lane.b32.xlu0 %v310_v2, 264 }
  0x9c   :  { %332 = vbcast.lane.b32.xlu1 %v310_v2, 296  ;;  %328 = vbcast.lane.b32.xlu0 %v310_v2, 288 }
  0xa0   :  { %340 = vbcast.lane.b32.xlu1 %v310_v2, 312  ;;  %336 = vbcast.lane.b32.xlu0 %v310_v2, 304 }
  0xa4   :  { %348 = vbcast.lane.b32.xlu1 %v310_v2, 328  ;;  %344 = vbcast.lane.b32.xlu0 %v310_v2, 320 }
  0xa8   :  { %356 = vbcast.lane.b32.xlu1 %v310_v2, 344  ;;  %352 = vbcast.lane.b32.xlu0 %v310_v2, 336 }
  0xac   :  { %364 = vbcast.lane.b32.xlu1 %v310_v2, 360  ;;  %360 = vbcast.lane.b32.xlu0 %v310_v2, 352 }
  0xb0   :  { %372 = vbcast.lane.b32.xlu1 %v310_v2, 376  ;;  %368 = vbcast.lane.b32.xlu0 %v310_v2, 368 }
  0xb4   :  { %383 = vbcast.lane.b32.xlu1 %v377_v4, 264  ;;  %379 = vbcast.lane.b32.xlu0 %v377_v4, 256 }
  0xb8   :  { %391 = vbcast.lane.b32.xlu1 %v377_v4, 280  ;;  %387 = vbcast.lane.b32.xlu0 %v377_v4, 272 }
  0xbc   :  { %399 = vbcast.lane.b32.xlu1 %v377_v4, 296  ;;  %395 = vbcast.lane.b32.xlu0 %v377_v4, 288 }
  0xc0   :  { %407 = vbcast.lane.b32.xlu1 %v377_v4, 312  ;;  %403 = vbcast.lane.b32.xlu0 %v377_v4, 304 }
  0xc4   :  { %415 = vbcast.lane.b32.xlu1 %v377_v4, 328  ;;  %411 = vbcast.lane.b32.xlu0 %v377_v4, 320 }
  0xc8   :  { %423 = vbcast.lane.b32.xlu1 %v377_v4, 344  ;;  %419 = vbcast.lane.b32.xlu0 %v377_v4, 336 }
  0xcc   :  { %431 = vbcast.lane.b32.xlu1 %v377_v4, 360  ;;  %427 = vbcast.lane.b32.xlu0 %v377_v4, 352 }
  0xd0   :  { %439 = vbcast.lane.b32.xlu1 %v377_v4, 376  ;;  %435 = vbcast.lane.b32.xlu0 %v377_v4, 368 }
  0xd4   :  { %450 = vbcast.lane.b32.xlu1 %v444_v6, 264  ;;  %446 = vbcast.lane.b32.xlu0 %v444_v6, 256 }
  0xd8   :  { %458 = vbcast.lane.b32.xlu1 %v444_v6, 280  ;;  %454 = vbcast.lane.b32.xlu0 %v444_v6, 272 }
  0xdc   :  { %466 = vbcast.lane.b32.xlu1 %v444_v6, 296  ;;  %462 = vbcast.lane.b32.xlu0 %v444_v6, 288 }
  0xe0   :  { %474 = vbcast.lane.b32.xlu1 %v444_v6, 312  ;;  %470 = vbcast.lane.b32.xlu0 %v444_v6, 304 }
  0xe4   :  { %482 = vbcast.lane.b32.xlu1 %v444_v6, 328  ;;  %478 = vbcast.lane.b32.xlu0 %v444_v6, 320 }
  0xe8   :  { %490 = vbcast.lane.b32.xlu1 %v444_v6, 344  ;;  %486 = vbcast.lane.b32.xlu0 %v444_v6, 336 }
  0xec   :  { %498 = vbcast.lane.b32.xlu1 %v444_v6, 360  ;;  %494 = vbcast.lane.b32.xlu0 %v444_v6, 352 }
  0xf0   :  { %506 = vbcast.lane.b32.xlu1 %v444_v6, 376  ;;  %502 = vbcast.lane.b32.xlu0 %v444_v6, 368 }
  0xf4   :  { %517 = vbcast.lane.b32.xlu1 %v511_v9, 264  ;;  %513 = vbcast.lane.b32.xlu0 %v511_v9, 256 }
  0xf8   :  { %525 = vbcast.lane.b32.xlu1 %v511_v9, 280  ;;  %521 = vbcast.lane.b32.xlu0 %v511_v9, 272 }
  0xfc   :  { %533 = vbcast.lane.b32.xlu1 %v511_v9, 296  ;;  %529 = vbcast.lane.b32.xlu0 %v511_v9, 288 }
 0x100   :  { %541 = vbcast.lane.b32.xlu1 %v511_v9, 312  ;;  %537 = vbcast.lane.b32.xlu0 %v511_v9, 304 }
 0x104   :  { %549 = vbcast.lane.b32.xlu1 %v511_v9, 328  ;;  %545 = vbcast.lane.b32.xlu0 %v511_v9, 320 }
 0x106   :  { %v4786_v10 = vpop.permute.xlu1 %320  ;;  %v4788_v12 = vpop.permute.xlu0 %312 }
 0x107   :  { %6745 = vst [vmem:[#allocation14_spill] sm:$0xff] %v4786_v10 }
 0x108   :  { %557 = vbcast.lane.b32.xlu1 %v511_v9, 344  ;;  %553 = vbcast.lane.b32.xlu0 %v511_v9, 336 }
 0x10a   :  { %v4790_v13 = vpop.permute.xlu1 %324  ;;  %v4792_v14 = vpop.permute.xlu0 %316 }
 0x10b   :  { %6746 = vst [vmem:[#allocation15_spill] sm:$0xff] %v4790_v13 }
 0x10c   :  { %565 = vbcast.lane.b32.xlu1 %v511_v9, 360  ;;  %561 = vbcast.lane.b32.xlu0 %v511_v9, 352 }
 0x10e   :  { %v4795_v16 = vpop.permute.xlu1 %332  ;;  %v4797_v17 = vpop.permute.xlu0 %328 }
 0x10f   :  { %6747 = vst [vmem:[#allocation16_spill] sm:$0xff] %v4795_v16  ;;  %6748 = vst [vmem:[#allocation17_spill] sm:$0xff] %v4797_v17 }
 0x110   :  { %573 = vbcast.lane.b32.xlu1 %v511_v9, 376  ;;  %569 = vbcast.lane.b32.xlu0 %v511_v9, 368 }
 0x112   :  { %v4802_v19 = vpop.permute.xlu1 %340  ;;  %v4804_v20 = vpop.permute.xlu0 %336 }
 0x113   :  { %6749 = vst [vmem:[#allocation18_spill] sm:$0xff] %v4802_v19  ;;  %6750 = vst [vmem:[#allocation19_spill] sm:$0xff] %v4804_v20 }
 0x114   :  { %584 = vbcast.lane.b32.xlu1 %v578_v18, 264  ;;  %580 = vbcast.lane.b32.xlu0 %v578_v18, 256 }
 0x116   :  { %v4806_v0 = vpop.permute.xlu1 %348  ;;  %v4808_v1 = vpop.permute.xlu0 %344 }
 0x117   :  { %6751 = vst [vmem:[#allocation20_spill] sm:$0xff] %v4806_v0 }
 0x118   :  { %592 = vbcast.lane.b32.xlu1 %v578_v18, 280  ;;  %588 = vbcast.lane.b32.xlu0 %v578_v18, 272 }
 0x11a   :  { %v4810_v21 = vpop.permute.xlu1 %356  ;;  %v4812_v22 = vpop.permute.xlu0 %352 }
 0x11b   :  { %6752 = vst [vmem:[#allocation21_spill] sm:$0xff] %v4810_v21  ;;  %6753 = vst [vmem:[#allocation22_spill] sm:$0xff] %v4812_v22 }
 0x11c   :  { %600 = vbcast.lane.b32.xlu1 %v578_v18, 296  ;;  %596 = vbcast.lane.b32.xlu0 %v578_v18, 288 }
 0x11e   :  { %v4814_v23 = vpop.permute.xlu1 %364  ;;  %v4816_v24 = vpop.permute.xlu0 %360 }
 0x11f   :  { %6754 = vst [vmem:[#allocation23_spill] sm:$0xff] %v4814_v23  ;;  %6755 = vst [vmem:[#allocation24_spill] sm:$0xff] %v4816_v24 }
 0x120   :  { %608 = vbcast.lane.b32.xlu1 %v578_v18, 312  ;;  %604 = vbcast.lane.b32.xlu0 %v578_v18, 304 }
 0x122   :  { %v4818_v25 = vpop.permute.xlu1 %372  ;;  %v4820_v26 = vpop.permute.xlu0 %368 }
 0x123   :  { %6756 = vst [vmem:[#allocation25_spill] sm:$0xff] %v4818_v25  ;;  %6757 = vst [vmem:[#allocation26_spill] sm:$0xff] %v4820_v26 }
 0x124   :  { %616 = vbcast.lane.b32.xlu1 %v578_v18, 328  ;;  %612 = vbcast.lane.b32.xlu0 %v578_v18, 320 }
 0x126   :  { %v4822_v27 = vpop.permute.xlu1 %383  ;;  %v4824_v28 = vpop.permute.xlu0 %379 }
 0x128   :  { %624 = vbcast.lane.b32.xlu1 %v578_v18, 344  ;;  %620 = vbcast.lane.b32.xlu0 %v578_v18, 336 }
 0x12a   :  { %v4826_v29 = vpop.permute.xlu1 %391  ;;  %v4828_v30 = vpop.permute.xlu0 %387 }
 0x12b   :  { %6758 = vst [vmem:[#allocation27_spill] sm:$0xff] %v4826_v29  ;;  %6759 = vst [vmem:[#allocation28_spill] sm:$0xff] %v4828_v30 }
 0x12c   :  { %632 = vbcast.lane.b32.xlu1 %v578_v18, 360  ;;  %628 = vbcast.lane.b32.xlu0 %v578_v18, 352 }
 0x12e   :  { %v4831_v32 = vpop.permute.xlu1 %399  ;;  %v4833_v33 = vpop.permute.xlu0 %395 }
 0x12f   :  { %6760 = vst [vmem:[#allocation29_spill] sm:$0xff] %v4831_v32  ;;  %6761 = vst [vmem:[#allocation30_spill] sm:$0xff] %v4833_v33 }
 0x130   :  { %640 = vbcast.lane.b32.xlu1 %v578_v18, 376  ;;  %636 = vbcast.lane.b32.xlu0 %v578_v18, 368 }
 0x132   :  { %v4838_v35 = vpop.permute.xlu1 %407  ;;  %v4840_v36 = vpop.permute.xlu0 %403 }
 0x133   :  { %6762 = vst [vmem:[#allocation31_spill] sm:$0xff] %v4838_v35  ;;  %6763 = vst [vmem:[#allocation32_spill] sm:$0xff] %v4840_v36 }
 0x134   :  { %651 = vbcast.lane.b32.xlu1 %v645_v34, 264  ;;  %647 = vbcast.lane.b32.xlu0 %v645_v34, 256 }
 0x136   :  { %v4842_v37 = vpop.permute.xlu1 %415  ;;  %v4844_v38 = vpop.permute.xlu0 %411 }
 0x137   :  { %6764 = vst [vmem:[#allocation33_spill] sm:$0xff] %v4842_v37 }
 0x138   :  { %659 = vbcast.lane.b32.xlu1 %v645_v34, 280  ;;  %655 = vbcast.lane.b32.xlu0 %v645_v34, 272 }
 0x13a   :  { %v4846_v39 = vpop.permute.xlu1 %423  ;;  %v4848_v40 = vpop.permute.xlu0 %419 }
 0x13b   :  { %6765 = vst [vmem:[#allocation34_spill] sm:$0xff] %v4846_v39  ;;  %6766 = vst [vmem:[#allocation35_spill] sm:$0xff] %v4848_v40 }
 0x13c   :  { %667 = vbcast.lane.b32.xlu1 %v645_v34, 296  ;;  %663 = vbcast.lane.b32.xlu0 %v645_v34, 288 }
 0x13e   :  { %v4850_v41 = vpop.permute.xlu1 %431  ;;  %v4852_v42 = vpop.permute.xlu0 %427 }
 0x13f   :  { %6767 = vst [vmem:[#allocation36_spill] sm:$0xff] %v4850_v41  ;;  %6768 = vst [vmem:[#allocation37_spill] sm:$0xff] %v4852_v42 }
 0x140   :  { %675 = vbcast.lane.b32.xlu1 %v645_v34, 312  ;;  %671 = vbcast.lane.b32.xlu0 %v645_v34, 304 }
 0x142   :  { %v4854_v43 = vpop.permute.xlu1 %439  ;;  %v4856_v44 = vpop.permute.xlu0 %435 }
 0x143   :  { %6769 = vst [vmem:[#allocation38_spill] sm:$0xff] %v4854_v43  ;;  %6770 = vst [vmem:[#allocation39_spill] sm:$0xff] %v4856_v44 }
 0x144   :  { %683 = vbcast.lane.b32.xlu1 %v645_v34, 328  ;;  %679 = vbcast.lane.b32.xlu0 %v645_v34, 320 }
 0x146   :  { %v4858_v46 = vpop.permute.xlu1 %450  ;;  %v4860_v47 = vpop.permute.xlu0 %446 }
 0x148   :  { %691 = vbcast.lane.b32.xlu1 %v645_v34, 344  ;;  %687 = vbcast.lane.b32.xlu0 %v645_v34, 336 }
 0x14a   :  { %v4862_v48 = vpop.permute.xlu1 %458  ;;  %v4864_v11 = vpop.permute.xlu0 %454 }
 0x14b   :  { %6771 = vst [vmem:[#allocation40_spill] sm:$0xff] %v4862_v48  ;;  %6772 = vst [vmem:[#allocation41_spill] sm:$0xff] %v4864_v11 }
 0x14c   :  { %699 = vbcast.lane.b32.xlu1 %v645_v34, 360  ;;  %695 = vbcast.lane.b32.xlu0 %v645_v34, 352 }
 0x14e   :  { %v4867_v55 = vpop.permute.xlu1 %466  ;;  %v4869_v57 = vpop.permute.xlu0 %462 }
 0x14f   :  { %6773 = vst [vmem:[#allocation42_spill] sm:$0xff] %v4867_v55  ;;  %6774 = vst [vmem:[#allocation43_spill] sm:$0xff] %v4869_v57 }
 0x150   :  { %707 = vbcast.lane.b32.xlu1 %v645_v34, 376  ;;  %703 = vbcast.lane.b32.xlu0 %v645_v34, 368 }
 0x152   :  { %v4874_v59 = vpop.permute.xlu1 %474  ;;  %v4876_v60 = vpop.permute.xlu0 %470 }
 0x153   :  { %6775 = vst [vmem:[#allocation44_spill] sm:$0xff] %v4874_v59  ;;  %6776 = vst [vmem:[#allocation45_spill] sm:$0xff] %v4876_v60 }
 0x154   :  { %718 = vbcast.lane.b32.xlu1 %v712_v58, 264  ;;  %714 = vbcast.lane.b32.xlu0 %v712_v58, 256 }
 0x156   :  { %v4878_v61 = vpop.permute.xlu1 %482  ;;  %v4880_v2 = vpop.permute.xlu0 %478 }
 0x157   :  { %6777 = vst [vmem:[#allocation46_spill] sm:$0xff] %v4878_v61 }
 0x158   :  { %726 = vbcast.lane.b32.xlu1 %v712_v58, 280  ;;  %722 = vbcast.lane.b32.xlu0 %v712_v58, 272 }
 0x15a   :  { %v4882_v4 = vpop.permute.xlu1 %490  ;;  %v4884_v6 = vpop.permute.xlu0 %486 }
 0x15b   :  { %6778 = vst [vmem:[#allocation47_spill] sm:$0xff] %v4882_v4  ;;  %6779 = vst [vmem:[#allocation48_spill] sm:$0xff] %v4884_v6 }
 0x15c   :  { %734 = vbcast.lane.b32.xlu1 %v712_v58, 296  ;;  %730 = vbcast.lane.b32.xlu0 %v712_v58, 288 }
 0x15e   :  { %v4886_v9 = vpop.permute.xlu1 %498  ;;  %v4888_v18 = vpop.permute.xlu0 %494 }
 0x15f   :  { %6780 = vst [vmem:[#allocation49_spill] sm:$0xff] %v4886_v9  ;;  %6781 = vst [vmem:[#allocation50_spill] sm:$0xff] %v4888_v18 }
 0x160   :  { %742 = vbcast.lane.b32.xlu1 %v712_v58, 312  ;;  %738 = vbcast.lane.b32.xlu0 %v712_v58, 304 }
 0x162   :  { %v4890_v34 = vpop.permute.xlu1 %506  ;;  %v4892_v49 = vpop.permute.xlu0 %502 }
 0x163   :  { %6782 = vst [vmem:[#allocation51_spill] sm:$0xff] %v4890_v34  ;;  %6783 = vst [vmem:[#allocation52_spill] sm:$0xff] %v4892_v49  ;;  %v293_v34 = vadd.s32 3, %v4745_v45  ;;  %v6794_v45 = vxor.u32 2147483648, %v4750_v51 }
 0x164   :  { %750 = vbcast.lane.b32.xlu1 %v712_v58, 328  ;;  %746 = vbcast.lane.b32.xlu0 %v712_v58, 320 }
 0x165   :  { %v294_v26 = vand.u32 3, %v293_v34  ;;  %v6795_v34 = vxor.u32 2147483648, %v4748_v50 }
 0x166   :  { %v4894_v31 = vpop.permute.xlu1 %517  ;;  %v4896_v15 = vpop.permute.xlu0 %513 }
 0x167   :  { %vm296_vm13 = vcmp.eq.s32.totalorder %v294_v26, 0  ;;  %vm299_vm14 = vcmp.eq.s32.totalorder %v294_v26, 2  ;;  %vm295_vm15 = vcmp.lt.s32.totalorder %v294_v26, 2 }
 0x168   :  { %758 = vbcast.lane.b32.xlu1 %v712_v58, 344  ;;  %754 = vbcast.lane.b32.xlu0 %v712_v58, 336  ;;  %v298_v9 = vsel %vm296_vm13, %v4748_v50, %v6794_v45  ;;  %v301_v42 = vsel %vm299_vm14, %v6795_v34, %v4750_v51  ;;  %v305_v51 = vstv %s4402_s28  ;;  %s6670_s28 = smov 58   ;;  %vm6698_vm13 = vcmask 211968  }
 0x169   :  { %v302_v39 = vsel %vm295_vm15, %v298_v9, %v301_v42  ;;  %vm6701_vm14 = vcmask 228352   ;;  %vm6700_vm15 = vcmask 244736  }
 0x16a   :  { %v4898_v7 = vpop.permute.xlu1 %525  ;;  %v4900_v5 = vpop.permute.xlu0 %521  ;;  %v303_v26 = vsel %vm186_vm12, nan, %v302_v39  ;;  %v6802_v39 = vsub.s32 0, %v4760_v56  ;;  %vm6699_vm12 = vcmask 195584  }
 0x16b   :  { %6784 = vst [vmem:[#allocation53_spill] sm:$0xff] %v4898_v7  ;;  %v304_v50 = vmul.f32 %v303_v26, %v4754_v54 }
 0x16c   :  { %766 = vbcast.lane.b32.xlu1 %v712_v58, 360  ;;  %762 = vbcast.lane.b32.xlu0 %v712_v58, 352 }
 0x16d   :  { %v4948_v42 = vadd.f32 %v305_v51, %v304_v50 }
 0x16e   :  { %v4903_v62 = vpop.permute.xlu1 %533  ;;  %v4905_v52 = vpop.permute.xlu0 %529 }
 0x16f   :  { %6785 = vst [vmem:[#allocation54_spill] sm:$0xff] %v4903_v62  ;;  %6786 = vst [vmem:[#allocation55_spill] sm:$0xff] %v4905_v52 }
 0x170   :  { %774 = vbcast.lane.b32.xlu1 %v712_v58, 376  ;;  %770 = vbcast.lane.b32.xlu0 %v712_v58, 368 }
 0x172   :  { %v4910_v43 = vpop.permute.xlu1 %541  ;;  %v4912_v25 = vpop.permute.xlu0 %537 }
 0x173   :  { %6787 = vst [vmem:[#allocation56_spill] sm:$0xff] %v4910_v43  ;;  %6788 = vst [vmem:[#allocation57_spill] sm:$0xff] %v4912_v25 }
 0x174   :  { %785 = vbcast.lane.b32.xlu1 %v779_v53, 264  ;;  %781 = vbcast.lane.b32.xlu0 %v779_v53, 256 }
 0x176   :  { %v4915_v44 = vpop.permute.xlu1 %549  ;;  %v4917_v49 = vpop.permute.xlu0 %545 }
 0x177   :  { %6789 = vst [vmem:[#allocation58_spill] sm:$0xff] %v4915_v44 }
 0x178   :  { %793 = vbcast.lane.b32.xlu1 %v779_v53, 280  ;;  %789 = vbcast.lane.b32.xlu0 %v779_v53, 272 }
 0x17a   :  { %v4919_v58 = vpop.permute.xlu1 %557  ;;  %v4921_v41 = vpop.permute.xlu0 %553 }
 0x17b   :  { %6790 = vst [vmem:[#allocation59_spill] sm:$0xff] %v4919_v58  ;;  %6791 = vst [vmem:[#allocation60_spill] sm:$0xff] %v4921_v41 }
 0x17c   :  { %801 = vbcast.lane.b32.xlu1 %v779_v53, 296  ;;  %797 = vbcast.lane.b32.xlu0 %v779_v53, 288 }
 0x17e   :  { %v4923_v63 = vpop.permute.xlu1 %565  ;;  %v4925_v3 = vpop.permute.xlu0 %561 }
 0x17f   :  { %6792 = vst [vmem:[#allocation61_spill] sm:$0xff] %v4923_v63  ;;  %6793 = vst [vmem:[#allocation62_spill] sm:$0xff] %v4925_v3 }
 0x180   :  { %809 = vbcast.lane.b32.xlu1 %v779_v53, 312  ;;  %805 = vbcast.lane.b32.xlu0 %v779_v53, 304 }
 0x182   :  { %v4933_v18 = vpop.permute.xlu1 %573  ;;  %v4935_v24 = vpop.permute.xlu0 %569 }
 0x183   :  { %6796 = vst [vmem:[#allocation63_spill] sm:$0xff] %v4933_v18  ;;  %6797 = vst [vmem:[#allocation64_spill] sm:$0xff] %v4935_v24  ;;  %v846_v24 = vrot.slane %v4948_v42, %v6802_v39 }
 0x184   :  { %817 = vbcast.lane.b32.xlu1 %v779_v53, 328  ;;  %813 = vbcast.lane.b32.xlu0 %v779_v53, 320 }
 0x186   :  { %v4939_v63 = vpop.permute.xlu1 %584  ;;  %v4941_v45 = vpop.permute.xlu0 %580 }
 0x188   :  { %825 = vbcast.lane.b32.xlu1 %v779_v53, 344  ;;  %821 = vbcast.lane.b32.xlu0 %v779_v53, 336 }
 0x18a   :  { %v4944_v34 = vpop.permute.xlu1 %592  ;;  %v4946_v18 = vpop.permute.xlu0 %588 }
 0x18b   :  { %6798 = vst [vmem:[#allocation65_spill] sm:$0xff] %v4944_v34  ;;  %6799 = vst [vmem:[#allocation66_spill] sm:$0xff] %v4946_v18 }
 0x18c   :  { %833 = vbcast.lane.b32.xlu1 %v779_v53, 360  ;;  %829 = vbcast.lane.b32.xlu0 %v779_v53, 352 }
 0x18e   :  { %v4950_v9 = vpop.permute.xlu1 %600  ;;  %v4952_v8 = vpop.permute.xlu0 %596 }
 0x18f   :  { %6800 = vst [vmem:[#allocation67_spill] sm:$0xff] %v4950_v9  ;;  %6801 = vst [vmem:[#allocation68_spill] sm:$0xff] %v4952_v8 }
 0x190   :  { %841 = vbcast.lane.b32.xlu1 %v779_v53, 376  ;;  %837 = vbcast.lane.b32.xlu0 %v779_v53, 368 }
 0x192   :  { %v4957_v54 = vpop.permute.xlu1 %608  ;;  %v4959_v26 = vpop.permute.xlu0 %604 }
 0x193   :  { %6803 = vst [vmem:[#allocation69_spill] sm:$0xff] %v4957_v54  ;;  %6804 = vst [vmem:[#allocation70_spill] sm:$0xff] %v4959_v26 }
 0x194   :  { %852 = vbcast.lane.b32.xlu1 %v846_v24, 264  ;;  %848 = vbcast.lane.b32.xlu0 %v846_v24, 256 }
 0x196   :  { %v4961_v3 = vpop.permute.xlu1 %616  ;;  %v4963_v50 = vpop.permute.xlu0 %612 }
 0x197   :  { %6805 = vst [vmem:[#allocation71_spill] sm:$0xff] %v4961_v3 }
 0x198   :  { %860 = vbcast.lane.b32.xlu1 %v846_v24, 280  ;;  %856 = vbcast.lane.b32.xlu0 %v846_v24, 272 }
 0x19a   :  { %v4965_v51 = vpop.permute.xlu1 %624  ;;  %v4967_v23 = vpop.permute.xlu0 %620 }
 0x19b   :  { %6806 = vst [vmem:[#allocation72_spill] sm:$0xff] %v4965_v51  ;;  %6807 = vst [vmem:[#allocation73_spill] sm:$0xff] %v4967_v23 }
 0x19c   :  { %868 = vbcast.lane.b32.xlu1 %v846_v24, 296  ;;  %864 = vbcast.lane.b32.xlu0 %v846_v24, 288 }
 0x19e   :  { %v4969_v53 = vpop.permute.xlu1 %632  ;;  %v4971_v39 = vpop.permute.xlu0 %628 }
 0x19f   :  { %6808 = vst [vmem:[#allocation74_spill] sm:$0xff] %v4969_v53  ;;  %6809 = vst [vmem:[#allocation75_spill] sm:$0xff] %v4971_v39 }
 0x1a0   :  { %876 = vbcast.lane.b32.xlu1 %v846_v24, 312  ;;  %872 = vbcast.lane.b32.xlu0 %v846_v24, 304 }
 0x1a2   :  { %v4973_v58 = vpop.permute.xlu1 %640  ;;  %v4975_v4 = vpop.permute.xlu0 %636 }
 0x1a3   :  { %6810 = vst [vmem:[#allocation76_spill] sm:$0xff] %v4973_v58  ;;  %6811 = vst [vmem:[#allocation77_spill] sm:$0xff] %v4975_v4  ;;  %v6815_v58 = vsub.s32 1, %v4760_v56 }
 0x1a4   :  { %884 = vbcast.lane.b32.xlu1 %v846_v24, 328  ;;  %880 = vbcast.lane.b32.xlu0 %v846_v24, 320 }
 0x1a5   :  { %v913_v4 = vrot.slane %v4948_v42, %v6815_v58 }
 0x1a6   :  { %v4977_v40 = vpop.permute.xlu1 %651  ;;  %v4979_v41 = vpop.permute.xlu0 %647 }
 0x1a8   :  { %892 = vbcast.lane.b32.xlu1 %v846_v24, 344  ;;  %888 = vbcast.lane.b32.xlu0 %v846_v24, 336 }
 0x1aa   :  { %v4981_v51 = vpop.permute.xlu1 %659  ;;  %v4983_v23 = vpop.permute.xlu0 %655 }
 0x1ab   :  { %6812 = vst [vmem:[#allocation78_spill] sm:$0xff] %v4981_v51 }
 0x1ac   :  { %900 = vbcast.lane.b32.xlu1 %v846_v24, 360  ;;  %896 = vbcast.lane.b32.xlu0 %v846_v24, 352 }
 0x1ae   :  { %v4985_v53 = vpop.permute.xlu1 %667  ;;  %v4987_v39 = vpop.permute.xlu0 %663 }
 0x1af   :  { %6813 = vst [vmem:[#allocation79_spill] sm:$0xff] %v4985_v53  ;;  %6814 = vst [vmem:[#allocation80_spill] sm:$0xff] %v4987_v39 }
 0x1b0   :  { %908 = vbcast.lane.b32.xlu1 %v846_v24, 376  ;;  %904 = vbcast.lane.b32.xlu0 %v846_v24, 368 }
 0x1b2   :  { %v4992_v6 = vpop.permute.xlu1 %675  ;;  %v4994_v22 = vpop.permute.xlu0 %671 }
 0x1b3   :  { %6816 = vst [vmem:[#allocation81_spill] sm:$0xff] %v4992_v6  ;;  %6817 = vst [vmem:[#allocation82_spill] sm:$0xff] %v4994_v22 }
 0x1b4   :  { %919 = vbcast.lane.b32.xlu1 %v913_v4, 264  ;;  %915 = vbcast.lane.b32.xlu0 %v913_v4, 256 }
 0x1b6   :  { %v4996_v21 = vpop.permute.xlu1 %683  ;;  %v4998_v37 = vpop.permute.xlu0 %679 }
 0x1b7   :  { %6818 = vst [vmem:[#allocation83_spill] sm:$0xff] %v4996_v21 }
 0x1b8   :  { %927 = vbcast.lane.b32.xlu1 %v913_v4, 280  ;;  %923 = vbcast.lane.b32.xlu0 %v913_v4, 272 }
 0x1ba   :  { %v5000_v3 = vpop.permute.xlu1 %691  ;;  %v5002_v44 = vpop.permute.xlu0 %687 }
 0x1bb   :  { %6819 = vst [vmem:[#allocation84_spill] sm:$0xff] %v5000_v3  ;;  %6820 = vst [vmem:[#allocation85_spill] sm:$0xff] %v5002_v44 }
 0x1bc   :  { %935 = vbcast.lane.b32.xlu1 %v913_v4, 296  ;;  %931 = vbcast.lane.b32.xlu0 %v913_v4, 288 }
 0x1be   :  { %v5004_v24 = vpop.permute.xlu1 %699  ;;  %v5006_v58 = vpop.permute.xlu0 %695 }
 0x1bf   :  { %6821 = vst [vmem:[#allocation86_spill] sm:$0xff] %v5004_v24  ;;  %6822 = vst [vmem:[#allocation87_spill] sm:$0xff] %v5006_v58 }
 0x1c0   :  { %943 = vbcast.lane.b32.xlu1 %v913_v4, 312  ;;  %939 = vbcast.lane.b32.xlu0 %v913_v4, 304 }
 0x1c2   :  { %v5008_v61 = vpop.permute.xlu1 %707  ;;  %v5010_v0 = vpop.permute.xlu0 %703 }
 0x1c3   :  { %6823 = vst [vmem:[#allocation88_spill] sm:$0xff] %v5008_v61  ;;  %6824 = vst [vmem:[#allocation89_spill] sm:$0xff] %v5010_v0  ;;  %v6829_v61 = vsub.s32 2, %v4760_v56 }
 0x1c4   :  { %951 = vbcast.lane.b32.xlu1 %v913_v4, 328  ;;  %947 = vbcast.lane.b32.xlu0 %v913_v4, 320 }
 0x1c5   :  { %v980_v0 = vrot.slane %v4948_v42, %v6829_v61 }
 0x1c6   :  { %v5012_v21 = vpop.permute.xlu1 %718  ;;  %v5014_v54 = vpop.permute.xlu0 %714 }
 0x1c8   :  { %959 = vbcast.lane.b32.xlu1 %v913_v4, 344  ;;  %955 = vbcast.lane.b32.xlu0 %v913_v4, 336 }
 0x1ca   :  { %v5016_v3 = vpop.permute.xlu1 %726  ;;  %v5018_v44 = vpop.permute.xlu0 %722 }
 0x1cb   :  { %6825 = vst [vmem:[#allocation90_spill] sm:$0xff] %v5016_v3  ;;  %6826 = vst [vmem:[#allocation91_spill] sm:$0xff] %v5018_v44 }
 0x1cc   :  { %967 = vbcast.lane.b32.xlu1 %v913_v4, 360  ;;  %963 = vbcast.lane.b32.xlu0 %v913_v4, 352 }
 0x1ce   :  { %v5020_v24 = vpop.permute.xlu1 %734  ;;  %v5022_v58 = vpop.permute.xlu0 %730 }
 0x1cf   :  { %6827 = vst [vmem:[#allocation92_spill] sm:$0xff] %v5020_v24  ;;  %6828 = vst [vmem:[#allocation93_spill] sm:$0xff] %v5022_v58 }
 0x1d0   :  { %975 = vbcast.lane.b32.xlu1 %v913_v4, 376  ;;  %971 = vbcast.lane.b32.xlu0 %v913_v4, 368 }
 0x1d2   :  { %v5027_v35 = vpop.permute.xlu1 %742  ;;  %v5029_v19 = vpop.permute.xlu0 %738 }
 0x1d3   :  { %6830 = vst [vmem:[#allocation94_spill] sm:$0xff] %v5027_v35  ;;  %6831 = vst [vmem:[#allocation95_spill] sm:$0xff] %v5029_v19 }
 0x1d4   :  { %986 = vbcast.lane.b32.xlu1 %v980_v0, 264  ;;  %982 = vbcast.lane.b32.xlu0 %v980_v0, 256 }
 0x1d6   :  { %v5031_v6 = vpop.permute.xlu1 %750  ;;  %v5033_v43 = vpop.permute.xlu0 %746 }
 0x1d7   :  { %6832 = vst [vmem:[#allocation96_spill] sm:$0xff] %v5031_v6 }
 0x1d8   :  { %994 = vbcast.lane.b32.xlu1 %v980_v0, 280  ;;  %990 = vbcast.lane.b32.xlu0 %v980_v0, 272 }
 0x1da   :  { %v5035_v59 = vpop.permute.xlu1 %758  ;;  %v5037_v26 = vpop.permute.xlu0 %754 }
 0x1db   :  { %6833 = vst [vmem:[#allocation97_spill] sm:$0xff] %v5035_v59  ;;  %6834 = vst [vmem:[#allocation98_spill] sm:$0xff] %v5037_v26 }
 0x1dc   :  { %1002 = vbcast.lane.b32.xlu1 %v980_v0, 296  ;;  %998 = vbcast.lane.b32.xlu0 %v980_v0, 288 }
 0x1de   :  { %v5039_v4 = vpop.permute.xlu1 %766  ;;  %v5041_v61 = vpop.permute.xlu0 %762 }
 0x1df   :  { %6835 = vst [vmem:[#allocation99_spill] sm:$0xff] %v5039_v4  ;;  %6836 = vst [vmem:[#allocation100_spill] sm:$0xff] %v5041_v61 }
 0x1e0   :  { %1010 = vbcast.lane.b32.xlu1 %v980_v0, 312  ;;  %1006 = vbcast.lane.b32.xlu0 %v980_v0, 304 }
 0x1e2   :  { %v5043_v35 = vpop.permute.xlu1 %774  ;;  %v5045_v36 = vpop.permute.xlu0 %770 }
 0x1e3   :  { %6837 = vst [vmem:[#allocation101_spill] sm:$0xff] %v5043_v35  ;;  %6838 = vst [vmem:[#allocation102_spill] sm:$0xff] %v5045_v36  ;;  %v6842_v35 = vsub.s32 3, %v4760_v56 }
 0x1e4   :  { %1018 = vbcast.lane.b32.xlu1 %v980_v0, 328  ;;  %1014 = vbcast.lane.b32.xlu0 %v980_v0, 320 }
 0x1e5   :  { %v1047_v36 = vrot.slane %v4948_v42, %v6842_v35 }
 0x1e6   :  { %v5047_v6 = vpop.permute.xlu1 %785  ;;  %v5049_v20 = vpop.permute.xlu0 %781 }
 0x1e8   :  { %1026 = vbcast.lane.b32.xlu1 %v980_v0, 344  ;;  %1022 = vbcast.lane.b32.xlu0 %v980_v0, 336 }
 0x1ea   :  { %v5051_v59 = vpop.permute.xlu1 %793  ;;  %v5053_v26 = vpop.permute.xlu0 %789 }
 0x1eb   :  { %6839 = vst [vmem:[#allocation103_spill] sm:$0xff] %v5051_v59 }
 0x1ec   :  { %1034 = vbcast.lane.b32.xlu1 %v980_v0, 360  ;;  %1030 = vbcast.lane.b32.xlu0 %v980_v0, 352 }
 0x1ee   :  { %v5055_v4 = vpop.permute.xlu1 %801  ;;  %v5057_v61 = vpop.permute.xlu0 %797 }
 0x1ef   :  { %6840 = vst [vmem:[#allocation104_spill] sm:$0xff] %v5055_v4  ;;  %6841 = vst [vmem:[#allocation105_spill] sm:$0xff] %v5057_v61 }
 0x1f0   :  { %1042 = vbcast.lane.b32.xlu1 %v980_v0, 376  ;;  %1038 = vbcast.lane.b32.xlu0 %v980_v0, 368 }
 0x1f2   :  { %v5062_v19 = vpop.permute.xlu1 %809  ;;  %v5064_v22 = vpop.permute.xlu0 %805 }
 0x1f3   :  { %6843 = vst [vmem:[#allocation106_spill] sm:$0xff] %v5062_v19  ;;  %6844 = vst [vmem:[#allocation107_spill] sm:$0xff] %v5064_v22 }
 0x1f4   :  { %1053 = vbcast.lane.b32.xlu1 %v1047_v36, 264  ;;  %1049 = vbcast.lane.b32.xlu0 %v1047_v36, 256 }
 0x1f6   :  { %v5066_v25 = vpop.permute.xlu1 %817  ;;  %v5068_v60 = vpop.permute.xlu0 %813 }
 0x1f7   :  { %6845 = vst [vmem:[#allocation108_spill] sm:$0xff] %v5066_v25 }
 0x1f8   :  { %1061 = vbcast.lane.b32.xlu1 %v1047_v36, 280  ;;  %1057 = vbcast.lane.b32.xlu0 %v1047_v36, 272 }
 0x1fa   :  { %v5070_v9 = vpop.permute.xlu1 %825  ;;  %v5072_v32 = vpop.permute.xlu0 %821 }
 0x1fb   :  { %6846 = vst [vmem:[#allocation109_spill] sm:$0xff] %v5070_v9  ;;  %6847 = vst [vmem:[#allocation110_spill] sm:$0xff] %v5072_v32 }
 0x1fc   :  { %1069 = vbcast.lane.b32.xlu1 %v1047_v36, 296  ;;  %1065 = vbcast.lane.b32.xlu0 %v1047_v36, 288 }
 0x1fe   :  { %v5074_v0 = vpop.permute.xlu1 %833  ;;  %v5076_v35 = vpop.permute.xlu0 %829 }
 0x1ff   :  { %6848 = vst [vmem:[#allocation111_spill] sm:$0xff] %v5074_v0  ;;  %6849 = vst [vmem:[#allocation112_spill] sm:$0xff] %v5076_v35 }
 0x200   :  { %1077 = vbcast.lane.b32.xlu1 %v1047_v36, 312  ;;  %1073 = vbcast.lane.b32.xlu0 %v1047_v36, 304 }
 0x202   :  { %v5078_v19 = vpop.permute.xlu1 %841  ;;  %v5080_v22 = vpop.permute.xlu0 %837 }
 0x203   :  { %6850 = vst [vmem:[#allocation113_spill] sm:$0xff] %v5078_v19  ;;  %6851 = vst [vmem:[#allocation114_spill] sm:$0xff] %v5080_v22  ;;  %v6856_v19 = vsub.s32 4, %v4760_v56 }
 0x204   :  { %1085 = vbcast.lane.b32.xlu1 %v1047_v36, 328  ;;  %1081 = vbcast.lane.b32.xlu0 %v1047_v36, 320 }
 0x205   :  { %v1114_v22 = vrot.slane %v4948_v42, %v6856_v19 }
 0x206   :  { %v5082_v25 = vpop.permute.xlu1 %852  ;;  %v5084_v16 = vpop.permute.xlu0 %848 }
 0x208   :  { %1093 = vbcast.lane.b32.xlu1 %v1047_v36, 344  ;;  %1089 = vbcast.lane.b32.xlu0 %v1047_v36, 336 }
 0x20a   :  { %v5086_v9 = vpop.permute.xlu1 %860  ;;  %v5088_v32 = vpop.permute.xlu0 %856 }
 0x20b   :  { %6852 = vst [vmem:[#allocation115_spill] sm:$0xff] %v5086_v9  ;;  %6853 = vst [vmem:[#allocation116_spill] sm:$0xff] %v5088_v32 }
 0x20c   :  { %1101 = vbcast.lane.b32.xlu1 %v1047_v36, 360  ;;  %1097 = vbcast.lane.b32.xlu0 %v1047_v36, 352 }
 0x20e   :  { %v5090_v0 = vpop.permute.xlu1 %868  ;;  %v5092_v35 = vpop.permute.xlu0 %864 }
 0x20f   :  { %6854 = vst [vmem:[#allocation117_spill] sm:$0xff] %v5090_v0  ;;  %6855 = vst [vmem:[#allocation118_spill] sm:$0xff] %v5092_v35 }
 0x210   :  { %1109 = vbcast.lane.b32.xlu1 %v1047_v36, 376  ;;  %1105 = vbcast.lane.b32.xlu0 %v1047_v36, 368 }
 0x212   :  { %v5097_v24 = vpop.permute.xlu1 %876  ;;  %v5099_v53 = vpop.permute.xlu0 %872 }
 0x213   :  { %6857 = vst [vmem:[#allocation119_spill] sm:$0xff] %v5097_v24  ;;  %6858 = vst [vmem:[#allocation120_spill] sm:$0xff] %v5099_v53 }
 0x214   :  { %1120 = vbcast.lane.b32.xlu1 %v1114_v22, 264  ;;  %1116 = vbcast.lane.b32.xlu0 %v1114_v22, 256 }
 0x216   :  { %v5101_v62 = vpop.permute.xlu1 %884  ;;  %v5103_v4 = vpop.permute.xlu0 %880 }
 0x217   :  { %6859 = vst [vmem:[#allocation121_spill] sm:$0xff] %v5101_v62 }
 0x218   :  { %1128 = vbcast.lane.b32.xlu1 %v1114_v22, 280  ;;  %1124 = vbcast.lane.b32.xlu0 %v1114_v22, 272 }
 0x21a   :  { %v5105_v0 = vpop.permute.xlu1 %892  ;;  %v5107_v55 = vpop.permute.xlu0 %888 }
 0x21b   :  { %6860 = vst [vmem:[#allocation122_spill] sm:$0xff] %v5105_v0  ;;  %6861 = vst [vmem:[#allocation123_spill] sm:$0xff] %v5107_v55 }
 0x21c   :  { %1136 = vbcast.lane.b32.xlu1 %v1114_v22, 296  ;;  %1132 = vbcast.lane.b32.xlu0 %v1114_v22, 288 }
 0x21e   :  { %v5109_v36 = vpop.permute.xlu1 %900  ;;  %v5111_v19 = vpop.permute.xlu0 %896 }
 0x21f   :  { %6862 = vst [vmem:[#allocation124_spill] sm:$0xff] %v5109_v36  ;;  %6863 = vst [vmem:[#allocation125_spill] sm:$0xff] %v5111_v19 }
 0x220   :  { %1144 = vbcast.lane.b32.xlu1 %v1114_v22, 312  ;;  %1140 = vbcast.lane.b32.xlu0 %v1114_v22, 304 }
 0x222   :  { %v5113_v24 = vpop.permute.xlu1 %908  ;;  %v5115_v53 = vpop.permute.xlu0 %904 }
 0x223   :  { %6864 = vst [vmem:[#allocation126_spill] sm:$0xff] %v5113_v24  ;;  %6865 = vst [vmem:[#allocation127_spill] sm:$0xff] %v5115_v53  ;;  %v6870_v24 = vsub.s32 5, %v4760_v56 }
 0x224   :  { %1152 = vbcast.lane.b32.xlu1 %v1114_v22, 328  ;;  %1148 = vbcast.lane.b32.xlu0 %v1114_v22, 320 }
 0x225   :  { %v1181_v53 = vrot.slane %v4948_v42, %v6870_v24 }
 0x226   :  { %v5117_v62 = vpop.permute.xlu1 %919  ;;  %v5119_v8 = vpop.permute.xlu0 %915 }
 0x228   :  { %1160 = vbcast.lane.b32.xlu1 %v1114_v22, 344  ;;  %1156 = vbcast.lane.b32.xlu0 %v1114_v22, 336 }
 0x22a   :  { %v5121_v55 = vpop.permute.xlu1 %927  ;;  %v5123_v0 = vpop.permute.xlu0 %923 }
 0x22b   :  { %6866 = vst [vmem:[#allocation128_spill] sm:$0xff] %v5121_v55  ;;  %6867 = vst [vmem:[#allocation129_spill] sm:$0xff] %v5123_v0 }
 0x22c   :  { %1168 = vbcast.lane.b32.xlu1 %v1114_v22, 360  ;;  %1164 = vbcast.lane.b32.xlu0 %v1114_v22, 352 }
 0x22e   :  { %v5125_v19 = vpop.permute.xlu1 %935  ;;  %v5127_v36 = vpop.permute.xlu0 %931 }
 0x22f   :  { %6868 = vst [vmem:[#allocation130_spill] sm:$0xff] %v5125_v19  ;;  %6869 = vst [vmem:[#allocation131_spill] sm:$0xff] %v5127_v36 }
 0x230   :  { %1176 = vbcast.lane.b32.xlu1 %v1114_v22, 376  ;;  %1172 = vbcast.lane.b32.xlu0 %v1114_v22, 368 }
 0x232   :  { %v5132_v33 = vpop.permute.xlu1 %943  ;;  %v5134_v17 = vpop.permute.xlu0 %939 }
 0x233   :  { %6871 = vst [vmem:[#allocation132_spill] sm:$0xff] %v5132_v33  ;;  %6872 = vst [vmem:[#allocation133_spill] sm:$0xff] %v5134_v17 }
 0x234   :  { %1187 = vbcast.lane.b32.xlu1 %v1181_v53, 264  ;;  %1183 = vbcast.lane.b32.xlu0 %v1181_v53, 256 }
 0x236   :  { %v5136_v35 = vpop.permute.xlu1 %951  ;;  %v5138_v58 = vpop.permute.xlu0 %947 }
 0x237   :  { %6873 = vst [vmem:[#allocation134_spill] sm:$0xff] %v5136_v35 }
 0x238   :  { %1195 = vbcast.lane.b32.xlu1 %v1181_v53, 280  ;;  %1191 = vbcast.lane.b32.xlu0 %v1181_v53, 272 }
 0x23a   :  { %v5140_v19 = vpop.permute.xlu1 %959  ;;  %v5142_v36 = vpop.permute.xlu0 %955 }
 0x23b   :  { %6874 = vst [vmem:[#allocation135_spill] sm:$0xff] %v5140_v19  ;;  %6875 = vst [vmem:[#allocation136_spill] sm:$0xff] %v5142_v36 }
 0x23c   :  { %1203 = vbcast.lane.b32.xlu1 %v1181_v53, 296  ;;  %1199 = vbcast.lane.b32.xlu0 %v1181_v53, 288 }
 0x23e   :  { %v5144_v22 = vpop.permute.xlu1 %967  ;;  %v5146_v24 = vpop.permute.xlu0 %963 }
 0x23f   :  { %6876 = vst [vmem:[#allocation137_spill] sm:$0xff] %v5144_v22  ;;  %6877 = vst [vmem:[#allocation138_spill] sm:$0xff] %v5146_v24 }
 0x240   :  { %1211 = vbcast.lane.b32.xlu1 %v1181_v53, 312  ;;  %1207 = vbcast.lane.b32.xlu0 %v1181_v53, 304 }
 0x242   :  { %v5148_v33 = vpop.permute.xlu1 %975  ;;  %v5150_v17 = vpop.permute.xlu0 %971 }
 0x243   :  { %6878 = vst [vmem:[#allocation139_spill] sm:$0xff] %v5148_v33  ;;  %6879 = vst [vmem:[#allocation140_spill] sm:$0xff] %v5150_v17  ;;  %v6884_v33 = vsub.s32 6, %v4760_v56 }
 0x244   :  { %1219 = vbcast.lane.b32.xlu1 %v1181_v53, 328  ;;  %1215 = vbcast.lane.b32.xlu0 %v1181_v53, 320 }
 0x245   :  { %v1248_v17 = vrot.slane %v4948_v42, %v6884_v33 }
 0x246   :  { %v5152_v35 = vpop.permute.xlu1 %986  ;;  %v5154_v39 = vpop.permute.xlu0 %982 }
 0x248   :  { %1227 = vbcast.lane.b32.xlu1 %v1181_v53, 344  ;;  %1223 = vbcast.lane.b32.xlu0 %v1181_v53, 336 }
 0x24a   :  { %v5156_v19 = vpop.permute.xlu1 %994  ;;  %v5158_v36 = vpop.permute.xlu0 %990 }
 0x24b   :  { %6880 = vst [vmem:[#allocation141_spill] sm:$0xff] %v5156_v19  ;;  %6881 = vst [vmem:[#allocation142_spill] sm:$0xff] %v5158_v36 }
 0x24c   :  { %1235 = vbcast.lane.b32.xlu1 %v1181_v53, 360  ;;  %1231 = vbcast.lane.b32.xlu0 %v1181_v53, 352 }
 0x24e   :  { %v5160_v22 = vpop.permute.xlu1 %1002  ;;  %v5162_v24 = vpop.permute.xlu0 %998 }
 0x24f   :  { %6882 = vst [vmem:[#allocation143_spill] sm:$0xff] %v5160_v22  ;;  %6883 = vst [vmem:[#allocation144_spill] sm:$0xff] %v5162_v24 }
 0x250   :  { %1243 = vbcast.lane.b32.xlu1 %v1181_v53, 376  ;;  %1239 = vbcast.lane.b32.xlu0 %v1181_v53, 368 }
 0x252   :  { %v5167_v52 = vpop.permute.xlu1 %1010  ;;  %v5169_v61 = vpop.permute.xlu0 %1006 }
 0x253   :  { %6885 = vst [vmem:[#allocation145_spill] sm:$0xff] %v5167_v52  ;;  %6886 = vst [vmem:[#allocation146_spill] sm:$0xff] %v5169_v61 }
 0x254   :  { %1254 = vbcast.lane.b32.xlu1 %v1248_v17, 264  ;;  %1250 = vbcast.lane.b32.xlu0 %v1248_v17, 256 }
 0x256   :  { %v5171_v57 = vpop.permute.xlu1 %1018  ;;  %v5173_v34 = vpop.permute.xlu0 %1014 }
 0x257   :  { %6887 = vst [vmem:[#allocation147_spill] sm:$0xff] %v5171_v57 }
 0x258   :  { %1262 = vbcast.lane.b32.xlu1 %v1248_v17, 280  ;;  %1258 = vbcast.lane.b32.xlu0 %v1248_v17, 272 }
 0x25a   :  { %v5175_v22 = vpop.permute.xlu1 %1026  ;;  %v5177_v24 = vpop.permute.xlu0 %1022 }
 0x25b   :  { %6888 = vst [vmem:[#allocation148_spill] sm:$0xff] %v5175_v22  ;;  %6889 = vst [vmem:[#allocation149_spill] sm:$0xff] %v5177_v24 }
 0x25c   :  { %1270 = vbcast.lane.b32.xlu1 %v1248_v17, 296  ;;  %1266 = vbcast.lane.b32.xlu0 %v1248_v17, 288 }
 0x25e   :  { %v5179_v33 = vpop.permute.xlu1 %1034  ;;  %v5181_v53 = vpop.permute.xlu0 %1030 }
 0x25f   :  { %6890 = vst [vmem:[#allocation150_spill] sm:$0xff] %v5179_v33  ;;  %6891 = vst [vmem:[#allocation151_spill] sm:$0xff] %v5181_v53 }
 0x260   :  { %1278 = vbcast.lane.b32.xlu1 %v1248_v17, 312  ;;  %1274 = vbcast.lane.b32.xlu0 %v1248_v17, 304 }
 0x262   :  { %v5183_v52 = vpop.permute.xlu1 %1042  ;;  %v5185_v61 = vpop.permute.xlu0 %1038 }
 0x263   :  { %6892 = vst [vmem:[#allocation152_spill] sm:$0xff] %v5183_v52  ;;  %6893 = vst [vmem:[#allocation153_spill] sm:$0xff] %v5185_v61  ;;  %v6897_v52 = vsub.s32 7, %v4760_v56 }
 0x264   :  { %1286 = vbcast.lane.b32.xlu1 %v1248_v17, 328  ;;  %1282 = vbcast.lane.b32.xlu0 %v1248_v17, 320 }
 0x265   :  { %v1315_v61 = vrot.slane %v4948_v42, %v6897_v52 }
 0x266   :  { %v5187_v57 = vpop.permute.xlu1 %1053  ;;  %v5189_v29 = vpop.permute.xlu0 %1049 }
 0x268   :  { %1294 = vbcast.lane.b32.xlu1 %v1248_v17, 344  ;;  %1290 = vbcast.lane.b32.xlu0 %v1248_v17, 336 }
 0x26a   :  { %v5191_v22 = vpop.permute.xlu1 %1061  ;;  %v5193_v24 = vpop.permute.xlu0 %1057 }
 0x26b   :  { %6894 = vst [vmem:[#allocation154_spill] sm:$0xff] %v5191_v22 }
 0x26c   :  { %1302 = vbcast.lane.b32.xlu1 %v1248_v17, 360  ;;  %1298 = vbcast.lane.b32.xlu0 %v1248_v17, 352 }
 0x26e   :  { %v5195_v33 = vpop.permute.xlu1 %1069  ;;  %v5197_v53 = vpop.permute.xlu0 %1065 }
 0x26f   :  { %6895 = vst [vmem:[#allocation155_spill] sm:$0xff] %v5195_v33  ;;  %6896 = vst [vmem:[#allocation156_spill] sm:$0xff] %v5197_v53 }
 0x270   :  { %1310 = vbcast.lane.b32.xlu1 %v1248_v17, 376  ;;  %1306 = vbcast.lane.b32.xlu0 %v1248_v17, 368 }
 0x272   :  { %v5202_v55 = vpop.permute.xlu1 %1077  ;;  %v5204_v13 = vpop.permute.xlu0 %1073 }
 0x273   :  { %6898 = vst [vmem:[#allocation157_spill] sm:$0xff] %v5202_v55  ;;  %6899 = vst [vmem:[#allocation158_spill] sm:$0xff] %v5204_v13 }
 0x274   :  { %1321 = vbcast.lane.b32.xlu1 %v1315_v61, 264  ;;  %1317 = vbcast.lane.b32.xlu0 %v1315_v61, 256 }
 0x276   :  { %v5206_v9 = vpop.permute.xlu1 %1085  ;;  %v5208_v3 = vpop.permute.xlu0 %1081 }
 0x277   :  { %6900 = vst [vmem:[#allocation159_spill] sm:$0xff] %v5206_v9 }
 0x278   :  { %1329 = vbcast.lane.b32.xlu1 %v1315_v61, 280  ;;  %1325 = vbcast.lane.b32.xlu0 %v1315_v61, 272 }
 0x27a   :  { %v5210_v33 = vpop.permute.xlu1 %1093  ;;  %v5212_v53 = vpop.permute.xlu0 %1089 }
 0x27b   :  { %6901 = vst [vmem:[#allocation160_spill] sm:$0xff] %v5210_v33  ;;  %6902 = vst [vmem:[#allocation161_spill] sm:$0xff] %v5212_v53 }
 0x27c   :  { %1337 = vbcast.lane.b32.xlu1 %v1315_v61, 296  ;;  %1333 = vbcast.lane.b32.xlu0 %v1315_v61, 288 }
 0x27e   :  { %v5214_v52 = vpop.permute.xlu1 %1101  ;;  %v5216_v17 = vpop.permute.xlu0 %1097 }
 0x27f   :  { %6903 = vst [vmem:[#allocation162_spill] sm:$0xff] %v5214_v52  ;;  %6904 = vst [vmem:[#allocation163_spill] sm:$0xff] %v5216_v17 }
 0x280   :  { %1345 = vbcast.lane.b32.xlu1 %v1315_v61, 312  ;;  %1341 = vbcast.lane.b32.xlu0 %v1315_v61, 304 }
 0x282   :  { %v5218_v42 = vpop.permute.xlu1 %1109  ;;  %v5220_v55 = vpop.permute.xlu0 %1105 }
 0x283   :  { %6905 = vst [vmem:[#allocation164_spill] sm:$0xff] %v5218_v42  ;;  %6906 = vst [vmem:[#allocation165_spill] sm:$0xff] %v5220_v55 }
 0x284   :  { %1353 = vbcast.lane.b32.xlu1 %v1315_v61, 328  ;;  %1349 = vbcast.lane.b32.xlu0 %v1315_v61, 320 }
 0x286   :  { %v5222_v9 = vpop.permute.xlu1 %1120  ;;  %v5224_v13 = vpop.permute.xlu0 %1116 }
 0x288   :  { %1361 = vbcast.lane.b32.xlu1 %v1315_v61, 344  ;;  %1357 = vbcast.lane.b32.xlu0 %v1315_v61, 336 }
 0x28a   :  { %v5226_v33 = vpop.permute.xlu1 %1128  ;;  %v5228_v53 = vpop.permute.xlu0 %1124 }
 0x28b   :  { %6907 = vst [vmem:[#allocation166_spill] sm:$0xff] %v5226_v33  ;;  %6908 = vst [vmem:[#allocation167_spill] sm:$0xff] %v5228_v53 }
 0x28c   :  { %1369 = vbcast.lane.b32.xlu1 %v1315_v61, 360  ;;  %1365 = vbcast.lane.b32.xlu0 %v1315_v61, 352 }
 0x28e   :  { %v5230_v52 = vpop.permute.xlu1 %1136  ;;  %v5232_v17 = vpop.permute.xlu0 %1132 }
 0x28f   :  { %6909 = vst [vmem:[#allocation168_spill] sm:$0xff] %v5230_v52  ;;  %6910 = vst [vmem:[#allocation169_spill] sm:$0xff] %v5232_v17 }
 0x290   :  { %1377 = vbcast.lane.b32.xlu1 %v1315_v61, 376  ;;  %1373 = vbcast.lane.b32.xlu0 %v1315_v61, 368 }
 0x292   :  { %v5234_v42 = vpop.permute.xlu1 %1144  ;;  %v5236_v55 = vpop.permute.xlu0 %1140 }
 0x293   :  { %6911 = vst [vmem:[#allocation170_spill] sm:$0xff] %v5234_v42  ;;  %6912 = vst [vmem:[#allocation171_spill] sm:$0xff] %v5236_v55 }
 0x296   :  { %v5238_v51 = vpop.permute.xlu1 %1152  ;;  %v5240_v7 = vpop.permute.xlu0 %1148 }
 0x297   :  { %6913 = vst [vmem:[#allocation172_spill] sm:$0xff] %v5238_v51 }
 0x29a   :  { %v5242_v22 = vpop.permute.xlu1 %1160  ;;  %v5244_v33 = vpop.permute.xlu0 %1156 }
 0x29b   :  { %6914 = vst [vmem:[#allocation173_spill] sm:$0xff] %v5242_v22  ;;  %6915 = vst [vmem:[#allocation174_spill] sm:$0xff] %v5244_v33 }
 0x29e   :  { %v5246_v59 = vpop.permute.xlu1 %1168  ;;  %v5248_v48 = vpop.permute.xlu0 %1164 }
 0x29f   :  { %6916 = vst [vmem:[#allocation175_spill] sm:$0xff] %v5246_v59  ;;  %6917 = vst [vmem:[#allocation176_spill] sm:$0xff] %v5248_v48 }
 0x2a2   :  { %v5250_v52 = vpop.permute.xlu1 %1176  ;;  %v5252_v17 = vpop.permute.xlu0 %1172 }
 0x2a3   :  { %6918 = vst [vmem:[#allocation177_spill] sm:$0xff] %v5250_v52  ;;  %6919 = vst [vmem:[#allocation178_spill] sm:$0xff] %v5252_v17 }
 0x2a6   :  { %v5254_v61 = vpop.permute.xlu1 %1187  ;;  %v1184_v42 = vpop.permute.xlu0 %1183 }
 0x2aa   :  { %v5256_v55 = vpop.permute.xlu1 %1195  ;;  %v5258_v51 = vpop.permute.xlu0 %1191 }
 0x2ab   :  { %6920 = vst [vmem:[#allocation179_spill] sm:$0xff] %v5256_v55 }
 0x2ae   :  { %v5260_v19 = vpop.permute.xlu1 %1203  ;;  %v5262_v22 = vpop.permute.xlu0 %1199 }
 0x2af   :  { %6921 = vst [vmem:[#allocation180_spill] sm:$0xff] %v5260_v19  ;;  %6922 = vst [vmem:[#allocation181_spill] sm:$0xff] %v5262_v22 }
 0x2b2   :  { %v5264_v33 = vpop.permute.xlu1 %1211  ;;  %v5266_v59 = vpop.permute.xlu0 %1207 }
 0x2b3   :  { %6923 = vst [vmem:[#allocation182_spill] sm:$0xff] %v5264_v33  ;;  %6924 = vst [vmem:[#allocation183_spill] sm:$0xff] %v5266_v59 }
 0x2b6   :  { %v5268_v48 = vpop.permute.xlu1 %1219  ;;  %v5270_v52 = vpop.permute.xlu0 %1215 }
 0x2b7   :  { %6925 = vst [vmem:[#allocation184_spill] sm:$0xff] %v5268_v48 }
 0x2ba   :  { %v5272_v17 = vpop.permute.xlu1 %1227  ;;  %v5274_v10 = vpop.permute.xlu0 %1223 }
 0x2bb   :  { %6926 = vst [vmem:[#allocation185_spill] sm:$0xff] %v5272_v17  ;;  %6927 = vst [vmem:[#allocation186_spill] sm:$0xff] %v5274_v10 }
 0x2be   :  { %v5276_v32 = vpop.permute.xlu1 %1235  ;;  %v5278_v55 = vpop.permute.xlu0 %1231 }
 0x2bf   :  { %6928 = vst [vmem:[#allocation187_spill] sm:$0xff] %v5276_v32  ;;  %6929 = vst [vmem:[#allocation188_spill] sm:$0xff] %v5278_v55 }
 0x2c2   :  { %v5280_v18 = vpop.permute.xlu1 %1243  ;;  %v5282_v19 = vpop.permute.xlu0 %1239 }
 0x2c3   :  { %6930 = vst [vmem:[#allocation189_spill] sm:$0xff] %v5280_v18  ;;  %6931 = vst [vmem:[#allocation190_spill] sm:$0xff] %v5282_v19  ;;  %v4592_v19 = vmov 1983009808  }
 0x2c4   :  { %v1511_v11 = vunpack.c.l.s4 %v4592_v19 }
 0x2c6   :  { %v5284_v22 = vpop.permute.xlu1 %1254  ;;  %v1251_v33 = vpop.permute.xlu0 %1250 }
 0x2ca   :  { %v5286_v59 = vpop.permute.xlu1 %1262  ;;  %v5288_v48 = vpop.permute.xlu0 %1258 }
 0x2cb   :  { %6932 = vst [vmem:[#allocation191_spill] sm:$0xff] %v5286_v59 }
 0x2ce   :  { %v5290_v53 = vpop.permute.xlu0 %1266  ;;  %v5292_v17 = vpop.permute.xlu1 %1270 }
 0x2cf   :  { %6933 = vst [vmem:[#allocation192_spill] sm:$0xff] %v5290_v53  ;;  %6934 = vst [vmem:[#allocation193_spill] sm:$0xff] %v5292_v17  ;;  %v1428_v53 = vsel %vm1379_vm0, %v4896_v15, %v5189_v29  ;;  %v1512_v17 = vunpack.c.0.s8 %v1511_v11  ;;  %v1380_v15 = vsel %vm1379_vm0, %v4788_v12, %v5084_v16  ;;  %v1476_v29 = vsel %vm1379_vm0, %v5014_v54, %v1251_v33 }
 0x2d2   :  { %v5294_v10 = vpop.permute.xlu0 %1274  ;;  %v5296_v32 = vpop.permute.xlu1 %1278 }
 0x2d3   :  { %6935 = vst [vmem:[#allocation194_spill] sm:$0xff] %v5294_v10  ;;  %6936 = vst [vmem:[#allocation195_spill] sm:$0xff] %v5296_v32  ;;  %v1396_v32 = vsel %vm1379_vm0, %v4824_v28, %v5119_v8  ;;  %v4593_v10 = vmov 1934713408   ;;  %v5325_v28 = vsub.s32 %v1512_v17, %v4760_v56 }
 0x2d4   :  { %v1575_v19 = vunpack.c.l.s4 %v4593_v10  ;;  %v1524_v30 = vcombine.low %v1396_v32, %v1428_v53  ;;  %v1444_v10 = vsel %vm1379_vm0, %v4941_v45, %v5224_v13 }
 0x2d6   :  { %v5298_v55 = vpop.permute.xlu0 %1282  ;;  %v5302_v36 = vpop.permute.xlu1 %1286  ;;  %v1532_v8 = vrot.slane %v1524_v30, %v5325_v28 }
 0x2d7   :  { %6938 = vst [vmem:[#allocation197_spill] sm:$0xff] %v5302_v36 }
 0x2da   :  { %v5300_v18 = vpop.permute.xlu0 %1290  ;;  %v5315_v36 = vpop.permute.xlu1 %1294 }
 0x2db   :  { %6937 = vst [vmem:[#allocation196_spill] sm:$0xff] %v5300_v18  ;;  %v1412_v18 = vsel %vm1379_vm0, %v4860_v47, %v5154_v39  ;;  %6940 = vst [vmem:[#allocation199_spill] sm:$0xff] %v5315_v36  ;;  %v1576_v47 = vunpack.c.0.s8 %v1575_v19  ;;  %v1540_v39 = vcombine.low %v1444_v10, %v1476_v29 }
 0x2dc   :  { %v1508_v11 = vcombine.low %v1380_v15, %v1412_v18 }
 0x2dd   :  { %v5339_v17 = vsub.s32 %v1576_v47, %v4760_v56  ;;  %v1548_v45 = vrot.slane %v1540_v39, %v5325_v28  ;;  %v1541_v56 = vcombine.high %v1444_v10, %v1476_v29 }
 0x2de   :  { %v5304_v59 = vpop.permute.xlu0 %1298  ;;  %v1516_v16 = vrot.slane %v1508_v11, %v5325_v28  ;;  %v5336_v54 = vpop.permute.xlu1 %1302  ;;  %v1525_v11 = vcombine.high %v1396_v32, %v1428_v53 }
 0x2df   :  { %6939 = vst [vmem:[#allocation198_spill] sm:$0xff] %v5304_v59  ;;  %v1460_v59 = vsel %vm1379_vm0, %v4979_v41, %v1184_v42  ;;  %6942 = vst [vmem:[#allocation201_spill] sm:$0xff] %v5336_v54  ;;  %v1509_v54 = vcombine.high %v1380_v15, %v1412_v18  ;;  %v5370_v15 = vsel %vm1379_vm0, %v4894_v31, %v5187_v57 }
 0x2e0   :  { %v1572_v13 = vcombine.low %v1516_v16, %v1532_v8  ;;  %v5387_v31 = vsel %vm1379_vm0, %v4822_v27, %v5117_v62  ;;  %v5392_v57 = vsel %vm1379_vm0, %v4858_v46, %v5152_v35  ;;  %v5405_v62 = vsel %vm1379_vm0, %v4939_v63, %v5222_v9 }
 0x2e1   :  { %v1523_v32 = vrot.slane %v1509_v54, %v5325_v28  ;;  %v5377_v54 = vsel %vm1379_vm0, %v4977_v40, %v5254_v61  ;;  %v5411_v27 = vsel %vm1379_vm0, %v4792_v14, %v5082_v25  ;;  %v5421_v63 = vsel %vm1379_vm0, %v4917_v49, %v5208_v3 }
 0x2e2   :  { %v5317_v0 = vpop.permute.xlu0 %1306  ;;  %v5344_v36 = vrot.slane %v1572_v13, %v5339_v17  ;;  %v5346_v41 = vpop.permute.xlu1 %1310  ;;  %v1539_v13 = vrot.slane %v1525_v11, %v5325_v28  ;;  %v1644_v61 = vcombine.low %v5411_v27, %v5392_v57  ;;  %v5429_v14 = vsel %vm1379_vm0, %v4844_v38, %v5138_v58 }
 0x2e3   :  { %6941 = vst [vmem:[#allocation200_spill] sm:$0xff] %v5317_v0  ;;  %6943 = vst [vmem:[#allocation202_spill] sm:$0xff] %v5346_v41  ;;  %v1555_v41 = vrot.slane %v1541_v56, %v5325_v28  ;;  %v5434_v25 = vsel %vm1379_vm0, %v4880_v2, %v5173_v34  ;;  %v2612_v49 = vcombine.low %v5429_v14, %v5421_v63 }
 0x2e4   :  { %v1588_v10 = vcombine.low %v1523_v32, %v1539_v13  ;;  %v1589_v3 = vcombine.high %v1523_v32, %v1539_v13  ;;  %v5446_v38 = vsel %vm1379_vm0, %v4808_v1, %v5103_v4  ;;  %v1652_v2 = vrot.slane %v1644_v61, %v5325_v28 }
 0x2e5   :  { %v5452_v34 = vsel %vm1379_vm0, %v5033_v43, %v5298_v55  ;;  %v2596_v58 = vcombine.low %v5446_v38, %v5434_v25  ;;  %v5462_v1 = vsel %vm1379_vm0, %v4963_v50, %v5240_v7  ;;  %v5470_v55 = vrot.slane %v2612_v49, %v5325_v28  ;;  %v6946_v49 = vld [vmem:[#allocation28_spill] sm:$0xff] }
 0x2e6   :  { %v1318_v0 = vpop.permute.xlu0 %1317  ;;  %v1596_v46 = vrot.slane %v1588_v10, %v5339_v17  ;;  %v1603_v43 = vrot.slane %v1589_v3, %v5339_v17  ;;  %v5477_v32 = vsel %vm1379_vm0, %v4998_v37, %v5270_v52 }
 0x2e7   :  { %v1492_v12 = vsel %vm1379_vm0, %v5049_v20, %v1318_v0  ;;  %v5481_v7 = vrot.slane %v2596_v58, %v5325_v28  ;;  %v6947_v58 = vld [vmem:[#allocation142_spill] sm:$0xff] }
 0x2e8   :  { %v1556_v33 = vcombine.low %v1460_v59, %v1492_v12  ;;  %v1557_v20 = vcombine.high %v1460_v59, %v1492_v12  ;;  %v1322_v59 = vpop.permute.xlu1 %1321 }
 0x2e9   :  { %v5365_v18 = vsel %vm1379_vm0, %v5047_v6, %v1322_v59  ;;  %v5382_v6 = vsel %vm1379_vm0, %v5012_v21, %v5284_v22  ;;  %v1660_v22 = vcombine.low %v5387_v31, %v5370_v15  ;;  %v2628_v59 = vcombine.low %v5462_v1, %v5452_v34 }
 0x2ea   :  { %v1564_v30 = vrot.slane %v1556_v33, %v5325_v28  ;;  %v5351_v42 = vpop.permute.xlu0 %1325  ;;  %v1573_v33 = vcombine.high %v1516_v16, %v1532_v8  ;;  %v1571_v44 = vrot.slane %v1557_v20, %v5325_v28  ;;  %v1676_v35 = vcombine.low %v5405_v62, %v5382_v6 }
 0x2eb   :  { %v5437_v11 = vrot.slane %v1660_v22, %v5325_v28  ;;  %v5490_v37 = vrot.slane %v2628_v59, %v5325_v28  ;;  %v1693_v52 = vcombine.high %v5377_v54, %v5365_v18 }
 0x2ec   :  { %v1604_v19 = vcombine.low %v1548_v45, %v1564_v30  ;;  %v1605_v47 = vcombine.high %v1548_v45, %v1564_v30  ;;  %v1587_v53 = vrot.slane %v1573_v33, %v5339_v17  ;;  %v1620_v29 = vcombine.low %v1555_v41, %v1571_v44 }
 0x2ed   :  { %v1692_v45 = vcombine.low %v5377_v54, %v5365_v18  ;;  %v1621_v30 = vcombine.high %v1555_v41, %v1571_v44  ;;  %v1684_v44 = vrot.slane %v1676_v35, %v5325_v28  ;;  %v1708_v33 = vcombine.low %v1652_v2, %v5437_v11 }
 0x2ee   :  { %v5349_v0 = vrot.slane %v1604_v19, %v5339_v17  ;;  %v1619_v12 = vrot.slane %v1605_v47, %v5339_v17  ;;  %v5359_v19 = vpop.permute.xlu0 %1333  ;;  %v1628_v40 = vrot.slane %v1620_v29, %v5339_v17  ;;  %v2660_v29 = vcombine.low %v5481_v7, %v5470_v55 }
 0x2ef   :  { %v5424_v9 = vrot.slane %v1692_v45, %v5325_v28  ;;  %v1635_v47 = vrot.slane %v1621_v30, %v5339_v17  ;;  %v1677_v45 = vcombine.high %v5405_v62, %v5382_v6  ;;  %v1645_v18 = vcombine.high %v5411_v27, %v5392_v57 }
 0x2f0   :  { %v1636_v39 = vcombine.low %v5344_v36, %v5349_v0  ;;  %v1638_v8 = vcombine.low %v1587_v53, %v1619_v12  ;;  %v1637_v16 = vcombine.high %v5344_v36, %v5349_v0  ;;  %v1640_v20 = vcombine.low %v1596_v46, %v1628_v40  ;;  %v7035_v0 = vld [vmem:[#allocation172_spill] sm:$0xff] }
 0x2f1   :  { %v1740_v56 = vcombine.low %v1684_v44, %v5424_v9  ;;  %v1639_v4 = vcombine.high %v1587_v53, %v1619_v12  ;;  %v1642_v12 = vcombine.low %v1603_v43, %v1635_v47  ;;  %v1716_v53 = vrot.slane %v1708_v33, %v5339_v17  ;;  %v6950_v33 = vld [vmem:[#allocation66_spill] sm:$0xff] }
 0x2f2   :  { %3689 = vrot.lane.b32.xlu1 %v1638_v8, %s4594_s29  ;;  %v5398_v21 = vpop.permute.xlu0 %1341  ;;  %3685 = vrot.lane.b32.xlu0 %v1637_v16, %s4595_s30  ;;  %v1661_v8 = vcombine.high %v5387_v31, %v5370_v15  ;;  %v1641_v16 = vcombine.high %v1596_v46, %v1628_v40  ;;  %v5508_v54 = vrot.slane %v2660_v29, %v5339_v17 }
 0x2f3   :  { %v1707_v61 = vrot.slane %v1693_v52, %v5325_v28  ;;  %v1741_v15 = vcombine.high %v1684_v44, %v5424_v9  ;;  %v1709_v57 = vcombine.high %v1652_v2, %v5437_v11  ;;  %v1691_v40 = vrot.slane %v1677_v45, %v5325_v28 }
 0x2f4   :  { %v1675_v6 = vrot.slane %v1661_v8, %v5325_v28  ;;  %v1494_v62 = vsel %vm1379_vm0, %v5053_v26, %v5351_v42  ;;  %v1659_v46 = vrot.slane %v1645_v18, %v5325_v28  ;;  %v1430_v9 = vsel %vm1379_vm0, %v4900_v5, %v5193_v24  ;;  %v6945_v42 = vld [vmem:[#allocation129_spill] sm:$0xff] }
 0x2f5   :  { %v1462_v30 = vsel %vm1379_vm0, %v4983_v23, %v5258_v51  ;;  %v1755_v3 = vrot.slane %v1741_v15, %v5339_v17  ;;  %v1756_v26 = vcombine.low %v1691_v40, %v1707_v61  ;;  %v1398_v44 = vsel %vm1379_vm0, %v6946_v49, %v6945_v42  ;;  %v6949_v51 = vld [vmem:[#allocation167_spill] sm:$0xff]  ;;  %v1330_v49 = vpop.permute.xlu1 %1329 }
 0x2f6   :  { %3697 = vrot.lane.b32.xlu1 %v1640_v20, %s4596_s4  ;;  %v1350_v41 = vpop.permute.xlu0 %1349  ;;  %3693 = vrot.lane.b32.xlu0 %v1639_v4, %s4597_s5  ;;  %v6944_v20 = vld [vmem:[#allocation91_spill] sm:$0xff]  ;;  %v1643_v2 = vcombine.high %v1603_v43, %v1635_v47  ;;  %v1723_v24 = vrot.slane %v1709_v57, %v5339_v17  ;;  %v1724_v23 = vcombine.low %v1659_v46, %v1675_v6 }
 0x2f7   :  { %v5466_v13 = vsel %vm1379_vm0, %v5068_v60, %v1350_v41  ;;  %v1748_v60 = vrot.slane %v1740_v56, %v5339_v17  ;;  %v1478_v11 = vsel %vm1379_vm0, %v6944_v20, %v5288_v48  ;;  %v1828_v41 = vcombine.low %v1462_v30, %v1494_v62  ;;  %v6948_v56 = vld [vmem:[#allocation41_spill] sm:$0xff] }
 0x2f8   :  { %v2644_v50 = vcombine.low %v5477_v32, %v5466_v13  ;;  %v1414_v5 = vsel %vm1379_vm0, %v6948_v56, %v6947_v58  ;;  %v1446_v48 = vsel %vm1379_vm0, %v6950_v33, %v6949_v51  ;;  %v1796_v4 = vcombine.low %v1398_v44, %v1430_v9  ;;  %v6953_v51 = vld [vmem:[#allocation141_spill] sm:$0xff]  ;;  %v6955_v33 = vld [vmem:[#allocation103_spill] sm:$0xff] }
 0x2f9   :  { %v1772_v35 = vcombine.low %v1716_v53, %v1748_v60  ;;  %v1812_v59 = vcombine.low %v1446_v48, %v1478_v11  ;;  %v1764_v43 = vrot.slane %v1756_v26, %v5339_v17  ;;  %v1774_v29 = vcombine.low %v1723_v24, %v1755_v3 }
 0x2fa   :  { %v5495_v10 = vrot.slane %v2644_v50, %v5325_v28  ;;  %3705 = vrot.lane.b32.xlu1 %v1642_v12, %s4598_s0  ;;  %3701 = vrot.lane.b32.xlu0 %v1641_v16, %s4599_s6  ;;  %v6951_v50 = vld [vmem:[#allocation116_spill] sm:$0xff]  ;;  %v6952_v12 = vld [vmem:[#allocation14_spill] sm:$0xff]  ;;  %v1757_v8 = vcombine.high %v1691_v40, %v1707_v61  ;;  %v1836_v16 = vrot.slane %v1828_v41, %v5325_v28 }
 0x2fb   :  { %v1382_v47 = vsel %vm1379_vm0, %v6952_v12, %v6951_v50  ;;  %v1773_v45 = vcombine.high %v1716_v53, %v1748_v60  ;;  %v1804_v18 = vrot.slane %v1796_v4, %v5325_v28  ;;  %v1820_v15 = vrot.slane %v1812_v59, %v5325_v28  ;;  %v6957_v4 = vld [vmem:[#allocation53_spill] sm:$0xff]  ;;  %v6958_v50 = vld [vmem:[#allocation179_spill] sm:$0xff]  ;;  %v6959_v12 = vld [vmem:[#allocation78_spill] sm:$0xff] }
 0x2fc   :  { %v2692_v22 = vcombine.low %v5490_v37, %v5495_v10  ;;  %v1780_v52 = vcombine.low %v1382_v47, %v1414_v5  ;;  %v1771_v61 = vrot.slane %v1757_v8, %v5339_v17  ;;  %v1829_v40 = vcombine.high %v1462_v30, %v1494_v62  ;;  %v6954_v62 = vld [vmem:[#allocation40_spill] sm:$0xff] }
 0x2fd   :  { %v1876_v60 = vcombine.low %v1820_v15, %v1836_v16  ;;  %v1781_v53 = vcombine.high %v1382_v47, %v1414_v5  ;;  %v1813_v42 = vcombine.high %v1446_v48, %v1478_v11  ;;  %v1775_v41 = vcombine.high %v1723_v24, %v1755_v3  ;;  %v6956_v48 = vld [vmem:[#allocation154_spill] sm:$0xff] }
 0x2fe   :  { %v5513_v31 = vrot.slane %v2692_v22, %v5339_v17  ;;  %3713 = vrot.lane.b32.xlu1 %v1772_v35, %s4600_s7  ;;  %3709 = vrot.lane.b32.xlu0 %v1643_v2, %s4601_s8  ;;  %v1732_v22 = vrot.slane %v1724_v23, %v5339_v17  ;;  %v1725_v35 = vcombine.high %v1659_v46, %v1675_v6 }
 0x2ff   :  { %v1788_v20 = vrot.slane %v1780_v52, %v5325_v28  ;;  %v1797_v46 = vcombine.high %v1398_v44, %v1430_v9  ;;  %v1843_v2 = vrot.slane %v1829_v40, %v5325_v28  ;;  %v1877_v58 = vcombine.high %v1820_v15, %v1836_v16  ;;  %v6961_v52 = vld [vmem:[#allocation90_spill] sm:$0xff] }
 0x300   :  { %v2724_v27 = vcombine.low %v5508_v54, %v5513_v31  ;;  %v1776_v57 = vcombine.low %v1732_v22, %v1764_v43  ;;  %v1739_v6 = vrot.slane %v1725_v35, %v5339_v17  ;;  %v1884_v56 = vrot.slane %v1876_v60, %v5339_v17  ;;  %v6964_v60 = vld [vmem:[#allocation128_spill] sm:$0xff] }
 0x301   :  { %v1844_v26 = vcombine.low %v1788_v20, %v1804_v18  ;;  %v5565_v30 = vsel %vm1379_vm0, %v6954_v62, %v6953_v51  ;;  %v1795_v5 = vrot.slane %v1781_v53, %v5325_v28  ;;  %v1495_v9 = vsel %vm1379_vm0, %v6955_v33, %v1330_v49  ;;  %v6965_v53 = vld [vmem:[#allocation27_spill] sm:$0xff] }
 0x302   :  { %3721 = vrot.lane.b32.xlu1 %v1774_v29, %s4602_s9  ;;  %3717 = vrot.lane.b32.xlu0 %v1773_v45, %s4603_s10  ;;  %v1778_v23 = vcombine.low %v1739_v6, %v1771_v61  ;;  %v1811_v11 = vrot.slane %v1797_v46, %v5325_v28  ;;  %v1845_v3 = vcombine.high %v1788_v20, %v1804_v18  ;;  %v6960_v29 = vld [vmem:[#allocation191_spill] sm:$0xff] }
 0x303   :  { %v1852_v44 = vrot.slane %v1844_v26, %v5339_v17  ;;  %v1827_v24 = vrot.slane %v1813_v42, %v5325_v28  ;;  %v1431_v59 = vsel %vm1379_vm0, %v6957_v4, %v6956_v48  ;;  %v1463_v47 = vsel %vm1379_vm0, %v6959_v12, %v6958_v50  ;;  %v6963_v20 = vld [vmem:[#allocation15_spill] sm:$0xff]  ;;  %v6966_v26 = vld [vmem:[#allocation166_spill] sm:$0xff]  ;;  %v6967_v42 = vld [vmem:[#allocation65_spill] sm:$0xff] }
 0x304   :  { %v1479_v8 = vsel %vm1379_vm0, %v6961_v52, %v6960_v29  ;;  %v1777_v16 = vcombine.high %v1732_v22, %v1764_v43  ;;  %v1964_v45 = vcombine.low %v1463_v47, %v1495_v9  ;;  %v1891_v35 = vrot.slane %v1877_v58, %v5339_v17 }
 0x305   :  { %v1892_v18 = vcombine.low %v1827_v24, %v1843_v2  ;;  %v1908_v15 = vcombine.low %v1852_v44, %v1884_v56  ;;  %v1399_v46 = vsel %vm1379_vm0, %v6965_v53, %v6964_v60  ;;  %v1447_v49 = vsel %vm1379_vm0, %v6967_v42, %v6966_v26  ;;  %v6970_v60 = vld [vmem:[#allocation105_spill] sm:$0xff]  ;;  %v6971_v42 = vld [vmem:[#allocation156_spill] sm:$0xff] }
 0x306   :  { %3729 = vrot.lane.b32.xlu1 %v1776_v57, %s4604_s11  ;;  %3725 = vrot.lane.b32.xlu0 %v1775_v41, %s4605_s12  ;;  %v6962_v57 = vld [vmem:[#allocation115_spill] sm:$0xff]  ;;  %v1932_v43 = vcombine.low %v1399_v46, %v1431_v59  ;;  %v1859_v22 = vrot.slane %v1845_v3, %v5339_v17  ;;  %v1860_v41 = vcombine.low %v1795_v5, %v1811_v11 }
 0x307   :  { %v1383_v40 = vsel %vm1379_vm0, %v6963_v20, %v6962_v57  ;;  %v1948_v58 = vcombine.low %v1447_v49, %v1479_v8  ;;  %v1779_v51 = vcombine.high %v1739_v6, %v1771_v61  ;;  %v1972_v62 = vrot.slane %v1964_v45, %v5325_v28  ;;  %v6968_v20 = vld [vmem:[#allocation144_spill] sm:$0xff] }
 0x308   :  { %v1893_v33 = vcombine.high %v1827_v24, %v1843_v2  ;;  %v1900_v48 = vrot.slane %v1892_v18, %v5339_v17  ;;  %v1910_v4 = vcombine.low %v1859_v22, %v1891_v35  ;;  %v1940_v50 = vrot.slane %v1932_v43, %v5325_v28 }
 0x309   :  { %v1861_v3 = vcombine.high %v1795_v5, %v1811_v11  ;;  %v1868_v12 = vrot.slane %v1860_v41, %v5339_v17  ;;  %v1956_v29 = vrot.slane %v1948_v58, %v5325_v28  ;;  %v1909_v6 = vcombine.high %v1852_v44, %v1884_v56  ;;  %v6974_v41 = vld [vmem:[#allocation80_spill] sm:$0xff] }
 0x30a   :  { %3737 = vrot.lane.b32.xlu1 %v1778_v23, %s4606_s13  ;;  %3733 = vrot.lane.b32.xlu0 %v1777_v16, %s4607_s14  ;;  %v1916_v23 = vcombine.low %v1383_v40, %v5565_v30  ;;  %v1965_v2 = vcombine.high %v1463_v47, %v1495_v9  ;;  %v1907_v52 = vrot.slane %v1893_v33, %v5339_v17  ;;  %v6975_v58 = vld [vmem:[#allocation192_spill] sm:$0xff] }
 0x30b   :  { %v2012_v24 = vcombine.low %v1956_v29, %v1972_v62  ;;  %v1912_v16 = vcombine.low %v1868_v12, %v1900_v48  ;;  %v1917_v45 = vcombine.high %v1383_v40, %v5565_v30  ;;  %v1933_v5 = vcombine.high %v1399_v46, %v1431_v59  ;;  %v6969_v40 = vld [vmem:[#allocation43_spill] sm:$0xff] }
 0x30c   :  { %v1924_v61 = vrot.slane %v1916_v23, %v5325_v28  ;;  %v1875_v18 = vrot.slane %v1861_v3, %v5339_v17  ;;  %v1911_v57 = vcombine.high %v1859_v22, %v1891_v35  ;;  %v1979_v56 = vrot.slane %v1965_v2, %v5325_v28  ;;  %v6973_v22 = vld [vmem:[#allocation181_spill] sm:$0xff]  ;;  %v6979_v2 = vld [vmem:[#allocation131_spill] sm:$0xff] }
 0x30d   :  { %v2013_v9 = vcombine.high %v1956_v29, %v1972_v62  ;;  %v2020_v44 = vrot.slane %v2012_v24, %v5339_v17  ;;  %v1931_v30 = vrot.slane %v1917_v45, %v5325_v28  ;;  %v5617_v59 = vsel %vm1379_vm0, %v6969_v40, %v6968_v20  ;;  %v6976_v23 = vld [vmem:[#allocation93_spill] sm:$0xff]  ;;  %v6977_v29 = vld [vmem:[#allocation118_spill] sm:$0xff] }
 0x30e   :  { %3745 = vrot.lane.b32.xlu1 %v1908_v15, %s4608_s15  ;;  %3741 = vrot.lane.b32.xlu0 %v1779_v51, %s4609_s1  ;;  %v1980_v11 = vcombine.low %v1924_v61, %v1940_v50  ;;  %v1949_v15 = vcombine.high %v1447_v49, %v1479_v8  ;;  %v1914_v47 = vcombine.low %v1875_v18, %v1907_v52  ;;  %v6972_v49 = vld [vmem:[#allocation55_spill] sm:$0xff]  ;;  %v6980_v24 = vld [vmem:[#allocation30_spill] sm:$0xff]  ;;  %v6981_v45 = vld [vmem:[#allocation169_spill] sm:$0xff] }
 0x30f   :  { %v1496_v8 = vsel %vm1379_vm0, %v6970_v60, %v5359_v19  ;;  %v1947_v35 = vrot.slane %v1933_v5, %v5325_v28  ;;  %v1981_v53 = vcombine.high %v1924_v61, %v1940_v50  ;;  %v1432_v43 = vsel %vm1379_vm0, %v6972_v49, %v6971_v42  ;;  %v6978_v61 = vld [vmem:[#allocation17_spill] sm:$0xff]  ;;  %v6982_v5 = vld [vmem:[#allocation68_spill] sm:$0xff] }
 0x310   :  { %v1988_v46 = vrot.slane %v1980_v11, %v5339_v17  ;;  %v1963_v26 = vrot.slane %v1949_v15, %v5325_v28  ;;  %v1464_v19 = vsel %vm1379_vm0, %v6974_v41, %v6973_v22  ;;  %v1480_v51 = vsel %vm1379_vm0, %v6976_v23, %v6975_v58 }
 0x311   :  { %v1913_v62 = vcombine.high %v1868_v12, %v1900_v48  ;;  %v2027_v33 = vrot.slane %v2013_v9, %v5339_v17  ;;  %v2100_v50 = vcombine.low %v1464_v19, %v1496_v8  ;;  %v1448_v11 = vsel %vm1379_vm0, %v6982_v5, %v6981_v45  ;;  %v6986_v5 = vld [vmem:[#allocation155_spill] sm:$0xff] }
 0x312   :  { %3753 = vrot.lane.b32.xlu1 %v1910_v4, %s4610_s16  ;;  %3749 = vrot.lane.b32.xlu0 %v1909_v6, %s4611_s17  ;;  %v2028_v4 = vcombine.low %v1963_v26, %v1979_v56  ;;  %v2044_v3 = vcombine.low %v1988_v46, %v2020_v44  ;;  %v1384_v6 = vsel %vm1379_vm0, %v6978_v61, %v6977_v29  ;;  %v6984_v61 = vld [vmem:[#allocation42_spill] sm:$0xff] }
 0x313   :  { %v1995_v48 = vrot.slane %v1981_v53, %v5339_v17  ;;  %v1996_v12 = vcombine.low %v1931_v30, %v1947_v35  ;;  %v2052_v9 = vcombine.low %v1384_v6, %v5617_v59  ;;  %v2029_v20 = vcombine.high %v1963_v26, %v1979_v56 }
 0x314   :  { %v2036_v40 = vrot.slane %v2028_v4, %v5339_v17  ;;  %v2108_v60 = vrot.slane %v2100_v50, %v5325_v28  ;;  %v1997_v49 = vcombine.high %v1931_v30, %v1947_v35  ;;  %v2101_v26 = vcombine.high %v1464_v19, %v1496_v8 }
 0x315   :  { %v2046_v42 = vcombine.low %v1995_v48, %v2027_v33  ;;  %v2004_v53 = vrot.slane %v1996_v12, %v5339_v17  ;;  %v2043_v56 = vrot.slane %v2029_v20, %v5339_v17  ;;  %v2085_v50 = vcombine.high %v1448_v11, %v1480_v51  ;;  %v6988_v12 = vld [vmem:[#allocation180_spill] sm:$0xff] }
 0x316   :  { %3761 = vrot.lane.b32.xlu1 %v1912_v16, %s4612_s18  ;;  %3757 = vrot.lane.b32.xlu0 %v1911_v57, %s4613_s19  ;;  %v1400_v16 = vsel %vm1379_vm0, %v6980_v24, %v6979_v2  ;;  %v2084_v57 = vcombine.low %v1448_v11, %v1480_v51  ;;  %v2011_v30 = vrot.slane %v1997_v49, %v5339_v17  ;;  %v6985_v2 = vld [vmem:[#allocation104_spill] sm:$0xff]  ;;  %v6987_v11 = vld [vmem:[#allocation54_spill] sm:$0xff] }
 0x317   :  { %v2068_v15 = vcombine.low %v1400_v16, %v1432_v43  ;;  %v2048_v23 = vcombine.low %v2004_v53, %v2036_v40  ;;  %v2069_v35 = vcombine.high %v1400_v16, %v1432_v43  ;;  %v2099_v45 = vrot.slane %v2085_v50, %v5325_v28 }
 0x318   :  { %v2092_v41 = vrot.slane %v2084_v57, %v5325_v28  ;;  %v2050_v29 = vcombine.low %v2011_v30, %v2043_v56  ;;  %v2661_v36 = vcombine.high %v5481_v7, %v5470_v55 }
 0x319   :  { %v2076_v22 = vrot.slane %v2068_v15, %v5325_v28  ;;  %v6989_v15 = vld [vmem:[#allocation79_spill] sm:$0xff] }
 0x31a   :  { %3769 = vrot.lane.b32.xlu1 %v1914_v47, %s4614_s2  ;;  %3765 = vrot.lane.b32.xlu0 %v1913_v62, %s4615_s20  ;;  %v1915_v47 = vcombine.high %v1875_v18, %v1907_v52  ;;  %v2060_v52 = vrot.slane %v2052_v9, %v5325_v28  ;;  %v2045_v18 = vcombine.high %v1988_v46, %v2020_v44  ;;  %v6990_v9 = vld [vmem:[#allocation193_spill] sm:$0xff] }
 0x31b   :  { %v2148_v58 = vcombine.low %v2092_v41, %v2108_v60  ;;  %v2053_v62 = vcombine.high %v1384_v6, %v5617_v59  ;;  %v2047_v44 = vcombine.high %v1995_v48, %v2027_v33  ;;  %v2115_v46 = vrot.slane %v2101_v26, %v5325_v28  ;;  %v6983_v59 = vld [vmem:[#allocation143_spill] sm:$0xff] }
 0x31c   :  { %v2116_v4 = vcombine.low %v2060_v52, %v2076_v22  ;;  %v2149_v8 = vcombine.high %v2092_v41, %v2108_v60  ;;  %v5668_v6 = vsel %vm1379_vm0, %v6984_v61, %v6983_v59  ;;  %v2083_v33 = vrot.slane %v2069_v35, %v5325_v28  ;;  %v6996_v35 = vld [vmem:[#allocation168_spill] sm:$0xff] }
 0x31d   :  { %v2156_v19 = vrot.slane %v2148_v58, %v5339_v17  ;;  %v2067_v43 = vrot.slane %v2053_v62, %v5325_v28  ;;  %v2117_v24 = vcombine.high %v2060_v52, %v2076_v22  ;;  %v1433_v48 = vsel %vm1379_vm0, %v6987_v11, %v6986_v5  ;;  %v6992_v52 = vld [vmem:[#allocation117_spill] sm:$0xff]  ;;  %v6994_v58 = vld [vmem:[#allocation130_spill] sm:$0xff] }
 0x31e   :  { %3777 = vrot.lane.b32.xlu1 %v2044_v3, %s4616_s21  ;;  %3773 = vrot.lane.b32.xlu0 %v1915_v47, %s4617_s22  ;;  %v1338_v3 = vpop.permute.xlu1 %1337  ;;  %v2124_v16 = vrot.slane %v2116_v4, %v5339_v17  ;;  %v1465_v57 = vsel %vm1379_vm0, %v6989_v15, %v6988_v12  ;;  %v6991_v47 = vld [vmem:[#allocation92_spill] sm:$0xff]  ;;  %v2049_v60 = vcombine.high %v2004_v53, %v2036_v40  ;;  %v6997_v4 = vld [vmem:[#allocation67_spill] sm:$0xff] }
 0x31f   :  { %v1497_v51 = vsel %vm1379_vm0, %v6985_v2, %v1338_v3  ;;  %v1481_v20 = vsel %vm1379_vm0, %v6991_v47, %v6990_v9  ;;  %v2163_v49 = vrot.slane %v2149_v8, %v5339_v17  ;;  %v2164_v22 = vcombine.low %v2099_v45, %v2115_v46 }
 0x320   :  { %v2180_v41 = vcombine.low %v2124_v16, %v2156_v19  ;;  %v1449_v50 = vsel %vm1379_vm0, %v6997_v4, %v6996_v35  ;;  %v2131_v53 = vrot.slane %v2117_v24, %v5339_v17  ;;  %v2132_v3 = vcombine.low %v2067_v43, %v2083_v33  ;;  %v7001_v35 = vld [vmem:[#allocation158_spill] sm:$0xff]  ;;  %v7002_v4 = vld [vmem:[#allocation57_spill] sm:$0xff] }
 0x321   :  { %v2165_v61 = vcombine.high %v2099_v45, %v2115_v46  ;;  %v2172_v2 = vrot.slane %v2164_v22, %v5339_v17  ;;  %v2133_v24 = vcombine.high %v2067_v43, %v2083_v33  ;;  %v2237_v46 = vcombine.high %v1465_v57, %v1497_v51 }
 0x322   :  { %3785 = vrot.lane.b32.xlu1 %v2046_v42, %s4618_s23  ;;  %3781 = vrot.lane.b32.xlu0 %v2045_v18, %s4619_s24  ;;  %v2236_v42 = vcombine.low %v1465_v57, %v1497_v51  ;;  %v6993_v18 = vld [vmem:[#allocation16_spill] sm:$0xff]  ;;  %v2182_v5 = vcombine.low %v2131_v53, %v2163_v49  ;;  %v2140_v12 = vrot.slane %v2132_v3, %v5339_v17  ;;  %v7005_v3 = vld [vmem:[#allocation194_spill] sm:$0xff] }
 0x323   :  { %v1385_v26 = vsel %vm1379_vm0, %v6993_v18, %v6992_v52  ;;  %v2179_v9 = vrot.slane %v2165_v61, %v5339_v17  ;;  %v2221_v22 = vcombine.high %v1449_v50, %v1481_v20  ;;  %v6998_v52 = vld [vmem:[#allocation146_spill] sm:$0xff]  ;;  %v6999_v18 = vld [vmem:[#allocation45_spill] sm:$0xff] }
 0x324   :  { %v2188_v8 = vcombine.low %v1385_v26, %v5668_v6  ;;  %v2244_v59 = vrot.slane %v2236_v42, %v5325_v28  ;;  %v2184_v47 = vcombine.low %v2140_v12, %v2172_v2  ;;  %v2147_v42 = vrot.slane %v2133_v24, %v5339_v17  ;;  %v7007_v24 = vld [vmem:[#allocation120_spill] sm:$0xff] }
 0x326   :  { %3793 = vrot.lane.b32.xlu1 %v2048_v23, %s6667_s25  ;;  %3789 = vrot.lane.b32.xlu0 %v2047_v44, %s4621_s26  ;;  %v6995_v23 = vld [vmem:[#allocation29_spill] sm:$0xff]  ;;  %v2220_v44 = vcombine.low %v1449_v50, %v1481_v20  ;;  %s6669_s25 = smov 62   ;;  %v2186_v57 = vcombine.low %v2147_v42, %v2179_v9  ;;  %v1434_v50 = vsel %vm1379_vm0, %v7002_v4, %v7001_v35 }
 0x327   :  { %v1401_v62 = vsel %vm1379_vm0, %v6995_v23, %v6994_v58 }
 0x328   :  { %v2204_v40 = vcombine.low %v1401_v62, %v1433_v48  ;;  %v2228_v15 = vrot.slane %v2220_v44, %v5325_v28  ;;  %v2205_v43 = vcombine.high %v1401_v62, %v1433_v48  ;;  %v5720_v48 = vsel %vm1379_vm0, %v6999_v18, %v6998_v52  ;;  %v7006_v44 = vld [vmem:[#allocation95_spill] sm:$0xff] }
 0x329   :  { %v2235_v62 = vrot.slane %v2221_v22, %v5325_v28 }
 0x32a   :  { %3801 = vrot.lane.b32.xlu1 %v2050_v29, %s6666_s27  ;;  %3797 = vrot.lane.b32.xlu0 %v2049_v60, %s6670_s28  ;;  %s6668_s27 = smov 64   ;;  %v2051_v29 = vcombine.high %v2011_v30, %v2043_v56  ;;  %v2212_v11 = vrot.slane %v2204_v40, %v5325_v28  ;;  %v2196_v56 = vrot.slane %v2188_v8, %v5325_v28  ;;  %s6672_s28 = smov 72   ;;  %v7003_v40 = vld [vmem:[#allocation183_spill] sm:$0xff] }
 0x32b   :  { %v2181_v30 = vcombine.high %v2124_v16, %v2156_v19  ;;  %v2284_v45 = vcombine.low %v2228_v15, %v2244_v59  ;;  %v2189_v60 = vcombine.high %v1385_v26, %v5668_v6  ;;  %v2251_v19 = vrot.slane %v2237_v46, %v5325_v28  ;;  %v7000_v26 = vld [vmem:[#allocation107_spill] sm:$0xff]  ;;  %v7010_v46 = vld [vmem:[#allocation32_spill] sm:$0xff] }
 0x32c   :  { %v2252_v33 = vcombine.low %v2196_v56, %v2212_v11  ;;  %v2285_v51 = vcombine.high %v2228_v15, %v2244_v59  ;;  %v1498_v20 = vsel %vm1379_vm0, %v7000_v26, %v5398_v21  ;;  %v2253_v58 = vcombine.high %v2196_v56, %v2212_v11  ;;  %v7008_v15 = vld [vmem:[#allocation19_spill] sm:$0xff] }
 0x32d   :  { %v2292_v16 = vrot.slane %v2284_v45, %v5339_v17  ;;  %v2203_v6 = vrot.slane %v2189_v60, %v5325_v28  ;;  %v1482_v8 = vsel %vm1379_vm0, %v7006_v44, %v7005_v3  ;;  %v2300_v61 = vcombine.low %v2235_v62, %v2251_v19  ;;  %v7012_v60 = vld [vmem:[#allocation70_spill] sm:$0xff] }
 0x32e   :  { %3809 = vrot.lane.b32.xlu1 %v2180_v41, %s6668_s27  ;;  %3805 = vrot.lane.b32.xlu0 %v2051_v29, %s6669_s25  ;;  %s6671_s27 = smov 68   ;;  %s6675_s25 = smov 66   ;;  %v2183_v41 = vcombine.high %v2131_v53, %v2163_v49  ;;  %v2219_v49 = vrot.slane %v2205_v43, %v5325_v28  ;;  %v2260_v23 = vrot.slane %v2252_v33, %v5339_v17  ;;  %v7004_v53 = vld [vmem:[#allocation82_spill] sm:$0xff] }
 0x32f   :  { %v1466_v21 = vsel %vm1379_vm0, %v7004_v53, %v7003_v40  ;;  %v2185_v29 = vcombine.high %v2140_v12, %v2172_v2  ;;  %v2299_v59 = vrot.slane %v2285_v51, %v5339_v17  ;;  %v1386_v56 = vsel %vm1379_vm0, %v7008_v15, %v7007_v24  ;;  %v1346_v51 = vpop.permute.xlu1 %1345  ;;  %v7013_v24 = vld [vmem:[#allocation145_spill] sm:$0xff]  ;;  %v7014_v15 = vld [vmem:[#allocation44_spill] sm:$0xff] }
 0x330   :  { %v2316_v11 = vcombine.low %v2260_v23, %v2292_v16  ;;  %v2267_v2 = vrot.slane %v2253_v58, %v5339_v17  ;;  %v2268_v12 = vcombine.low %v2203_v6, %v2219_v49  ;;  %v2301_v52 = vcombine.high %v2235_v62, %v2251_v19 }
 0x331   :  { %v2308_v18 = vrot.slane %v2300_v61, %v5339_v17  ;;  %v2269_v58 = vcombine.high %v2203_v6, %v2219_v49  ;;  %v2373_v62 = vcombine.high %v1466_v21, %v1498_v20 }
 0x332   :  { %3817 = vrot.lane.b32.xlu1 %v2182_v5, %s6671_s27  ;;  %3813 = vrot.lane.b32.xlu0 %v2181_v30, %s6675_s25  ;;  %s6674_s27 = smov 70   ;;  %v2372_v5 = vcombine.low %v1466_v21, %v1498_v20  ;;  %v7009_v30 = vld [vmem:[#allocation133_spill] sm:$0xff]  ;;  %v2318_v35 = vcombine.low %v2267_v2, %v2299_v59  ;;  %s6677_s25 = smov 78   ;;  %v2276_v4 = vrot.slane %v2268_v12, %v5339_v17  ;;  %v7018_v12 = vld [vmem:[#allocation182_spill] sm:$0xff] }
 0x333   :  { %v1402_v45 = vsel %vm1379_vm0, %v7010_v46, %v7009_v30  ;;  %v2315_v19 = vrot.slane %v2301_v52, %v5339_v17  ;;  %v5763_v6 = vpop.permute.xlu1 %1353  ;;  %v2283_v49 = vrot.slane %v2269_v58, %v5339_v17  ;;  %v2387_v20 = vrot.slane %v2373_v62, %v5325_v28 }
 0x334   :  { %v2340_v33 = vcombine.low %v1402_v45, %v1434_v50  ;;  %v2380_v26 = vrot.slane %v2372_v5, %v5325_v28  ;;  %v2320_v44 = vcombine.low %v2276_v4, %v2308_v18  ;;  %v2341_v61 = vcombine.high %v1402_v45, %v1434_v50  ;;  %v7015_v50 = vld [vmem:[#allocation106_spill] sm:$0xff] }
 0x336   :  { %3825 = vrot.lane.b32.xlu1 %v2184_v47, %s6672_s28  ;;  %3821 = vrot.lane.b32.xlu0 %v2183_v41, %s6674_s27  ;;  %s6673_s28 = smov 76   ;;  %v7011_v47 = vld [vmem:[#allocation171_spill] sm:$0xff]  ;;  %s6676_s27 = smov 80   ;;  %v2324_v41 = vcombine.low %v1386_v56, %v5720_v48  ;;  %v2348_v40 = vrot.slane %v2340_v33, %v5325_v28  ;;  %v7019_v33 = vld [vmem:[#allocation81_spill] sm:$0xff] }
 0x337   :  { %v1450_v43 = vsel %vm1379_vm0, %v7012_v60, %v7011_v47  ;;  %v7016_v60 = vld [vmem:[#allocation157_spill] sm:$0xff]  ;;  %v5794_v52 = vpop.permute.xlu1 %1361 }
 0x338   :  { %v2356_v22 = vcombine.low %v1450_v43, %v1482_v8 }
 0x33a   :  { %3833 = vrot.lane.b32.xlu1 %v2186_v57, %s6673_s28  ;;  %s6690_s28 = smov 74   ;;  %v2187_v57 = vcombine.high %v2147_v42, %v2179_v9  ;;  %v2364_v53 = vrot.slane %v2356_v22, %v5325_v28  ;;  %v2332_v9 = vrot.slane %v2324_v41, %v5325_v28  ;;  %v2317_v42 = vcombine.high %v2260_v23, %v2292_v16  ;;  %v7020_v41 = vld [vmem:[#allocation195_spill] sm:$0xff] }
 0x33b   :  { %3829 = vrot.lane.b32.xlu0 %v2185_v29, %s6690_s28  ;;  %v2325_v29 = vcombine.high %v1386_v56, %v5720_v48  ;;  %v2319_v16 = vcombine.high %v2267_v2, %v2299_v59  ;;  %v2322_v48 = vcombine.low %v2283_v49, %v2315_v19  ;;  %v5773_v56 = vsel %vm1379_vm0, %v7014_v15, %v7013_v24  ;;  %s6693_s28 = smov 112  }
 0x33c   :  { %v2420_v3 = vcombine.low %v2364_v53, %v2380_v26  ;;  %v2388_v5 = vcombine.low %v2332_v9, %v2348_v40  ;;  %v2421_v23 = vcombine.high %v2364_v53, %v2380_v26  ;;  %v2355_v59 = vrot.slane %v2341_v61, %v5325_v28  ;;  %v7026_v61 = vld [vmem:[#allocation170_spill] sm:$0xff] }
 0x33d   :  { %v2339_v30 = vrot.slane %v2325_v29, %v5325_v28  ;;  %v2389_v46 = vcombine.high %v2332_v9, %v2348_v40  ;;  %v1467_v22 = vsel %vm1379_vm0, %v7019_v33, %v7018_v12  ;;  %v2321_v26 = vcombine.high %v2276_v4, %v2308_v18  ;;  %v7022_v9 = vld [vmem:[#allocation119_spill] sm:$0xff]  ;;  %v5815_v33 = vpop.permute.xlu1 %1369 }
 0x33e   :  { %3841 = vrot.lane.b32.xlu1 %v2316_v11, %s6676_s27  ;;  %s6678_s27 = smov 84   ;;  %v2357_v11 = vcombine.high %v1450_v43, %v1482_v8  ;;  %v2428_v21 = vrot.slane %v2420_v3, %v5339_v17  ;;  %v5778_v8 = vsel %vm1379_vm0, %v7015_v50, %v1346_v51  ;;  %v2396_v45 = vrot.slane %v2388_v5, %v5339_v17  ;;  %v7017_v43 = vld [vmem:[#allocation56_spill] sm:$0xff]  ;;  %v7021_v51 = vld [vmem:[#allocation94_spill] sm:$0xff]  ;;  %v7027_v5 = vld [vmem:[#allocation69_spill] sm:$0xff] }
 0x33f   :  { %3837 = vrot.lane.b32.xlu0 %v2187_v57, %s6677_s25  ;;  %s6679_s25 = smov 82   ;;  %v1435_v2 = vsel %vm1379_vm0, %v7017_v43, %v7016_v60  ;;  %v1483_v57 = vsel %vm1379_vm0, %v7021_v51, %v7020_v41  ;;  %v2435_v58 = vrot.slane %v2421_v23, %v5339_v17  ;;  %v7024_v3 = vld [vmem:[#allocation132_spill] sm:$0xff]  ;;  %v2403_v4 = vrot.slane %v2389_v46, %v5339_v17 }
 0x340   :  { %v2371_v47 = vrot.slane %v2357_v11, %v5325_v28  ;;  %v2452_v53 = vcombine.low %v2396_v45, %v2428_v21  ;;  %v1451_v11 = vsel %vm1379_vm0, %v7027_v5, %v7026_v61  ;;  %v2323_v15 = vcombine.high %v2283_v49, %v2315_v19 }
 0x341   :  { %v2492_v23 = vcombine.low %v1451_v11, %v1483_v57  ;;  %v2454_v12 = vcombine.low %v2403_v4, %v2435_v58  ;;  %v2405_v41 = vcombine.high %v2339_v30, %v2355_v59  ;;  %v2453_v49 = vcombine.high %v2396_v45, %v2428_v21 }
 0x342   :  { %3849 = vrot.lane.b32.xlu1 %v2318_v35, %s6678_s27  ;;  %s6680_s27 = smov 88   ;;  %v2508_v35 = vcombine.low %v1467_v22, %v5778_v8  ;;  %v2436_v40 = vcombine.low %v2371_v47, %v2387_v20  ;;  %v2437_v60 = vcombine.high %v2371_v47, %v2387_v20  ;;  %v2509_v20 = vcombine.high %v1467_v22, %v5778_v8  ;;  %v5831_v8 = vpop.permute.xlu1 %1377 }
 0x343   :  { %3845 = vrot.lane.b32.xlu0 %v2317_v42, %s6679_s25  ;;  %s6682_s25 = smov 86   ;;  %v7023_v42 = vld [vmem:[#allocation18_spill] sm:$0xff]  ;;  %v2455_v45 = vcombine.high %v2403_v4, %v2435_v58 }
 0x344   :  { %v1387_v62 = vsel %vm1379_vm0, %v7023_v42, %v7022_v9  ;;  %v2516_v50 = vrot.slane %v2508_v35, %v5325_v28  ;;  %v2444_v43 = vrot.slane %v2436_v40, %v5339_v17  ;;  %v2451_v35 = vrot.slane %v2437_v60, %v5339_v17 }
 0x345   :  { %v2460_v24 = vcombine.low %v1387_v62, %v5773_v56  ;;  %v2419_v9 = vrot.slane %v2405_v41, %v5339_v17  ;;  %v2493_v42 = vcombine.high %v1451_v11, %v1483_v57  ;;  %v2461_v21 = vcombine.high %v1387_v62, %v5773_v56 }
 0x346   :  { %3857 = vrot.lane.b32.xlu1 %v2320_v44, %s6680_s27  ;;  %s6681_s27 = smov 92   ;;  %v7025_v44 = vld [vmem:[#allocation31_spill] sm:$0xff]  ;;  %v2523_v22 = vrot.slane %v2509_v20, %v5325_v28 }
 0x347   :  { %3853 = vrot.lane.b32.xlu0 %v2319_v16, %s6682_s25  ;;  %v1403_v29 = vsel %vm1379_vm0, %v7025_v44, %v7024_v3  ;;  %v2404_v16 = vcombine.low %v2339_v30, %v2355_v59  ;;  %s6684_s25 = smov 96   ;;  %v2468_v19 = vrot.slane %v2460_v24, %v5325_v28  ;;  %v2458_v61 = vcombine.low %v2419_v9, %v2451_v35 }
 0x348   :  { %v2476_v18 = vcombine.low %v1403_v29, %v1435_v2  ;;  %v2477_v30 = vcombine.high %v1403_v29, %v1435_v2  ;;  %v2507_v5 = vrot.slane %v2493_v42, %v5325_v28  ;;  %v2475_v11 = vrot.slane %v2461_v21, %v5325_v28 }
 0x349   :  { %v2412_v51 = vrot.slane %v2404_v16, %v5339_v17 }
 0x34a   :  { %3865 = vrot.lane.b32.xlu1 %v2322_v48, %s6681_s27  ;;  %s6683_s27 = smov 90   ;;  %v5809_v48 = vpop.permute.xlu0 %1357  ;;  %v2484_v46 = vrot.slane %v2476_v18, %v5325_v28  ;;  %v2491_v2 = vrot.slane %v2477_v30, %v5325_v28  ;;  %v2572_v4 = vcombine.low %v2507_v5, %v2523_v22  ;;  %v2573_v60 = vcombine.high %v2507_v5, %v2523_v22  ;;  %v7038_v5 = vld [vmem:[#allocation83_spill] sm:$0xff] }
 0x34b   :  { %3861 = vrot.lane.b32.xlu0 %v2321_v26, %s6683_s27  ;;  %s6685_s27 = smov 94   ;;  %v2500_v26 = vrot.slane %v2492_v23, %v5325_v28  ;;  %v2457_v58 = vcombine.high %v2412_v51, %v2444_v43  ;;  %v2629_v30 = vcombine.high %v5462_v1, %v5452_v34  ;;  %v2693_v22 = vcombine.high %v5490_v37, %v5495_v10  ;;  %v7037_v10 = vld [vmem:[#allocation184_spill] sm:$0xff] }
 0x34c   :  { %v2524_v59 = vcombine.low %v2468_v19, %v2484_v46  ;;  %v2525_v57 = vcombine.high %v2468_v19, %v2484_v46  ;;  %v2540_v24 = vcombine.low %v2475_v11, %v2491_v2  ;;  %v2541_v41 = vcombine.high %v2475_v11, %v2491_v2  ;;  %v7034_v2 = vld [vmem:[#allocation58_spill] sm:$0xff]  ;;  %v7039_v11 = vld [vmem:[#allocation197_spill] sm:$0xff] }
 0x34d   :  { %v2556_v47 = vcombine.low %v2500_v26, %v2516_v50  ;;  %v2557_v3 = vcombine.high %v2500_v26, %v2516_v50  ;;  %v2459_v50 = vcombine.high %v2419_v9, %v2451_v35  ;;  %v2597_v26 = vcombine.high %v5446_v38, %v5434_v25  ;;  %v7028_v25 = vld [vmem:[#allocation121_spill] sm:$0xff]  ;;  %v7029_v38 = vld [vmem:[#allocation20_spill] sm:$0xff] }
 0x34e   :  { %3873 = vrot.lane.b32.xlu1 %v2452_v53, %s6684_s25  ;;  %s6686_s25 = smov 100   ;;  %v5825_v40 = vpop.permute.xlu0 %1365  ;;  %v2456_v53 = vcombine.low %v2412_v51, %v2444_v43  ;;  %v2532_v29 = vrot.slane %v2524_v59, %v5339_v17  ;;  %v2539_v23 = vrot.slane %v2525_v57, %v5339_v17  ;;  %v2580_v43 = vrot.slane %v2572_v4, %v5339_v17  ;;  %v7031_v59 = vld [vmem:[#allocation46_spill] sm:$0xff] }
 0x34f   :  { %3869 = vrot.lane.b32.xlu0 %v2323_v15, %s6685_s27  ;;  %s6687_s27 = smov 98   ;;  %v2564_v44 = vrot.slane %v2556_v47, %v5339_v17  ;;  %v2571_v18 = vrot.slane %v2557_v3, %v5339_v17  ;;  %v2548_v51 = vrot.slane %v2540_v24, %v5339_v17  ;;  %v2645_v19 = vcombine.high %v5477_v32, %v5466_v13  ;;  %v7030_v32 = vld [vmem:[#allocation147_spill] sm:$0xff] }
 0x350   :  { %v5860_v20 = vrot.slane %v2573_v60, %v5339_v17  ;;  %v5870_v13 = vsel %vm1379_vm0, %v7029_v38, %v7028_v25  ;;  %v5875_v9 = vsel %vm1379_vm0, %v7031_v59, %v7030_v32  ;;  %v2555_v42 = vrot.slane %v2541_v41, %v5339_v17  ;;  %v7042_v41 = vld [vmem:[#allocation33_spill] sm:$0xff] }
 0x351   :  { %v2588_v16 = vcombine.low %v2532_v29, %v2564_v44  ;;  %v2592_v47 = vcombine.low %v2548_v51, %v2580_v43  ;;  %v5888_v1 = vrot.slane %v2645_v19, %v5325_v28  ;;  %v2591_v21 = vcombine.high %v2539_v23, %v2571_v18 }
 0x352   :  { %3881 = vrot.lane.b32.xlu1 %v2454_v12, %s6686_s25  ;;  %s6688_s25 = smov 104   ;;  %v5839_v56 = vpop.permute.xlu0 %1373  ;;  %v2590_v12 = vcombine.low %v2539_v23, %v2571_v18  ;;  %v7040_v18 = vld [vmem:[#allocation96_spill] sm:$0xff]  ;;  %v2593_v24 = vcombine.high %v2548_v51, %v2580_v43  ;;  %v2725_v60 = vcombine.high %v5508_v54, %v5513_v31  ;;  %v2732_v19 = vcombine.low %v5870_v13, %v5875_v9  ;;  %v7043_v43 = vld [vmem:[#allocation122_spill] sm:$0xff]  ;;  %v7044_v51 = vld [vmem:[#allocation21_spill] sm:$0xff] }
 0x353   :  { %3877 = vrot.lane.b32.xlu0 %v2453_v49, %s6687_s27  ;;  %s6689_s27 = smov 102   ;;  %v2589_v49 = vcombine.high %v2532_v29, %v2564_v44  ;;  %v2594_v44 = vcombine.low %v2555_v42, %v5860_v20  ;;  %v2643_v29 = vrot.slane %v2629_v30, %v5325_v28  ;;  %v5922_v4 = vsel %vm1379_vm0, %v7040_v18, %v7039_v11  ;;  %v7048_v18 = vld [vmem:[#allocation48_spill] sm:$0xff] }
 0x354   :  { %v2595_v59 = vcombine.high %v2555_v42, %v5860_v20 }
 0x355   :  { %v2708_v7 = vcombine.low %v2643_v29, %v5888_v1  ;;  %v2709_v38 = vcombine.high %v2643_v29, %v5888_v1 }
 0x356   :  { %3889 = vrot.lane.b32.xlu1 %v2456_v53, %s6688_s25  ;;  %s6691_s25 = smov 108   ;;  %v2613_v53 = vcombine.high %v5429_v14, %v5421_v63  ;;  %v5880_v63 = vrot.slane %v2597_v26, %v5325_v28  ;;  %v7032_v14 = vld [vmem:[#allocation108_spill] sm:$0xff] }
 0x357   :  { %3885 = vrot.lane.b32.xlu0 %v2455_v45, %s6689_s27  ;;  %s6692_s27 = smov 106   ;;  %v5885_v34 = vsel %vm1379_vm0, %v7032_v14, %v5763_v6  ;;  %v2716_v14 = vrot.slane %v2708_v7, %v5339_v17 }
 0x358   :  { %v5903_v57 = vrot.slane %v2613_v53, %v5325_v28  ;;  %v2675_v53 = vrot.slane %v2661_v36, %v5339_v17 }
 0x35a   :  { %3897 = vrot.lane.b32.xlu1 %v2458_v61, %s6691_s25  ;;  %s4649_s25 = smov 110   ;;  %v7033_v61 = vld [vmem:[#allocation159_spill] sm:$0xff]  ;;  %v2676_v30 = vcombine.low %v5880_v63, %v5903_v57  ;;  %v2677_v42 = vcombine.high %v5880_v63, %v5903_v57  ;;  %v7046_v63 = vld [vmem:[#allocation22_spill] sm:$0xff] }
 0x35b   :  { %3893 = vrot.lane.b32.xlu0 %v2457_v58, %s6692_s27  ;;  %s6694_s27 = smov 116   ;;  %v5900_v6 = vsel %vm1379_vm0, %v7034_v2, %v7033_v61  ;;  %v5917_v58 = vsel %vm1379_vm0, %v7038_v5, %v7037_v10  ;;  %v5962_v61 = vrot.slane %v2732_v19, %v5325_v28  ;;  %v7045_v5 = vld [vmem:[#allocation123_spill] sm:$0xff] }
 0x35c   :  { %v2780_v55 = vcombine.low %v5917_v58, %v5885_v34  ;;  %v2684_v2 = vrot.slane %v2676_v30, %v5339_v17  ;;  %v5980_v57 = vsel %vm1379_vm0, %v7046_v63, %v7045_v5  ;;  %v7052_v30 = vld [vmem:[#allocation186_spill] sm:$0xff] }
 0x35e   :  { %3905 = vrot.lane.b32.xlu1 %v2588_v16, %s6693_s28  ;;  %s4651_s28 = smov 114   ;;  %v2788_v25 = vrot.slane %v2780_v55, %v5325_v28  ;;  %v2729_v10 = vcombine.high %v2684_v2, %v2716_v14 }
 0x35f   :  { %3901 = vrot.lane.b32.xlu0 %v2459_v50, %s4649_s25 }
 0x362   :  { %3913 = vrot.lane.b32.xlu1 %v2590_v12, %s6694_s27  ;;  %s6695_s27 = smov 120   ;;  %v7041_v12 = vld [vmem:[#allocation134_spill] sm:$0xff] }
 0x363   :  { %3909 = vrot.lane.b32.xlu0 %v2589_v49, %s4651_s28  ;;  %v1405_v26 = vsel %vm1379_vm0, %v7042_v41, %v7041_v12 }
 0x364   :  { %v5842_v62 = vpop.permute.xlu1 %3689  ;;  %v3686_v15 = vpop.permute.xlu0 %3685 }
 0x365   :  { %v4189_v3 = vsel %vm4188_vm1, %v1636_v39, %v3686_v15  ;;  %v7036_v39 = vld [vmem:[#allocation71_spill] sm:$0xff]  ;;  %v2707_v15 = vrot.slane %v2693_v22, %v5339_v17 }
 0x366   :  { %3921 = vrot.lane.b32.xlu1 %v2592_v47, %s6695_s27  ;;  %s6696_s27 = smov 118   ;;  %v5912_v37 = vsel %vm1379_vm0, %v7036_v39, %v7035_v0  ;;  %v4191_v23 = vsel %vm4190_vm2, %v4189_v3, %v5842_v62  ;;  %v5945_v47 = vsel %vm1379_vm0, %v7044_v51, %v7043_v43  ;;  %v2723_v39 = vrot.slane %v2709_v38, %v5339_v17  ;;  %v7050_v51 = vld [vmem:[#allocation161_spill] sm:$0xff] }
 0x367   :  { %3917 = vrot.lane.b32.xlu0 %v2591_v21, %s6696_s27  ;;  %s6697_s27 = smov 124   ;;  %v2764_v49 = vcombine.low %v5912_v37, %v5922_v4  ;;  %v2727_v3 = vcombine.high %v2675_v53, %v2707_v15  ;;  %v2726_v36 = vcombine.low %v2675_v53, %v2707_v15  ;;  %v2728_v15 = vcombine.low %v2684_v2, %v2716_v14  ;;  %v7057_v2 = vld [vmem:[#allocation35_spill] sm:$0xff] }
 0x368   :  { %v5851_v46 = vpop.permute.xlu1 %3697  ;;  %v3694_v35 = vpop.permute.xlu0 %3693 }
 0x369   :  { %v4193_v50 = vsel %vm4192_vm3, %v4191_v23, %v3694_v35  ;;  %v2748_v35 = vcombine.low %v1405_v26, %v5900_v6  ;;  %v2772_v1 = vrot.slane %v2764_v49, %v5325_v28  ;;  %v2691_v23 = vrot.slane %v2677_v42, %v5339_v17  ;;  %v7049_v49 = vld [vmem:[#allocation110_spill] sm:$0xff]  ;;  %v7056_v42 = vld [vmem:[#allocation136_spill] sm:$0xff] }
 0x36a   :  { %3929 = vrot.lane.b32.xlu1 %v2594_v44, %s6697_s27  ;;  %s4655_s27 = smov 122   ;;  %v4195_v32 = vsel %vm4194_vm4, %v4193_v50, %v5851_v46  ;;  %v2733_v44 = vcombine.high %v5870_v13, %v5875_v9  ;;  %v2749_v46 = vcombine.high %v1405_v26, %v5900_v6  ;;  %v2781_v13 = vcombine.high %v5917_v58, %v5885_v34  ;;  %v7047_v58 = vld [vmem:[#allocation149_spill] sm:$0xff] }
 0x36b   :  { %3925 = vrot.lane.b32.xlu0 %v2593_v24, %s4655_s27  ;;  %v2756_v20 = vrot.slane %v2748_v35, %v5325_v28  ;;  %v2828_v9 = vcombine.low %v2772_v1, %v2788_v25  ;;  %v2765_v34 = vcombine.high %v5912_v37, %v5922_v4  ;;  %v2829_v4 = vcombine.high %v2772_v1, %v2788_v25  ;;  %v7051_v35 = vld [vmem:[#allocation60_spill] sm:$0xff]  ;;  %v7053_v25 = vld [vmem:[#allocation85_spill] sm:$0xff] }
 0x36c   :  { %v3706_v45 = vpop.permute.xlu1 %3705  ;;  %v3702_v16 = vpop.permute.xlu0 %3701  ;;  %v5983_v11 = vrot.slane %v2733_v44, %v5325_v28  ;;  %v5994_v55 = vrot.slane %v2749_v46, %v5325_v28  ;;  %v2795_v37 = vrot.slane %v2781_v13, %v5325_v28  ;;  %v2731_v41 = vcombine.high %v2691_v23, %v2723_v39 }
 0x36d   :  { %v4197_v21 = vsel %vm4196_vm5, %v4195_v32, %v3702_v16  ;;  %v5991_v16 = vsel %vm1379_vm0, %v7048_v18, %v7047_v58  ;;  %v2796_v7 = vcombine.low %v5962_v61, %v2756_v20  ;;  %v2797_v26 = vcombine.high %v5962_v61, %v2756_v20  ;;  %v7054_v32 = vld [vmem:[#allocation196_spill] sm:$0xff] }
 0x36e   :  { %3937 = vrot.lane.b32.xlu1 %v2725_v60, %s4595_s30  ;;  %s4656_s30 = smov 126   ;;  %v4199_v29 = vsel %vm4198_vm6, %v4197_v21, %v3706_v45  ;;  %v2836_v60 = vrot.slane %v2828_v9, %v5339_v17  ;;  %v2779_v19 = vrot.slane %v2765_v34, %v5325_v28  ;;  %v6008_v43 = vsel %vm1379_vm0, %v7049_v49, %v5809_v48 }
 0x36f   :  { %3933 = vrot.lane.b32.xlu0 %v2595_v59, %s4656_s30  ;;  %v6015_v53 = vsel %vm1379_vm0, %v7051_v35, %v7050_v51  ;;  %v6020_v38 = vsel %vm1379_vm0, %v7053_v25, %v7052_v30  ;;  %v7055_v59 = vld [vmem:[#allocation98_spill] sm:$0xff]  ;;  %v2843_v14 = vrot.slane %v2829_v4, %v5339_v17  ;;  %v2730_v44 = vcombine.low %v2691_v23, %v2723_v39 }
 0x370   :  { %v3714_v62 = vpop.permute.xlu1 %3713  ;;  %v3710_v22 = vpop.permute.xlu0 %3709  ;;  %v6025_v48 = vsel %vm1379_vm0, %v7055_v59, %v7054_v32  ;;  %v2844_v21 = vcombine.low %v2779_v19, %v2795_v37  ;;  %v2916_v61 = vcombine.low %v6020_v38, %v6008_v43  ;;  %v1406_v13 = vsel %vm1379_vm0, %v7057_v2, %v7056_v42 }
 0x371   :  { %v4201_v6 = vsel %vm4200_vm7, %v4199_v29, %v3710_v22  ;;  %v2868_v9 = vcombine.low %v5980_v57, %v5991_v16  ;;  %v7058_v29 = vld [vmem:[#allocation174_spill] sm:$0xff]  ;;  %v2811_v39 = vrot.slane %v2797_v26, %v5339_v17  ;;  %v2845_v63 = vcombine.high %v2779_v19, %v2795_v37 }
 0x372   :  { %3945 = vrot.lane.b32.xlu1 %v2727_v3, %s4597_s5  ;;  %v4203_v24 = vsel %vm4202_vm8, %v4201_v6, %v3714_v62  ;;  %v2804_v62 = vrot.slane %v2796_v7, %v5339_v17  ;;  %v2812_v6 = vcombine.low %v5983_v11, %v5994_v55  ;;  %v2852_v34 = vrot.slane %v2844_v21, %v5339_v17  ;;  %s7103_s5 = smov 62  }
 0x373   :  { %3941 = vrot.lane.b32.xlu0 %v2726_v36, %s4594_s29  ;;  %v7059_v36 = vld [vmem:[#allocation73_spill] sm:$0xff]  ;;  %v2924_v7 = vrot.slane %v2916_v61, %v5325_v28  ;;  %v2869_v37 = vcombine.high %v5980_v57, %v5991_v16  ;;  %v6060_v26 = vrot.slane %v2868_v9, %v5325_v28  ;;  %v2917_v57 = vcombine.high %v6020_v38, %v6008_v43  ;;  %v7062_v38 = vld [vmem:[#allocation160_spill] sm:$0xff]  ;;  %s7095_s29 = smov 58  }
 0x374   :  { %v3722_v0 = vpop.permute.xlu1 %3721  ;;  %v3718_v45 = vpop.permute.xlu0 %3717  ;;  %v2861_v20 = vcombine.high %v2804_v62, %v2836_v60  ;;  %v2860_v18 = vcombine.low %v2804_v62, %v2836_v60  ;;  %v2820_v60 = vrot.slane %v2812_v6, %v5339_v17  ;;  %v2859_v62 = vrot.slane %v2845_v63, %v5339_v17  ;;  %v7066_v6 = vld [vmem:[#allocation72_spill] sm:$0xff] }
 0x375   :  { %v4205_v12 = vsel %vm4204_vm9, %v4203_v24, %v3718_v45  ;;  %v2863_v24 = vcombine.high %v2811_v39, %v2843_v14  ;;  %v2862_v35 = vcombine.low %v2811_v39, %v2843_v14  ;;  %v6075_v32 = vrot.slane %v2869_v37, %v5325_v28  ;;  %v7063_v14 = vld [vmem:[#allocation59_spill] sm:$0xff]  ;;  %v7065_v39 = vld [vmem:[#allocation173_spill] sm:$0xff]  ;;  %v7068_v63 = vld [vmem:[#allocation84_spill] sm:$0xff] }
 0x376   :  { %3953 = vrot.lane.b32.xlu1 %v2729_v10, %s4599_s6  ;;  %v4207_v22 = vsel %vm4206_vm10, %v4205_v12, %v3722_v0  ;;  %v1454_v0 = vsel %vm1379_vm0, %v7059_v36, %v7058_v29  ;;  %v2884_v10 = vcombine.low %v1406_v13, %v6015_v53  ;;  %v7061_v12 = vld [vmem:[#allocation47_spill] sm:$0xff]  ;;  %v2865_v25 = vcombine.high %v2820_v60, %v2852_v34  ;;  %s7107_s6 = smov 66  }
 0x377   :  { %3949 = vrot.lane.b32.xlu0 %v2728_v15, %s4596_s4  ;;  %v2900_v5 = vcombine.low %v1454_v0, %v6025_v48  ;;  %v7060_v15 = vld [vmem:[#allocation148_spill] sm:$0xff]  ;;  %v2885_v59 = vcombine.high %v1406_v13, %v6015_v53  ;;  %v2901_v21 = vcombine.high %v1454_v0, %v6025_v48  ;;  %v6094_v53 = vrot.slane %v2917_v57, %v5325_v28  ;;  %v7073_v57 = vld [vmem:[#allocation135_spill] sm:$0xff]  ;;  %s7096_s4 = smov 56  }
 0x378   :  { %v3730_v50 = vpop.permute.xlu1 %3729  ;;  %v3726_v3 = vpop.permute.xlu0 %3725  ;;  %v2892_v19 = vrot.slane %v2884_v10, %v5325_v28  ;;  %v6109_v10 = vsel %vm1379_vm0, %v7066_v6, %v7065_v39 }
 0x379   :  { %v4209_v1 = vsel %vm4208_vm11, %v4207_v22, %v3726_v3  ;;  %v2908_v49 = vrot.slane %v2900_v5, %v5325_v28  ;;  %v6084_v22 = vsel %vm1379_vm0, %v7063_v14, %v7062_v38  ;;  %v2915_v36 = vrot.slane %v2901_v21, %v5325_v28  ;;  %v7067_v5 = vld [vmem:[#allocation185_spill] sm:$0xff] }
 0x37a   :  { %3961 = vrot.lane.b32.xlu1 %v2731_v41, %s4601_s8  ;;  %v4211_v45 = vsel %vm6699_vm12, %v4209_v1, %v3730_v50  ;;  %v6055_v41 = vsel %vm1379_vm0, %v7061_v12, %v7060_v15  ;;  %v2813_v50 = vcombine.high %v5983_v11, %v5994_v55  ;;  %vm6702_vm12 = vcmask 277504   ;;  %s7109_s8 = smov 70  }
 0x37b   :  { %3957 = vrot.lane.b32.xlu0 %v2730_v44, %s4598_s0  ;;  %v2964_v30 = vcombine.low %v2908_v49, %v2924_v7  ;;  %v2932_v3 = vcombine.low %v6060_v26, %v2892_v19  ;;  %v7064_v44 = vld [vmem:[#allocation109_spill] sm:$0xff]  ;;  %v2965_v48 = vcombine.high %v2908_v49, %v2924_v7  ;;  %v2933_v29 = vcombine.high %v6060_v26, %v2892_v19  ;;  %v7072_v19 = vld [vmem:[#allocation23_spill] sm:$0xff]  ;;  %s7106_s0 = smov 60  }
 0x37c   :  { %v3738_v46 = vpop.permute.xlu1 %3737  ;;  %v3734_v58 = vpop.permute.xlu0 %3733  ;;  %v2827_v43 = vrot.slane %v2813_v50, %v5339_v17  ;;  %v6090_v61 = vsel %vm1379_vm0, %v7064_v44, %v5794_v52  ;;  %v6100_v52 = vrot.slane %v2885_v59, %v5325_v28  ;;  %v2981_v59 = vcombine.high %v2915_v36, %v6094_v53 }
 0x37d   :  { %v4213_v23 = vsel %vm6698_vm13, %v4211_v45, %v3734_v58  ;;  %vm6715_vm13 = vcmask 261120   ;;  %v2972_v42 = vrot.slane %v2964_v30, %v5339_v17  ;;  %v2940_v0 = vrot.slane %v2932_v3, %v5339_v17  ;;  %v7069_v45 = vld [vmem:[#allocation199_spill] sm:$0xff]  ;;  %v7070_v58 = vld [vmem:[#allocation97_spill] sm:$0xff] }
 0x37e   :  { %3969 = vrot.lane.b32.xlu1 %v2861_v20, %s4603_s10  ;;  %v4215_v16 = vsel %vm6701_vm14, %v4213_v23, %v3738_v46  ;;  %v2864_v20 = vcombine.low %v2820_v60, %v2852_v34  ;;  %v2867_v9 = vcombine.high %v2827_v43, %v2859_v62  ;;  %vm6704_vm14 = vcmask 310272   ;;  %v7071_v60 = vld [vmem:[#allocation124_spill] sm:$0xff]  ;;  %s7115_s10 = smov 74  }
 0x37f   :  { %3965 = vrot.lane.b32.xlu0 %v2860_v18, %s4600_s7  ;;  %v6114_v34 = vsel %vm1379_vm0, %v7068_v63, %v7067_v5  ;;  %v6119_v18 = vsel %vm1379_vm0, %v7070_v58, %v7069_v45  ;;  %v2980_v23 = vcombine.low %v2915_v36, %v6094_v53  ;;  %v2866_v15 = vcombine.low %v2827_v43, %v2859_v62  ;;  %v7078_v58 = vld [vmem:[#allocation50_spill] sm:$0xff]  ;;  %s7108_s7 = smov 64  }
 0x380   :  { %v3746_v4 = vpop.permute.xlu1 %3745  ;;  %v3742_v51 = vpop.permute.xlu0 %3741  ;;  %v3052_v7 = vcombine.low %v6114_v34, %v6090_v61  ;;  %v2979_v12 = vrot.slane %v2965_v48, %v5339_v17  ;;  %v2997_v50 = vcombine.high %v2940_v0, %v2972_v42  ;;  %v6131_v49 = vsel %vm1379_vm0, %v7072_v19, %v7071_v60 }
 0x381   :  { %v4217_v11 = vsel %vm6700_vm15, %v4215_v16, %v3742_v51  ;;  %vm6703_vm15 = vcmask 293888   ;;  %v7074_v16 = vld [vmem:[#allocation34_spill] sm:$0xff]  ;;  %v3004_v62 = vcombine.low %v5945_v47, %v6055_v41  ;;  %v2996_v38 = vcombine.low %v2940_v0, %v2972_v42 }
 0x382   :  { %3977 = vrot.lane.b32.xlu1 %v2863_v24, %s4605_s12  ;;  %v4219_v1 = vsel %vm6715_vm13, %v4217_v11, %v3746_v4  ;;  %v1407_v51 = vsel %vm1379_vm0, %v7074_v16, %v7073_v57  ;;  %v2947_v11 = vrot.slane %v2933_v29, %v5339_v17  ;;  %v2988_v14 = vrot.slane %v2980_v23, %v5339_v17  ;;  %s7124_s12 = smov 78  }
 0x383   :  { %3973 = vrot.lane.b32.xlu0 %v2862_v35, %s4602_s9  ;;  %v3036_v35 = vcombine.low %v6109_v10, %v6119_v18  ;;  %v3020_v30 = vcombine.low %v1407_v51, %v6084_v22  ;;  %v3012_v42 = vrot.slane %v3004_v62, %v5325_v28  ;;  %v3053_v36 = vcombine.high %v6114_v34, %v6090_v61  ;;  %v7077_v34 = vld [vmem:[#allocation151_spill] sm:$0xff]  ;;  %s7112_s9 = smov 68  }
 0x384   :  { %v3754_v55 = vpop.permute.xlu1 %3753  ;;  %v3750_v46 = vpop.permute.xlu0 %3749  ;;  %v2999_v48 = vcombine.high %v2947_v11, %v2979_v12  ;;  %v2998_v39 = vcombine.low %v2947_v11, %v2979_v12  ;;  %v2995_v6 = vrot.slane %v2981_v59, %v5339_v17  ;;  %v3037_v61 = vcombine.high %v6109_v10, %v6119_v18 }
 0x385   :  { %v4221_v2 = vsel %vm6702_vm12, %v4219_v1, %v3750_v46  ;;  %vm6705_vm12 = vcmask 326656   ;;  %v7075_v1 = vld [vmem:[#allocation125_spill] sm:$0xff]  ;;  %v7076_v46 = vld [vmem:[#allocation24_spill] sm:$0xff]  ;;  %v3044_v53 = vrot.slane %v3036_v35, %v5325_v28  ;;  %vm6718_vm13 = vcmask 539648  }
 0x386   :  { %3985 = vrot.lane.b32.xlu1 %v2865_v25, %s4607_s14  ;;  %v4223_v4 = vsel %vm6703_vm15, %v4221_v2, %v3754_v55  ;;  %vm6706_vm15 = vcmask 343040   ;;  %v2948_v55 = vcombine.low %v6075_v32, %v6100_v52  ;;  %v3060_v25 = vrot.slane %v3052_v7, %v5325_v28  ;;  %v7081_v35 = vld [vmem:[#allocation112_spill] sm:$0xff]  ;;  %s7130_s14 = smov 82  }
 0x387   :  { %3981 = vrot.lane.b32.xlu0 %v2864_v20, %s4604_s11  ;;  %v6154_v20 = vsel %vm1379_vm0, %v7076_v46, %v7075_v1  ;;  %v3005_v2 = vcombine.high %v5945_v47, %v6055_v41  ;;  %v6181_v7 = vsel %vm1379_vm0, %v7078_v58, %v7077_v34  ;;  %v6201_v62 = vsel %vm1379_vm0, %v7081_v35, %v5825_v40  ;;  %s7117_s11 = smov 72  }
 0x388   :  { %v3762_v13 = vpop.permute.xlu1 %3761  ;;  %v3758_v24 = vpop.permute.xlu0 %3757  ;;  %v2956_v29 = vrot.slane %v2948_v55, %v5339_v17  ;;  %v3100_v47 = vcombine.low %v3044_v53, %v3060_v25  ;;  %v3101_v10 = vcombine.high %v3044_v53, %v3060_v25  ;;  %v7082_v55 = vld [vmem:[#allocation188_spill] sm:$0xff]  ;;  %v7083_v25 = vld [vmem:[#allocation87_spill] sm:$0xff] }
 0x389   :  { %v4225_v37 = vsel %vm6704_vm14, %v4223_v4, %v3758_v24  ;;  %vm6707_vm14 = vcmask 359424   ;;  %v7079_v24 = vld [vmem:[#allocation163_spill] sm:$0xff]  ;;  %v6208_v59 = vsel %vm1379_vm0, %v7083_v25, %v7082_v55 }
 0x38a   :  { %3993 = vrot.lane.b32.xlu1 %v2867_v9, %s4609_s1  ;;  %v4227_v21 = vsel %vm6705_vm12, %v4225_v37, %v3762_v13  ;;  %vm6708_vm12 = vcmask 375808   ;;  %v3028_v13 = vrot.slane %v3020_v30, %v5325_v28  ;;  %v2949_v9 = vcombine.high %v6075_v32, %v6100_v52  ;;  %s7134_s1 = smov 86  }
 0x38b   :  { %3989 = vrot.lane.b32.xlu0 %v2866_v15, %s4606_s13  ;;  %v3001_v45 = vcombine.high %v2956_v29, %v2988_v14  ;;  %v6172_v32 = vrot.slane %v3005_v2, %v5325_v28  ;;  %v3021_v52 = vcombine.high %v1407_v51, %v6084_v22  ;;  %v7080_v15 = vld [vmem:[#allocation62_spill] sm:$0xff]  ;;  %v3067_v22 = vrot.slane %v3053_v36, %v5325_v28  ;;  %v7088_v36 = vld [vmem:[#allocation176_spill] sm:$0xff]  ;;  %s7129_s13 = smov 76  }
 0x38c   :  { %v3770_v26 = vpop.permute.xlu1 %3769  ;;  %v3766_v43 = vpop.permute.xlu0 %3765  ;;  %v3068_v23 = vcombine.low %v3012_v42, %v3028_v13  ;;  %v2963_v4 = vrot.slane %v2949_v9, %v5339_v17  ;;  %v6187_v12 = vsel %vm1379_vm0, %v7080_v15, %v7079_v24  ;;  %v3051_v51 = vrot.slane %v3037_v61, %v5325_v28  ;;  %v7090_v15 = vld [vmem:[#allocation150_spill] sm:$0xff] }
 0x38d   :  { %v4229_v3 = vsel %vm6706_vm15, %v4227_v21, %v3766_v43  ;;  %vm6709_vm15 = vcmask 392192   ;;  %v6195_v16 = vrot.slane %v3021_v52, %v5325_v28  ;;  %v3069_v30 = vcombine.high %v3012_v42, %v3028_v13  ;;  %v7084_v21 = vld [vmem:[#allocation198_spill] sm:$0xff]  ;;  %v7085_v43 = vld [vmem:[#allocation100_spill] sm:$0xff]  ;;  %v7087_v13 = vld [vmem:[#allocation37_spill] sm:$0xff] }
 0x38e   :  { %4001 = vrot.lane.b32.xlu1 %v2997_v50, %s4611_s17  ;;  %v4231_v41 = vsel %vm6707_vm14, %v4229_v3, %v3770_v26  ;;  %vm6710_vm14 = vcmask 408576   ;;  %v3000_v26 = vcombine.low %v2956_v29, %v2988_v14  ;;  %v3108_v50 = vrot.slane %v3100_v47, %v5339_v17  ;;  %v7086_v42 = vld [vmem:[#allocation138_spill] sm:$0xff]  ;;  %v7089_v47 = vld [vmem:[#allocation75_spill] sm:$0xff]  ;;  %s7139_s17 = smov 90  }
 0x38f   :  { %3997 = vrot.lane.b32.xlu0 %v2996_v38, %s4608_s15  ;;  %v3003_v57 = vcombine.high %v2963_v4, %v2995_v6  ;;  %v3076_v11 = vrot.slane %v3068_v23, %v5339_v17  ;;  %v6213_v38 = vsel %vm1379_vm0, %v7085_v43, %v7084_v21  ;;  %v3115_v40 = vrot.slane %v3101_v10, %v5339_v17  ;;  %v7091_v10 = vld [vmem:[#allocation49_spill] sm:$0xff]  ;;  %s7133_s15 = smov 80  }
 0x390   :  { %v3778_v44 = vpop.permute.xlu1 %3777  ;;  %v3774_v0 = vpop.permute.xlu0 %3773  ;;  %v3116_v14 = vcombine.low %v3051_v51, %v3067_v22  ;;  %v3188_v1 = vcombine.low %v6208_v59, %v6201_v62  ;;  %v1408_v9 = vsel %vm1379_vm0, %v7087_v13, %v7086_v42  ;;  %v3140_v29 = vcombine.low %v6154_v20, %v6181_v7  ;;  %v7093_v43 = vld [vmem:[#allocation61_spill] sm:$0xff] }
 0x391   :  { %v4233_v5 = vsel %vm6708_vm12, %v4231_v41, %v3774_v0  ;;  %vm6711_vm12 = vcmask 424960   ;;  %v3133_v53 = vcombine.high %v3076_v11, %v3108_v50  ;;  %v1456_v41 = vsel %vm1379_vm0, %v7089_v47, %v7088_v36  ;;  %v7097_v47 = vld [vmem:[#allocation175_spill] sm:$0xff] }
 0x392   :  { %4009 = vrot.lane.b32.xlu1 %v2999_v48, %s4613_s19  ;;  %v4235_v18 = vsel %vm6709_vm15, %v4233_v5, %v3778_v44  ;;  %vm6712_vm15 = vcmask 441344   ;;  %v3002_v48 = vcombine.low %v2963_v4, %v2995_v6  ;;  %v3083_v0 = vrot.slane %v3069_v30, %v5339_v17  ;;  %s7147_s19 = smov 94  }
 0x393   :  { %4005 = vrot.lane.b32.xlu0 %v2998_v39, %s4610_s16  ;;  %v3084_v39 = vcombine.low %v6172_v32, %v6195_v16  ;;  %v3156_v6 = vcombine.low %v1408_v9, %v6187_v12  ;;  %v3172_v5 = vcombine.low %v1456_v41, %v6213_v38  ;;  %v3132_v34 = vcombine.low %v3076_v11, %v3108_v50  ;;  %s7135_s16 = smov 84  }
 0x394   :  { %v3786_v63 = vpop.permute.xlu1 %3785  ;;  %v3782_v37 = vpop.permute.xlu0 %3781  ;;  %v3196_v58 = vrot.slane %v3188_v1, %v5325_v28  ;;  %v3135_v24 = vcombine.high %v3083_v0, %v3115_v40  ;;  %v3134_v35 = vcombine.low %v3083_v0, %v3115_v40  ;;  %v3157_v25 = vcombine.high %v1408_v9, %v6187_v12 }
 0x395   :  { %v4237_v60 = vsel %vm6710_vm14, %v4235_v18, %v3782_v37  ;;  %vm6713_vm14 = vcmask 457728   ;;  %v6243_v18 = vsel %vm1379_vm0, %v7091_v10, %v7090_v15  ;;  %v6248_v37 = vrot.slane %v3140_v29, %v5325_v28 }
 0x396   :  { %4017 = vrot.lane.b32.xlu1 %v3001_v45, %s4615_s20  ;;  %v4239_v3 = vsel %vm6711_vm12, %v4237_v60, %v3786_v63  ;;  %vm6714_vm12 = vcmask 474112   ;;  %v3117_v63 = vcombine.high %v3051_v51, %v3067_v22  ;;  %v3124_v45 = vrot.slane %v3116_v14, %v5339_v17  ;;  %s7153_s20 = smov 98  }
 0x397   :  { %4013 = vrot.lane.b32.xlu0 %v3000_v26, %s4612_s18  ;;  %v3141_v22 = vcombine.high %v6154_v20, %v6181_v7  ;;  %v3085_v26 = vcombine.high %v6172_v32, %v6195_v16  ;;  %v3092_v50 = vrot.slane %v3084_v39, %v5339_v17  ;;  %v3164_v60 = vrot.slane %v3156_v6, %v5325_v28  ;;  %v7099_v39 = vld [vmem:[#allocation187_spill] sm:$0xff]  ;;  %v7100_v6 = vld [vmem:[#allocation86_spill] sm:$0xff]  ;;  %s7140_s18 = smov 88  }
 0x398   :  { %v3794_v19 = vpop.permute.xlu1 %3793  ;;  %v3790_v44 = vpop.permute.xlu0 %3789  ;;  %v3189_v20 = vcombine.high %v6208_v59, %v6201_v62  ;;  %v3173_v21 = vcombine.high %v1456_v41, %v6213_v38  ;;  %v7092_v59 = vld [vmem:[#allocation162_spill] sm:$0xff] }
 0x399   :  { %v4241_v46 = vsel %vm6712_vm15, %v4239_v3, %v3790_v44  ;;  %vm6717_vm15 = vcmask 490496   ;;  %v3137_v11 = vcombine.high %v3092_v50, %v3124_v45  ;;  %v6263_v55 = vrot.slane %v3141_v22, %v5325_v28  ;;  %v7094_v3 = vld [vmem:[#allocation111_spill] sm:$0xff]  ;;  %v7098_v41 = vld [vmem:[#allocation74_spill] sm:$0xff] }
 0x39a   :  { %4025 = vrot.lane.b32.xlu1 %v3003_v57, %s4617_s22  ;;  %v4243_v52 = vsel %vm6713_vm14, %v4241_v46, %v3794_v19  ;;  %vm6716_vm14 = vcmask 506880   ;;  %v3180_v19 = vrot.slane %v3172_v5, %v5325_v28  ;;  %v3131_v57 = vrot.slane %v3117_v63, %v5339_v17  ;;  %v7101_v63 = vld [vmem:[#allocation201_spill] sm:$0xff]  ;;  %s7155_s22 = smov 102  }
 0x39b   :  { %4021 = vrot.lane.b32.xlu0 %v3002_v48, %s4614_s2  ;;  %v3099_v62 = vrot.slane %v3085_v26, %v5339_v17  ;;  %v6272_v40 = vsel %vm1379_vm0, %v7093_v43, %v7092_v59  ;;  %v3204_v14 = vcombine.low %v6248_v37, %v3164_v60  ;;  %v6278_v44 = vsel %vm1379_vm0, %v7094_v3, %v5815_v33  ;;  %v7105_v26 = vld [vmem:[#allocation36_spill] sm:$0xff]  ;;  %s7152_s2 = smov 92  }
 0x39c   :  { %v3802_v2 = vpop.permute.xlu1 %3801  ;;  %v3798_v61 = vpop.permute.xlu0 %3797  ;;  %v3236_v30 = vcombine.low %v3180_v19, %v3196_v58  ;;  %v6282_v12 = vrot.slane %v3189_v20, %v5325_v28  ;;  %v3237_v38 = vcombine.high %v3180_v19, %v3196_v58  ;;  %v3136_v46 = vcombine.low %v3092_v50, %v3124_v45  ;;  %v7102_v45 = vld [vmem:[#allocation99_spill] sm:$0xff] }
 0x39d   :  { %v4245_v23 = vsel %vm6714_vm12, %v4243_v52, %v3798_v61  ;;  %vm6731_vm12 = vcmask 523264   ;;  %v3139_v13 = vcombine.high %v3099_v62, %v3131_v57  ;;  %v6288_v33 = vrot.slane %v3157_v25, %v5325_v28 }
 0x39e   :  { %4033 = vrot.lane.b32.xlu1 %v3133_v53, %s4619_s24  ;;  %v4247_v7 = vsel %vm6717_vm15, %v4245_v23, %v3802_v2  ;;  %v3244_v2 = vrot.slane %v3236_v30, %v5339_v17  ;;  %v3205_v9 = vcombine.high %v6248_v37, %v3164_v60  ;;  %v3187_v29 = vrot.slane %v3173_v21, %v5325_v28  ;;  %v7104_v37 = vld [vmem:[#allocation137_spill] sm:$0xff]  ;;  %s7157_s24 = smov 106  }
 0x39f   :  { %4029 = vrot.lane.b32.xlu0 %v3132_v34, %s4616_s21  ;;  %vm6720_vm15 = vcmask 572416   ;;  %v3212_v36 = vrot.slane %v3204_v14, %v5339_v17  ;;  %v6297_v0 = vsel %vm1379_vm0, %v7098_v41, %v7097_v47  ;;  %v6302_v5 = vsel %vm1379_vm0, %v7100_v6, %v7099_v39  ;;  %v7114_v47 = vld [vmem:[#allocation52_spill] sm:$0xff]  ;;  %s7154_s21 = smov 96  }
 0x3a0   :  { %v3810_v4 = vpop.permute.xlu1 %3809  ;;  %v3806_v51 = vpop.permute.xlu0 %3805  ;;  %v6307_v52 = vsel %vm1379_vm0, %v7102_v45, %v7101_v63  ;;  %v3324_v61 = vcombine.low %v6302_v5, %v6278_v44  ;;  %v3252_v34 = vcombine.low %v3187_v29, %v6282_v12  ;;  %v1409_v50 = vsel %vm1379_vm0, %v7105_v26, %v7104_v37  ;;  %v7118_v26 = vld [vmem:[#allocation165_spill] sm:$0xff] }
 0x3a1   :  { %v4249_v32 = vsel %vm6716_vm14, %v4247_v7, %v3806_v51  ;;  %vm6719_vm14 = vcmask 556032   ;;  %v3269_v22 = vcombine.high %v3212_v36, %v3244_v2  ;;  %v3276_v60 = vcombine.low %v6131_v49, %v6243_v18 }
 0x3a2   :  { %4041 = vrot.lane.b32.xlu1 %v3135_v24, %s4621_s26  ;;  %v4251_v48 = vsel %vm6731_vm12, %v4249_v32, %v3810_v4  ;;  %v3138_v4 = vcombine.low %v3099_v62, %v3131_v57  ;;  %v3251_v24 = vrot.slane %v3237_v38, %v5339_v17  ;;  %v3308_v19 = vcombine.low %v6297_v0, %v6307_v52  ;;  %s7158_s26 = smov 104  }
 0x3a3   :  { %4037 = vrot.lane.b32.xlu0 %v3134_v35, %s4618_s23  ;;  %v3292_v57 = vcombine.low %v1409_v50, %v6272_v40  ;;  %v3219_v20 = vrot.slane %v3205_v9, %v5339_v17  ;;  %v3220_v7 = vcombine.low %v6263_v55, %v6288_v33  ;;  %v3332_v51 = vrot.slane %v3324_v61, %v5325_v28  ;;  %s7156_s23 = smov 100  }
 0x3a4   :  { %v3818_v16 = vpop.permute.xlu1 %3817  ;;  %v3814_v1 = vpop.permute.xlu0 %3813  ;;  %v3253_v35 = vcombine.high %v3187_v29, %v6282_v12  ;;  %v3277_v59 = vcombine.high %v6131_v49, %v6243_v18  ;;  %v6337_v43 = vrot.slane %v3276_v60, %v5325_v28  ;;  %v3316_v14 = vrot.slane %v3308_v19, %v5325_v28  ;;  %v7120_v19 = vld [vmem:[#allocation190_spill] sm:$0xff] }
 0x3a5   :  { %v4253_v53 = vsel %vm6718_vm13, %v4251_v48, %v3814_v1  ;;  %vm6721_vm13 = vcmask 588800   ;;  %v3271_v62 = vcombine.high %v3219_v20, %v3251_v24  ;;  %v3293_v3 = vcombine.high %v1409_v50, %v6272_v40  ;;  %v7119_v50 = vld [vmem:[#allocation64_spill] sm:$0xff] }
 0x3a6   :  { %4049 = vrot.lane.b32.xlu1 %v3137_v11, %s7095_s29  ;;  %v4255_v58 = vsel %vm6719_vm14, %v4253_v53, %v3818_v16  ;;  %vm6722_vm14 = vcmask 605184   ;;  %v3268_v16 = vcombine.low %v3212_v36, %v3244_v2  ;;  %v3260_v11 = vrot.slane %v3252_v34, %v5339_v17  ;;  %v7113_v36 = vld [vmem:[#allocation153_spill] sm:$0xff]  ;;  %s7159_s29 = smov 108  }
 0x3a7   :  { %4045 = vrot.lane.b32.xlu0 %v3136_v46, %s7096_s4  ;;  %v3300_v12 = vrot.slane %v3292_v57, %v5325_v28  ;;  %v3221_v38 = vcombine.high %v6263_v55, %v6288_v33  ;;  %v3228_v48 = vrot.slane %v3220_v7, %v5339_v17  ;;  %v3325_v49 = vcombine.high %v6302_v5, %v6278_v44  ;;  %v7110_v55 = vld [vmem:[#allocation127_spill] sm:$0xff]  ;;  %v7111_v33 = vld [vmem:[#allocation26_spill] sm:$0xff]  ;;  %v7121_v57 = vld [vmem:[#allocation89_spill] sm:$0xff]  ;;  %s7161_s4 = smov 118  }
 0x3a8   :  { %v3826_v42 = vpop.permute.xlu1 %3825  ;;  %v3822_v23 = vpop.permute.xlu0 %3821  ;;  %v3372_v18 = vcombine.low %v3316_v14, %v3332_v51  ;;  %v3270_v2 = vcombine.low %v3219_v20, %v3251_v24  ;;  %v3267_v53 = vrot.slane %v3253_v35, %v5339_v17  ;;  %v6355_v9 = vsel %vm1379_vm0, %v7111_v33, %v7110_v55  ;;  %v7122_v7 = vld [vmem:[#allocation200_spill] sm:$0xff] }
 0x3a9   :  { %v4257_v15 = vsel %vm6720_vm15, %v4255_v58, %v3822_v23  ;;  %vm6723_vm15 = vcmask 621568   ;;  %v6358_v29 = vrot.slane %v3277_v59, %v5325_v28  ;;  %v3309_v44 = vcombine.high %v6297_v0, %v6307_v52 }
 0x3aa   :  { %4057 = vrot.lane.b32.xlu1 %v3139_v13, %s7103_s5  ;;  %v4259_v30 = vsel %vm6721_vm13, %v4257_v15, %v3826_v42  ;;  %vm6724_vm13 = vcmask 637952   ;;  %v3273_v13 = vcombine.high %v3228_v48, %v3260_v11  ;;  %v6366_v41 = vsel %vm1379_vm0, %v7114_v47, %v7113_v36  ;;  %s7163_s5 = smov 120  }
 0x3ab   :  { %4053 = vrot.lane.b32.xlu0 %v3138_v4, %s7106_s0  ;;  %v6369_v39 = vrot.slane %v3293_v3, %v5325_v28  ;;  %v3340_v6 = vcombine.low %v6337_v43, %v3300_v12  ;;  %v3235_v5 = vrot.slane %v3221_v38, %v5339_v17  ;;  %v3339_v63 = vrot.slane %v3325_v49, %v5325_v28  ;;  %v7127_v38 = vld [vmem:[#allocation178_spill] sm:$0xff] }
 0x3ac   :  { %v3834_v10 = vpop.permute.xlu1 %3833  ;;  %v3373_v0 = vcombine.high %v3316_v14, %v3332_v51  ;;  %v3272_v61 = vcombine.low %v3228_v48, %v3260_v11  ;;  %v3380_v34 = vrot.slane %v3372_v18, %v5339_v17  ;;  %v3341_v24 = vcombine.high %v6337_v43, %v3300_v12  ;;  %v7123_v51 = vld [vmem:[#allocation102_spill] sm:$0xff]  ;;  %v7125_v43 = vld [vmem:[#allocation140_spill] sm:$0xff]  ;;  %v7126_v14 = vld [vmem:[#allocation39_spill] sm:$0xff] }
 0x3ad   :  { %v3830_v32 = vpop.permute.xlu0 %3829  ;;  %v3275_v4 = vcombine.high %v3235_v5, %v3267_v53  ;;  %v3323_v15 = vrot.slane %v3309_v44, %v5325_v28  ;;  %v3348_v37 = vrot.slane %v3340_v6, %v5339_v17  ;;  %v6390_v60 = vsel %vm1379_vm0, %v7119_v50, %v7118_v26  ;;  %v7128_v48 = vld [vmem:[#allocation77_spill] sm:$0xff]  ;;  %v7131_v6 = vld [vmem:[#allocation152_spill] sm:$0xff] }
 0x3ae   :  { %4065 = vrot.lane.b32.xlu1 %v3269_v22, %s7107_s6  ;;  %v4261_v25 = vsel %vm6722_vm14, %v4259_v30, %v3830_v32  ;;  %vm6725_vm14 = vcmask 654336   ;;  %v6395_v20 = vsel %vm1379_vm0, %v7121_v57, %v7120_v19  ;;  %v3387_v35 = vrot.slane %v3373_v0, %v5339_v17  ;;  %v7136_v19 = vld [vmem:[#allocation164_spill] sm:$0xff]  ;;  %v7137_v57 = vld [vmem:[#allocation63_spill] sm:$0xff] }
 0x3af   :  { %4061 = vrot.lane.b32.xlu0 %v3268_v16, %s7108_s7  ;;  %v4263_v1 = vsel %vm6723_vm15, %v4261_v25, %v3834_v10  ;;  %vm6726_vm15 = vcmask 670720   ;;  %v7116_v10 = vld [vmem:[#allocation114_spill] sm:$0xff]  ;;  %v3388_v30 = vcombine.low %v3323_v15, %v3339_v63  ;;  %v3274_v11 = vcombine.low %v3235_v5, %v3267_v53  ;;  %v7132_v5 = vld [vmem:[#allocation51_spill] sm:$0xff] }
 0x3b0   :  { %v3842_v21 = vpop.permute.xlu1 %3841  ;;  %v6383_v22 = vsel %vm1379_vm0, %v7116_v10, %v5839_v56  ;;  %v6400_v56 = vsel %vm1379_vm0, %v7123_v51, %v7122_v7  ;;  %v3405_v59 = vcombine.high %v3348_v37, %v3380_v34  ;;  %v1410_v3 = vsel %vm1379_vm0, %v7126_v14, %v7125_v43  ;;  %v7138_v51 = vld [vmem:[#allocation113_spill] sm:$0xff] }
 0x3b1   :  { %v3838_v46 = vpop.permute.xlu0 %3837  ;;  %v3460_v25 = vcombine.low %v6395_v20, %v6383_v22  ;;  %v3412_v12 = vcombine.low %v6355_v9, %v6366_v41  ;;  %v1458_v49 = vsel %vm1379_vm0, %v7128_v48, %v7127_v38  ;;  %v3355_v18 = vrot.slane %v3341_v24, %v5339_v17  ;;  %v7143_v48 = vld [vmem:[#allocation189_spill] sm:$0xff] }
 0x3b2   :  { %4073 = vrot.lane.b32.xlu1 %v3271_v62, %s7109_s8  ;;  %v4265_v40 = vsel %vm6724_vm13, %v4263_v1, %v3838_v46  ;;  %vm6727_vm13 = vcmask 687104   ;;  %v3356_v1 = vcombine.low %v6358_v29, %v6369_v39  ;;  %v3428_v46 = vcombine.low %v1410_v3, %v6390_v60 }
 0x3b3   :  { %4069 = vrot.lane.b32.xlu0 %v3270_v2, %s7112_s9  ;;  %v4267_v45 = vsel %vm6725_vm14, %v4265_v40, %v3842_v21  ;;  %vm6728_vm14 = vcmask 703488   ;;  %v3444_v2 = vcombine.low %v1458_v49, %v6400_v56  ;;  %v3389_v53 = vcombine.high %v3323_v15, %v3339_v63 }
 0x3b4   :  { %v3850_v42 = vpop.permute.xlu1 %3849  ;;  %v3396_v40 = vrot.slane %v3388_v30, %v5339_v17  ;;  %v3404_v55 = vcombine.low %v3348_v37, %v3380_v34  ;;  %v3468_v33 = vrot.slane %v3460_v25, %v5325_v28  ;;  %v3407_v47 = vcombine.high %v3355_v18, %v3387_v35 }
 0x3b5   :  { %v3846_v52 = vpop.permute.xlu0 %3845  ;;  %v6430_v0 = vsel %vm1379_vm0, %v7132_v5, %v7131_v6  ;;  %v3413_v63 = vcombine.high %v6355_v9, %v6366_v41  ;;  %v3436_v34 = vrot.slane %v3428_v46, %v5325_v28  ;;  %v3461_v9 = vcombine.high %v6395_v20, %v6383_v22  ;;  %v7146_v46 = vld [vmem:[#allocation101_spill] sm:$0xff]  ;;  %v7148_v6 = vld [vmem:[#allocation126_spill] sm:$0xff] }
 0x3b6   :  { %4081 = vrot.lane.b32.xlu1 %v3273_v13, %s7115_s10  ;;  %v4269_v58 = vsel %vm6726_vm15, %v4267_v45, %v3846_v52  ;;  %vm6729_vm15 = vcmask 719872   ;;  %v6435_v45 = vrot.slane %v3412_v12, %v5325_v28  ;;  %v3357_v52 = vcombine.high %v6358_v29, %v6369_v39  ;;  %v7142_v12 = vld [vmem:[#allocation76_spill] sm:$0xff]  ;;  %v7149_v5 = vld [vmem:[#allocation25_spill] sm:$0xff] }
 0x3b7   :  { %4077 = vrot.lane.b32.xlu0 %v3272_v61, %s7117_s11  ;;  %v4271_v32 = vsel %vm6727_vm13, %v4269_v58, %v3850_v42  ;;  %vm6730_vm13 = vcmask 736256   ;;  %v3364_v61 = vrot.slane %v3356_v1, %v5339_v17  ;;  %v3452_v58 = vrot.slane %v3444_v2, %v5325_v28  ;;  %v7145_v1 = vld [vmem:[#allocation202_spill] sm:$0xff] }
 0x3b8   :  { %v3858_v23 = vpop.permute.xlu1 %3857  ;;  %v3406_v24 = vcombine.low %v3355_v18, %v3387_v35  ;;  %v6450_v37 = vrot.slane %v3413_v63, %v5325_v28  ;;  %v3429_v26 = vcombine.high %v1410_v3, %v6390_v60  ;;  %v3445_v50 = vcombine.high %v1458_v49, %v6400_v56  ;;  %v7141_v3 = vld [vmem:[#allocation177_spill] sm:$0xff]  ;;  %v7144_v49 = vld [vmem:[#allocation88_spill] sm:$0xff] }
 0x3b9   :  { %v3854_v16 = vpop.permute.xlu0 %3853  ;;  %v3508_v15 = vcombine.low %v3452_v58, %v3468_v33  ;;  %v3409_v10 = vcombine.high %v3364_v61, %v3396_v40  ;;  %vm6734_vm12 = vcmask 801792   ;;  %v3371_v22 = vrot.slane %v3357_v52, %v5339_v17  ;;  %v7151_v52 = vld [vmem:[#allocation38_spill] sm:$0xff] }
 0x3ba   :  { %4089 = vrot.lane.b32.xlu1 %v3275_v4, %s7124_s12  ;;  %v4273_v21 = vsel %vm6728_vm14, %v4271_v32, %v3854_v16  ;;  %vm6733_vm14 = vcmask 752640   ;;  %v6459_v20 = vsel %vm1379_vm0, %v7137_v57, %v7136_v19  ;;  %v3476_v7 = vcombine.low %v6435_v45, %v3436_v34 }
 0x3bb   :  { %4085 = vrot.lane.b32.xlu0 %v3274_v11, %s7129_s13  ;;  %v4275_v42 = vsel %vm6729_vm15, %v4273_v21, %v3858_v23  ;;  %vm6732_vm15 = vcmask 769024   ;;  %v3403_v23 = vrot.slane %v3389_v53, %v5339_v17  ;;  %v6465_v35 = vsel %vm1379_vm0, %v7138_v51, %v5831_v8 }
 0x3bc   :  { %v3866_v62 = vpop.permute.xlu1 %3865  ;;  %v6469_v60 = vrot.slane %v3461_v9, %v5325_v28  ;;  %v3509_v56 = vcombine.high %v3452_v58, %v3468_v33  ;;  %v3408_v16 = vcombine.low %v3364_v61, %v3396_v40  ;;  %v3516_v11 = vrot.slane %v3508_v15, %v5339_v17 }
 0x3bd   :  { %v3862_v13 = vpop.permute.xlu0 %3861  ;;  %v6475_v8 = vrot.slane %v3429_v26, %v5325_v28  ;;  %v3459_v43 = vrot.slane %v3445_v50, %v5325_v28  ;;  %v3484_v14 = vrot.slane %v3476_v7, %v5339_v17  ;;  %v6484_v38 = vsel %vm1379_vm0, %v7142_v12, %v7141_v3 }
 0x3be   :  { %4097 = vrot.lane.b32.xlu1 %v3405_v59, %s7130_s14  ;;  %v4277_v44 = vsel %vm6730_vm13, %v4275_v42, %v3862_v13  ;;  %vm4282_vm13 = vcmask 785408   ;;  %v3477_v59 = vcombine.high %v6435_v45, %v3436_v34  ;;  %v1475_v18 = vsel %vm1379_vm0, %v7144_v49, %v7143_v48  ;;  %v7150_v45 = vld [vmem:[#allocation139_spill] sm:$0xff] }
 0x3bf   :  { %4093 = vrot.lane.b32.xlu0 %v3404_v55, %s7133_s15  ;;  %v4279_v41 = vsel %vm6733_vm14, %v4277_v44, %v3866_v62  ;;  %v3411_v62 = vcombine.high %v3371_v22, %v3403_v23  ;;  %vm6736_vm14 = vcmask 834560   ;;  %v6492_v2 = vsel %vm1379_vm0, %v7146_v46, %v7145_v1 }
 0x3c0   :  { %v3874_v36 = vpop.permute.xlu1 %3873  ;;  %v3596_v53 = vcombine.low %v1475_v18, %v6465_v35  ;;  %v3524_v40 = vcombine.low %v3459_v43, %v6469_v60  ;;  %v3410_v55 = vcombine.low %v3371_v22, %v3403_v23  ;;  %v3523_v33 = vrot.slane %v3509_v56, %v5339_v17 }
 0x3c1   :  { %v3870_v4 = vpop.permute.xlu0 %3869  ;;  %v6503_v63 = vsel %vm1379_vm0, %v7149_v5, %v7148_v6  ;;  %v1411_v61 = vsel %vm1379_vm0, %v7151_v52, %v7150_v45  ;;  %v3580_v34 = vcombine.low %v6484_v38, %v6492_v2  ;;  %v3491_v9 = vrot.slane %v3477_v59, %v5339_v17 }
 0x3c2   :  { %4105 = vrot.lane.b32.xlu1 %v3407_v47, %s7134_s1  ;;  %v4281_v29 = vsel %vm6732_vm15, %v4279_v41, %v3870_v4  ;;  %vm6735_vm15 = vcmask 818176   ;;  %v3541_v47 = vcombine.high %v3484_v14, %v3516_v11  ;;  %v3548_v58 = vcombine.low %v6503_v63, %v6430_v0 }
 0x3c3   :  { %4101 = vrot.lane.b32.xlu0 %v3406_v24, %s7135_s16  ;;  %v4283_v30 = vsel %vm4282_vm13, %v4281_v29, %v3874_v36  ;;  %v3564_v23 = vcombine.low %v1411_v61, %v6459_v20  ;;  %v3492_v41 = vcombine.low %v6450_v37, %v6475_v8  ;;  %v3604_v4 = vrot.slane %v3596_v53, %v5325_v28 }
 0x3c4   :  { %v3882_v39 = vpop.permute.xlu1 %3881  ;;  %v3525_v24 = vcombine.high %v3459_v43, %v6469_v60  ;;  %vm6740_vm0 = vcmask 883712   ;;  %v3543_v22 = vcombine.high %v3491_v9, %v3523_v33  ;;  %v3588_v19 = vrot.slane %v3580_v34, %v5325_v28 }
 0x3c5   :  { %v3878_v32 = vpop.permute.xlu0 %3877  ;;  %v3556_v57 = vrot.slane %v3548_v58, %v5325_v28  ;;  %v3572_v7 = vrot.slane %v3564_v23, %v5325_v28  ;;  %v3493_v51 = vcombine.high %v6450_v37, %v6475_v8  ;;  %v3500_v60 = vrot.slane %v3492_v41, %v5339_v17 }
 0x3c6   :  { %4113 = vrot.lane.b32.xlu1 %v3409_v10, %s7139_s17  ;;  %v4285_v25 = vsel %vm6734_vm12, %v4283_v30, %v3878_v32  ;;  %vm6738_vm12 = vcmask 850944   ;;  %v3532_v10 = vrot.slane %v3524_v40, %v5339_v17  ;;  %v3597_v56 = vcombine.high %v1475_v18, %v6465_v35 }
 0x3c7   :  { %4109 = vrot.lane.b32.xlu0 %v3408_v16, %s7140_s18  ;;  %v4287_v42 = vsel %vm6735_vm15, %v4285_v25, %v3882_v39  ;;  %vm6737_vm15 = vcmask 867328   ;;  %v3540_v39 = vcombine.low %v3484_v14, %v3516_v11  ;;  %v3644_v30 = vcombine.low %v3588_v19, %v3604_v4 }
 0x3c8   :  { %v3890_v21 = vpop.permute.xlu1 %3889  ;;  %v3542_v11 = vcombine.low %v3491_v9, %v3523_v33  ;;  %v3539_v25 = vrot.slane %v3525_v24, %v5339_v17  ;;  %v3545_v59 = vcombine.high %v3500_v60, %v3532_v10  ;;  %v3581_v37 = vcombine.high %v6484_v38, %v6492_v2 }
 0x3c9   :  { %v3886_v13 = vpop.permute.xlu0 %3885  ;;  %v3549_v35 = vcombine.high %v6503_v63, %v6430_v0  ;;  %v3565_v8 = vcombine.high %v1411_v61, %v6459_v20  ;;  %v3612_v43 = vcombine.low %v3556_v57, %v3572_v7  ;;  %v3507_v14 = vrot.slane %v3493_v51, %v5339_v17 }
 0x3ca   :  { %4121 = vrot.lane.b32.xlu1 %v3411_v62, %s7147_s19  ;;  %v4289_v44 = vsel %vm6736_vm14, %v4287_v42, %v3886_v13  ;;  %vm6739_vm14 = vcmask 900096   ;;  %v3611_v3 = vrot.slane %v3597_v56, %v5325_v28  ;;  %v3645_v12 = vcombine.high %v3588_v19, %v3604_v4 }
 0x3cb   :  { %4117 = vrot.lane.b32.xlu0 %v3410_v55, %s7152_s2  ;;  %v4291_v15 = vsel %vm6738_vm12, %v4289_v44, %v3890_v21  ;;  %vm6741_vm12 = vcmask 932864   ;;  %v3544_v38 = vcombine.low %v3500_v60, %v3532_v10  ;;  %v3652_v18 = vrot.slane %v3644_v30, %v5339_v17 }
 0x3cc   :  { %v3898_v36 = vpop.permute.xlu1 %3897  ;;  %v3547_v0 = vcombine.high %v3507_v14, %v3539_v25  ;;  %v3595_v20 = vrot.slane %v3581_v37, %v5325_v28  ;;  %v3579_v2 = vrot.slane %v3565_v8, %v5325_v28  ;;  %v3613_v53 = vcombine.high %v3556_v57, %v3572_v7 }
 0x3cd   :  { %v3894_v29 = vpop.permute.xlu0 %3893  ;;  %v3620_v40 = vrot.slane %v3612_v43, %v5339_v17  ;;  %v3563_v42 = vrot.slane %v3549_v35, %v5325_v28  ;;  %v3546_v44 = vcombine.low %v3507_v14, %v3539_v25 }
 0x3ce   :  { %4129 = vrot.lane.b32.xlu1 %v3541_v47, %s7153_s20  ;;  %v4293_v26 = vsel %vm6737_vm15, %v4291_v15, %v3894_v29  ;;  %vm6742_vm15 = vcmask 916480   ;;  %v3660_v13 = vcombine.low %v3595_v20, %v3611_v3  ;;  %v3627_v63 = vrot.slane %v3613_v53, %v5339_v17 }
 0x3cf   :  { %4125 = vrot.lane.b32.xlu0 %v3540_v39, %s7154_s21  ;;  %v4295_v32 = vsel %vm6740_vm0, %v4293_v26, %v3898_v36  ;;  %vm6743_vm0 = vcmask 965632   ;;  %v3659_v36 = vrot.slane %v3645_v12, %v5339_v17  ;;  %v3677_v5 = vcombine.high %v3620_v40, %v3652_v18 }
 0x3d0   :  { %v3906_v50 = vpop.permute.xlu1 %3905  ;;  %v3628_v45 = vcombine.low %v3563_v42, %v3579_v2  ;;  %v3661_v28 = vcombine.high %v3595_v20, %v3611_v3  ;;  %v3676_v34 = vcombine.low %v3620_v40, %v3652_v18  ;;  %v3668_v58 = vrot.slane %v3660_v13, %v5339_v17 }
 0x3d1   :  { %v3902_v16 = vpop.permute.xlu0 %3901  ;;  %v3679_v41 = vcombine.high %v3627_v63, %v3659_v36  ;;  %v3629_v4 = vcombine.high %v3563_v42, %v3579_v2  ;;  %v3678_v39 = vcombine.low %v3627_v63, %v3659_v36 }
 0x3d2   :  { %4137 = vrot.lane.b32.xlu1 %v3543_v22, %s7155_s22  ;;  %v4297_v21 = vsel %vm6739_vm14, %v4295_v32, %v3902_v16  ;;  %vm6744_vm14 = vcmask 949248   ;;  %v3636_v24 = vrot.slane %v3628_v45, %v5339_v17  ;;  %v3675_v10 = vrot.slane %v3661_v28, %v5339_v17 }
 0x3d3   :  { %4133 = vrot.lane.b32.xlu0 %v3542_v11, %s7156_s23  ;;  %v4299_v48 = vsel %vm6742_vm15, %v4297_v21, %v3906_v50  ;;  %vm4308_vm15 = vcmask 998400   ;;  %v3643_v19 = vrot.slane %v3629_v4, %v5339_v17 }
 0x3d4   :  { %v3914_v62 = vpop.permute.xlu1 %3913  ;;  %v3681_v22 = vcombine.high %v3636_v24, %v3668_v58  ;;  %v3680_v51 = vcombine.low %v3636_v24, %v3668_v58 }
 0x3d5   :  { %v3910_v49 = vpop.permute.xlu0 %3909  ;;  %v3683_v30 = vcombine.high %v3643_v19, %v3675_v10  ;;  %v3682_v16 = vcombine.low %v3643_v19, %v3675_v10 }
 0x3d6   :  { %4145 = vrot.lane.b32.xlu1 %v3545_v59, %s7157_s24  ;;  %v4301_v1 = vsel %vm6741_vm12, %v4299_v48, %v3910_v49  ;;  %vm4306_vm12 = vcmask 982016  }
 0x3d7   :  { %4141 = vrot.lane.b32.xlu0 %v3544_v38, %s7158_s26  ;;  %v4303_v55 = vsel %vm6744_vm14, %v4301_v1, %v3914_v62  ;;  %vm4312_vm14 = vcmask 1031168  }
 0x3d8   :  { %v3922_v46 = vpop.permute.xlu1 %3921 }
 0x3d9   :  { %v3918_v33 = vpop.permute.xlu0 %3917 }
 0x3da   :  { %4153 = vrot.lane.b32.xlu1 %v3547_v0, %s4649_s25  ;;  %v4305_v47 = vsel %vm6743_vm0, %v4303_v55, %v3918_v33  ;;  %vm4310_vm0 = vcmask 1014784   ;;  %s7160_s25 = smov 112  }
 0x3db   :  { %4149 = vrot.lane.b32.xlu0 %v3546_v44, %s7159_s29  ;;  %v4307_v52 = vsel %vm4306_vm12, %v4305_v47, %v3922_v46 }
 0x3dc   :  { %v3930_v6 = vpop.permute.xlu1 %3929 }
 0x3dd   :  { %v3926_v61 = vpop.permute.xlu0 %3925 }
 0x3de   :  { %4161 = vrot.lane.b32.xlu1 %v3677_v5, %s4651_s28  ;;  %v4309_v23 = vsel %vm4308_vm15, %v4307_v52, %v3926_v61  ;;  %s7162_s28 = smov 116  }
 0x3df   :  { %4157 = vrot.lane.b32.xlu0 %v3676_v34, %s7160_s25  ;;  %v4311_v15 = vsel %vm4310_vm0, %v4309_v23, %v3930_v6 }
 0x3e0   :  { %v3938_v9 = vpop.permute.xlu1 %3937 }
 0x3e1   :  { %v3934_v29 = vpop.permute.xlu0 %3933  ;;  %v4314_v57 = vsel %vm4188_vm1, %v2724_v27, %v3938_v9  ;;  %vm7165_vm1 = vcmask 195584  }
 0x3e2   :  { %4169 = vrot.lane.b32.xlu1 %v3679_v41, %s7161_s4  ;;  %v4313_v26 = vsel %vm4312_vm14, %v4311_v15, %v3934_v29 }
 0x3e3   :  { %4377 = vst [vmem:[#allocation9] sm:$0xff] %v4313_v26  ;;  %4165 = vrot.lane.b32.xlu0 %v3678_v39, %s7162_s28 }
 0x3e4   :  { %v3946_v50 = vpop.permute.xlu1 %3945 }
 0x3e5   :  { %v3942_v7 = vpop.permute.xlu0 %3941 }
 0x3e6   :  { %4177 = vrot.lane.b32.xlu1 %v3681_v22, %s4655_s27  ;;  %v4315_v60 = vsel %vm4190_vm2, %v4314_v57, %v3942_v7  ;;  %s7164_s27 = smov 124   ;;  %vm7166_vm2 = vcmask 211968  }
 0x3e7   :  { %4173 = vrot.lane.b32.xlu0 %v3680_v51, %s7163_s5  ;;  %v4316_v32 = vsel %vm4192_vm3, %v4315_v60, %v3946_v50  ;;  %vm7167_vm3 = vcmask 228352  }
 0x3e8   :  { %v3954_v56 = vpop.permute.xlu1 %3953 }
 0x3e9   :  { %v3950_v17 = vpop.permute.xlu0 %3949 }
 0x3ea   :  { %4185 = vrot.lane.b32.xlu1 %v3683_v30, %s4656_s30  ;;  %v4317_v11 = vsel %vm4194_vm4, %v4316_v32, %v3950_v17  ;;  %vm7168_vm4 = vcmask 244736   ;;  %s4657_s30 = smov [#allocation9]  }
 0x3eb   :  { %4181 = vrot.lane.b32.xlu0 %v3682_v16, %s7164_s27  ;;  %v4318_v54 = vsel %vm4196_vm5, %v4317_v11, %v3954_v56  ;;  %vm7169_vm5 = vcmask 261120   ;;  %s4385_s0 = sshll.u32 %s4657_s30, 4  ;;  %s4386_s0 = int_to_ptr.vmem [resolvable:$true] %s4385_s0 }
 0x3ec   :  { %v3962_v25 = vpop.permute.xlu1 %3961  ;;  %s4553_s6 = scalar_lea.vmem %s4386_s0, 256  ;;  %p4558_p6 = scmp.lt.s32.totalorder %s4386_s0, %s4386_s0 }
 0x3ed   :  { %v3958_v31 = vpop.permute.xlu0 %3957  ;;  %p4554_p5 = scmp.ne.s32.totalorder %s4386_s0, %s4553_s6  ;;  %p4559_p7 = scmp.lt.s32.totalorder %s4553_s6, %s4553_s6 }
 0x3ee   :  { %v4319_v27 = vsel %vm4198_vm6, %v4318_v54, %v3958_v31  ;;  %vm7170_vm6 = vcmask 277504  }
 0x3ef   :  { %v4320_v62 = vsel %vm4200_vm7, %v4319_v27, %v3962_v25  ;;  %vm7171_vm7 = vcmask 293888   ;;  %p4560_p8 = por %p4559_p7, %p4558_p6 }
 0x3f0   :  { %v3970_v21 = vpop.permute.xlu1 %3969 }
 0x3f1   :  { %v3966_v59 = vpop.permute.xlu0 %3965  ;;  %p4561_p9 = pnand %p4560_p8, %p4554_p5 }
 0x3f2   :  { %v4321_v37 = vsel %vm4202_vm8, %v4320_v62, %v3966_v59  ;;  %vm7172_vm8 = vcmask 310272  }
 0x3f3   :  { %v4322_v8 = vsel %vm4204_vm9, %v4321_v37, %v3970_v21  ;;  %vm7173_vm9 = vcmask 326656  }
 0x3f4   :  { %v3978_v35 = vpop.permute.xlu1 %3977 }
 0x3f5   :  { %v3974_v43 = vpop.permute.xlu0 %3973 }
 0x3f6   :  { %v4323_v14 = vsel %vm4206_vm10, %v4322_v8, %v3974_v43  ;;  %vm7174_vm10 = vcmask 343040  }
 0x3f7   :  { %v4324_v12 = vsel %vm4208_vm11, %v4323_v14, %v3978_v35  ;;  %vm7175_vm11 = vcmask 359424  }
 0x3f8   :  { %v3986_v3 = vpop.permute.xlu1 %3985 }
 0x3f9   :  { %v3982_v48 = vpop.permute.xlu0 %3981 }
 0x3fa   :  { %v4325_v49 = vsel %vm7165_vm1, %v4324_v12, %v3982_v48  ;;  %vm7176_vm1 = vcmask 375808  }
 0x3fb   :  { %v4326_v18 = vsel %vm7166_vm2, %v4325_v49, %v3986_v3  ;;  %vm7177_vm2 = vcmask 392192  }
 0x3fc   :  { %v3994_v38 = vpop.permute.xlu1 %3993 }
 0x3fd   :  { %v3990_v1 = vpop.permute.xlu0 %3989 }
 0x3fe   :  { %v4327_v46 = vsel %vm7167_vm3, %v4326_v18, %v3990_v1  ;;  %vm7178_vm3 = vcmask 408576  }
 0x3ff   :  { %v4328_v20 = vsel %vm7168_vm4, %v4327_v46, %v3994_v38  ;;  %vm7179_vm4 = vcmask 424960  }
 0x400   :  { %v4002_v0 = vpop.permute.xlu1 %4001 }
 0x401   :  { %v3998_v2 = vpop.permute.xlu0 %3997 }
 0x402   :  { %v4329_v53 = vsel %vm7169_vm5, %v4328_v20, %v3998_v2  ;;  %vm7180_vm5 = vcmask 441344  }
 0x403   :  { %v4330_v42 = vsel %vm7170_vm6, %v4329_v53, %v4002_v0  ;;  %vm7181_vm6 = vcmask 457728  }
 0x404   :  { %v4010_v40 = vpop.permute.xlu1 %4009 }
 0x405   :  { %v4006_v13 = vpop.permute.xlu0 %4005 }
 0x406   :  { %v4331_v55 = vsel %vm7171_vm7, %v4330_v42, %v4006_v13  ;;  %vm7182_vm7 = vcmask 474112  }
 0x407   :  { %v4332_v44 = vsel %vm7172_vm8, %v4331_v55, %v4010_v40  ;;  %vm7183_vm8 = vcmask 490496  }
 0x408   :  { %v4018_v33 = vpop.permute.xlu1 %4017 }
 0x409   :  { %v4014_v36 = vpop.permute.xlu0 %4013 }
 0x40a   :  { %v4333_v47 = vsel %vm7173_vm9, %v4332_v44, %v4014_v36  ;;  %vm7184_vm9 = vcmask 506880  }
 0x40b   :  { %v4334_v5 = vsel %vm7174_vm10, %v4333_v47, %v4018_v33  ;;  %vm7185_vm10 = vcmask 523264  }
 0x40c   :  { %v4026_v6 = vpop.permute.xlu1 %4025 }
 0x40d   :  { %v4022_v63 = vpop.permute.xlu0 %4021 }
 0x40e   :  { %v4335_v45 = vsel %vm7175_vm11, %v4334_v5, %v4022_v63  ;;  %vm7186_vm11 = vcmask 539648  }
 0x40f   :  { %v4336_v52 = vsel %vm7176_vm1, %v4335_v45, %v4026_v6  ;;  %vm7187_vm1 = vcmask 556032  }
 0x410   :  { %v4034_v28 = vpop.permute.xlu1 %4033 }
 0x411   :  { %v4030_v61 = vpop.permute.xlu0 %4029 }
 0x412   :  { %v4337_v34 = vsel %vm7177_vm2, %v4336_v52, %v4030_v61  ;;  %vm7188_vm2 = vcmask 572416  }
 0x413   :  { %v4338_v23 = vsel %vm7178_vm3, %v4337_v34, %v4034_v28  ;;  %vm7189_vm3 = vcmask 588800  }
 0x414   :  { %v4042_v58 = vpop.permute.xlu1 %4041 }
 0x415   :  { %v4038_v9 = vpop.permute.xlu0 %4037 }
 0x416   :  { %v4339_v41 = vsel %vm7179_vm4, %v4338_v23, %v4038_v9  ;;  %vm7190_vm4 = vcmask 605184  }
 0x417   :  { %v4340_v24 = vsel %vm7180_vm5, %v4339_v41, %v4042_v58  ;;  %vm7191_vm5 = vcmask 621568  }
 0x418   :  { %v4050_v4 = vpop.permute.xlu1 %4049 }
 0x419   :  { %v4046_v15 = vpop.permute.xlu0 %4045 }
 0x41a   :  { %v4341_v29 = vsel %vm7181_vm6, %v4340_v24, %v4046_v15  ;;  %vm7192_vm6 = vcmask 637952  }
 0x41b   :  { %v4342_v10 = vsel %vm7182_vm7, %v4341_v29, %v4050_v4  ;;  %vm7193_vm7 = vcmask 654336  }
 0x41c   :  { %v4058_v39 = vpop.permute.xlu1 %4057 }
 0x41d   :  { %v4054_v26 = vpop.permute.xlu0 %4053 }
 0x41e   :  { %v4343_v50 = vsel %vm7183_vm8, %v4342_v10, %v4054_v26  ;;  %vm7194_vm8 = vcmask 670720  }
 0x41f   :  { %v4344_v19 = vsel %vm7184_vm9, %v4343_v50, %v4058_v39  ;;  %vm7195_vm9 = vcmask 687104  }
 0x420   :  { %v4066_v22 = vpop.permute.xlu1 %4065 }
 0x421   :  { %v4062_v57 = vpop.permute.xlu0 %4061 }
 0x422   :  { %v4345_v7 = vsel %vm7185_vm10, %v4344_v19, %v4062_v57  ;;  %vm7196_vm10 = vcmask 703488  }
 0x423   :  { %v4346_v60 = vsel %vm7186_vm11, %v4345_v7, %v4066_v22  ;;  %vm7197_vm11 = vcmask 719872  }
 0x424   :  { %v4074_v51 = vpop.permute.xlu1 %4073 }
 0x425   :  { %v4070_v56 = vpop.permute.xlu0 %4069 }
 0x426   :  { %v4347_v30 = vsel %vm7187_vm1, %v4346_v60, %v4070_v56  ;;  %vm7198_vm1 = vcmask 736256  }
 0x427   :  { %v4348_v17 = vsel %vm7188_vm2, %v4347_v30, %v4074_v51  ;;  %vm7199_vm2 = vcmask 752640  }
 0x428   :  { %v4082_v32 = vpop.permute.xlu1 %4081 }
 0x429   :  { %v4078_v16 = vpop.permute.xlu0 %4077 }
 0x42a   :  { %v4349_v11 = vsel %vm7189_vm3, %v4348_v17, %v4078_v16  ;;  %vm7200_vm3 = vcmask 769024  }
 0x42b   :  { %v4350_v54 = vsel %vm7190_vm4, %v4349_v11, %v4082_v32  ;;  %vm7201_vm4 = vcmask 801792  }
 0x42c   :  { %v4090_v25 = vpop.permute.xlu1 %4089 }
 0x42d   :  { %v4086_v31 = vpop.permute.xlu0 %4085 }
 0x42e   :  { %v4351_v27 = vsel %vm7191_vm5, %v4350_v54, %v4086_v31  ;;  %vm7202_vm5 = vcmask 818176  }
 0x42f   :  { %v4352_v62 = vsel %vm7192_vm6, %v4351_v27, %v4090_v25  ;;  %vm7203_vm6 = vcmask 834560  }
 0x430   :  { %v4098_v21 = vpop.permute.xlu1 %4097 }
 0x431   :  { %v4094_v59 = vpop.permute.xlu0 %4093 }
 0x432   :  { %v4353_v37 = vsel %vm7193_vm7, %v4352_v62, %v4094_v59  ;;  %vm7204_vm7 = vcmask 850944  }
 0x433   :  { %v4354_v8 = vsel %vm7194_vm8, %v4353_v37, %v4098_v21  ;;  %vm7205_vm8 = vcmask 867328  }
 0x434   :  { %v4106_v35 = vpop.permute.xlu1 %4105 }
 0x435   :  { %v4102_v43 = vpop.permute.xlu0 %4101 }
 0x436   :  { %v4355_v14 = vsel %vm7195_vm9, %v4354_v8, %v4102_v43  ;;  %vm7206_vm9 = vcmask 883712  }
 0x437   :  { %v4356_v12 = vsel %vm7196_vm10, %v4355_v14, %v4106_v35  ;;  %vm7208_vm10 = vcmask 916480  }
 0x438   :  { %v4114_v3 = vpop.permute.xlu1 %4113 }
 0x439   :  { %v4110_v48 = vpop.permute.xlu0 %4109 }
 0x43a   :  { %v4357_v49 = vsel %vm7197_vm11, %v4356_v12, %v4110_v48  ;;  %vm7209_vm11 = vcmask 932864  }
 0x43b   :  { %v4358_v18 = vsel %vm7198_vm1, %v4357_v49, %v4114_v3  ;;  %vm7210_vm1 = vcmask 949248  }
 0x43c   :  { %v4122_v38 = vpop.permute.xlu1 %4121 }
 0x43d   :  { %v4118_v1 = vpop.permute.xlu0 %4117 }
 0x43e   :  { %v4359_v46 = vsel %vm7199_vm2, %v4358_v18, %v4118_v1  ;;  %vm7211_vm2 = vcmask 965632  }
 0x43f   :  { %v4360_v20 = vsel %vm7200_vm3, %v4359_v46, %v4122_v38 }
 0x440   :  { %v4130_v0 = vpop.permute.xlu1 %4129 }
 0x441   :  { %v4126_v2 = vpop.permute.xlu0 %4125 }
 0x442   :  { %v4361_v53 = vsel %vm4282_vm13, %v4360_v20, %v4126_v2  ;;  %vm7207_vm13 = vcmask 900096  }
 0x443   :  { %v4362_v42 = vsel %vm7201_vm4, %v4361_v53, %v4130_v0 }
 0x444   :  { %v4138_v40 = vpop.permute.xlu1 %4137 }
 0x445   :  { %v4134_v13 = vpop.permute.xlu0 %4133 }
 0x446   :  { %v4363_v55 = vsel %vm7202_vm5, %v4362_v42, %v4134_v13 }
 0x447   :  { %v4364_v44 = vsel %vm7203_vm6, %v4363_v55, %v4138_v40 }
 0x448   :  { %v4146_v33 = vpop.permute.xlu1 %4145 }
 0x449   :  { %v4142_v36 = vpop.permute.xlu0 %4141 }
 0x44a   :  { %v4365_v47 = vsel %vm7204_vm7, %v4364_v44, %v4142_v36 }
 0x44b   :  { %v4366_v5 = vsel %vm7205_vm8, %v4365_v47, %v4146_v33 }
 0x44c   :  { %v4154_v6 = vpop.permute.xlu1 %4153 }
 0x44d   :  { %v4150_v63 = vpop.permute.xlu0 %4149 }
 0x44e   :  { %v4367_v45 = vsel %vm7206_vm9, %v4366_v5, %v4150_v63 }
 0x44f   :  { %v4368_v52 = vsel %vm7207_vm13, %v4367_v45, %v4154_v6 }
 0x450   :  { %v4162_v28 = vpop.permute.xlu1 %4161 }
 0x451   :  { %v4158_v61 = vpop.permute.xlu0 %4157 }
 0x452   :  { %v4369_v34 = vsel %vm7208_vm10, %v4368_v52, %v4158_v61 }
 0x453   :  { %v4370_v23 = vsel %vm7209_vm11, %v4369_v34, %v4162_v28 }
 0x454   :  { %v4170_v58 = vpop.permute.xlu1 %4169 }
 0x455   :  { %v4166_v9 = vpop.permute.xlu0 %4165 }
 0x456   :  { %v4371_v41 = vsel %vm7210_vm1, %v4370_v23, %v4166_v9 }
 0x457   :  { %v4372_v24 = vsel %vm7211_vm2, %v4371_v41, %v4170_v58 }
 0x458   :  { %v4178_v4 = vpop.permute.xlu1 %4177 }
 0x459   :  { %v4174_v15 = vpop.permute.xlu0 %4173 }
 0x45a   :  { %v4373_v29 = vsel %vm4306_vm12, %v4372_v24, %v4174_v15 }
 0x45b   :  { %v4374_v10 = vsel %vm4308_vm15, %v4373_v29, %v4178_v4 }
 0x45c   :  { %v4186_v39 = vpop.permute.xlu1 %4185 }
 0x45d   :  { %v4182_v26 = vpop.permute.xlu0 %4181 }
 0x45e   :  { %v4375_v50 = vsel %vm4310_vm0, %v4374_v10, %v4182_v26 }
 0x45f   :  { %v4376_v22 = vsel %vm4312_vm14, %v4375_v50, %v4186_v39 }
 0x460   :  { %4378 = vst [vmem:[#allocation9 + $0x8] sm:$0xff] %v4376_v22 }
 0x461   :  { %4564 = shalt.err (!%p4561_p9)
}
 0x462   :  { %s4565_s9 = scalar_lea.hbm %s6655_s3, 256 }
 0x463   :  { %p4566_p10 = scmp.ne.s32.totalorder %s6655_s3, %s4565_s9  ;;  %p4569_p11 = scmp.lt.u32.totalorder %s4565_s9, %s6655_s3 }
 0x465   :  { %p4571_p12 = pnand %p4569_p11, %p4566_p10 }
 0x467   :  { %4574 = shalt.err (!%p4571_p12)
}
 0x468   :  { %4388 = dma.vmem_to_hbm [thread:$0]  %s4386_s0, 256, %s6655_s3, [#allocation4]  }
 0x469   :  { %4581 = dma.done.wait [#allocation4], 256  }
 0x46a   :  { %4582 = vsyncadd [#allocation4], 4294967040 }
 0x46b   :  { %4392 = vsyncpa [#allocation3], 1 }
 0x46c   :  { %4393 = vsyncpa [#allocation8], 1 }
 0x46d   :  { %4394 = vsyncpa [#allocation4], 1 }
 0x46e   :  { %4395 = vsyncpa [#allocation5], 1 }

// kernel: tpu_custom_call.1
= control target key start
LH: loop header
LB: loop body
LE: loop exit
PB: predicated region body
PF: predicated region fallthrough
CT: control target
= control target key end

     0   :  { %8 = vsyncpa [#allocation5], 0  ;;  %s565_s0 = inlined_call_operand.hbm [shape: f32[1,13], index: 0, kind: input, shape index: {}]   ;;  %s566_s1 = inlined_call_operand.hbm [shape: f32[8,128], index: 1, kind: input, shape index: {}]   ;;  %s567_s2 = inlined_call_operand.hbm [shape: f32[8,128], index: 2, kind: input, shape index: {}]   ;;  %s568_s3 = inlined_call_operand.hbm [shape: f32[2,8,128], index: 3, kind: output, shape index: {}]  }
   0x1   :  { %9 = vsyncpa [#allocation3], 0 }
   0x2   :  { %10 = vsyncpa [#allocation8], 0 }
   0x3   :  { %11 = vsyncpa [#allocation4], 0  ;;  %s369_s14 = scalar_lea.hbm %s565_s0, 16 }
   0x4   :  { %p370_p0 = scmp.ne.s32.totalorder %s565_s0, %s369_s14  ;;  %p373_p1 = scmp.lt.u32.totalorder %s369_s14, %s565_s0 }
   0x6   :  { %p375_p2 = pnand %p373_p1, %p370_p0 }
   0x8   :  { %378 = shalt.err (!%p375_p2)
}
   0x9   :  { %s453_s19 = smov [#allocation2]   ;;  %s454_s22 = smov [#allocation6]  }
   0xa   :  { %19 = dma.hbm_to_smem %s565_s0, 16, %s453_s19, [#allocation5]  }
   0xb   :  { %s26_s23 = sshll.u32 %s454_s22, 4  ;;  %s455_s24 = smov [#allocation7]   ;;  %s27_s23 = int_to_ptr.vmem [resolvable:$true] %s26_s23 }
   0xc   :  { %s36_s25 = sshll.u32 %s455_s24, 4  ;;  %s379_s28 = scalar_lea.hbm %s566_s1, 128  ;;  %s37_s25 = int_to_ptr.vmem [resolvable:$true] %s36_s25 }
   0xd   :  { %p380_p3 = scmp.ne.s32.totalorder %s566_s1, %s379_s28  ;;  %p383_p4 = scmp.lt.u32.totalorder %s379_s28, %s566_s1 }
   0xf   :  { %p385_p5 = pnand %p383_p4, %p380_p3 }
  0x11   :  { %388 = shalt.err (!%p385_p5)
}
  0x12   :  { %s389_s0 = scalar_lea.vmem %s27_s23, 128  ;;  %p394_p7 = scmp.lt.s32.totalorder %s27_s23, %s27_s23 }
  0x13   :  { %p390_p6 = scmp.ne.s32.totalorder %s27_s23, %s389_s0  ;;  %p395_p8 = scmp.lt.s32.totalorder %s389_s0, %s389_s0 }
  0x15   :  { %p396_p9 = por %p395_p8, %p394_p7 }
  0x17   :  { %p397_p10 = pnand %p396_p9, %p390_p6 }
  0x19   :  { %400 = shalt.err (!%p397_p10)
}
  0x1a   :  { %29 = dma.hbm_to_vmem [thread:$0]  %s566_s1, 128, %s27_s23, [#allocation3]  }
  0x1b   :  { %s401_s10 = scalar_lea.hbm %s567_s2, 128 }
  0x1c   :  { %p402_p11 = scmp.ne.s32.totalorder %s567_s2, %s401_s10  ;;  %p405_p12 = scmp.lt.u32.totalorder %s401_s10, %s567_s2 }
  0x1e   :  { %p407_p13 = pnand %p405_p12, %p402_p11 }
  0x20   :  { %410 = shalt.err (!%p407_p13)
}
  0x21   :  { %s411_s15 = scalar_lea.vmem %s37_s25, 128  ;;  %p416_p1 = scmp.lt.s32.totalorder %s37_s25, %s37_s25 }
  0x22   :  { %p412_p0 = scmp.ne.s32.totalorder %s37_s25, %s411_s15  ;;  %p417_p2 = scmp.lt.s32.totalorder %s411_s15, %s411_s15 }
  0x24   :  { %p418_p3 = por %p417_p2, %p416_p1 }
  0x26   :  { %p419_p4 = pnand %p418_p3, %p412_p0 }
  0x28   :  { %422 = shalt.err (!%p419_p4)
}
  0x29   :  { %39 = dma.hbm_to_vmem [thread:$0]  %s567_s2, 128, %s37_s25, [#allocation8]  }
  0x2a   :  { %445 = dma.done.wait [#allocation5], 16  }
  0x2b   :  { %446 = vsyncadd [#allocation5], 4294967280 }
  0x2c   :  { %447 = dma.done.wait [#allocation3], 128  }
  0x2d   :  { %448 = vsyncadd [#allocation3], 4294967168 }
  0x2e   :  { %449 = dma.done.wait [#allocation8], 128  }
  0x2f   :  { %450 = vsyncadd [#allocation8], 4294967168 }
  0x30   :  { %49 = sfence }
  0x31   :  { %s330_s17 = sld [smem:[#allocation2 + $0x2]]  ;;  %s331_s18 = sld [smem:[#allocation2 + $0x3]]  ;;  %v521_v0 = vld [vmem:[#allocation6] sm:$0xff]  ;;  %v523_v1 = vld [vmem:[#allocation7] sm:$0xff]  ;;  %v456_v20 = vmov 683565275  }
  0x32   :  { %s333_s19 = sld [smem:[#allocation2 + $0x5]]  ;;  %v457_v22 = vmov 2475754826   ;;  %v458_v24 = vmov 2131351028   ;;  %s52_s2 = sld [smem:[#allocation2]] }
  0x33   :  { %v459_v26 = vmov 2102212464   ;;  %v460_v28 = vmov 920167782   ;;  %v461_v35 = vmov 1326507024  }
  0x34   :  { %s329_s20 = sld [smem:[#allocation2 + $0x1]]  ;;  %s332_s21 = sld [smem:[#allocation2 + $0x4]] }
  0x35   :  { %s340_s22 = sld [smem:[#allocation2 + $0xc]]  ;;  %s339_s23 = sld [smem:[#allocation2 + $0xb]] }
  0x36   :  { %s338_s24 = sld [smem:[#allocation2 + $0xa]]  ;;  %s337_s25 = sld [smem:[#allocation2 + $0x9]] }
  0x37   :  { %v72_v2 = vstv %s330_s17  ;;  %v74_v3 = vstv %s331_s18  ;;  %s336_s26 = sld [smem:[#allocation2 + $0x8]]  ;;  %s334_s27 = sld [smem:[#allocation2 + $0x6]] }
  0x38   :  { %v73_v4 = vmul.f32 %v72_v2, %v521_v0  ;;  %v75_v5 = vmul.f32 %v74_v3, %v523_v1  ;;  %v77_v6 = vstv %s333_s19  ;;  %v65_v61 = vstv %s52_s2  ;;  %s335_s28 = sld [smem:[#allocation2 + $0x7]]  ;;  %s462_s29 = smov [#allocation9]  }
  0x39   :  { %v66_v3 = vmul.f32 %v65_v61, %v521_v0  ;;  %s315_s30 = sshll.u32 %s462_s29, 4  ;;  %s316_s30 = int_to_ptr.vmem [resolvable:$true] %s315_s30 }
  0x3a   :  { %v76_v7 = vadd.f32 %v75_v5, %v73_v4  ;;  %v67_v62 = vstv %s329_s20  ;;  %s423_s4 = scalar_lea.vmem %s316_s30, 256  ;;  %p428_p6 = scmp.lt.s32.totalorder %s316_s30, %s316_s30 }
  0x3b   :  { %v68_v4 = vmul.f32 %v67_v62, %v523_v1  ;;  %v82_v0 = vstv %s339_s23  ;;  %p424_p5 = scmp.ne.s32.totalorder %s316_s30, %s423_s4  ;;  %p429_p7 = scmp.lt.s32.totalorder %s423_s4, %s423_s4 }
  0x3c   :  { %v527_v8 = vadd.f32 %v77_v6, %v76_v7 }
  0x3d   :  { %v69_v7 = vadd.f32 %v68_v4, %v66_v3  ;;  %p430_p8 = por %p429_p7, %p428_p6 }
  0x3e   :  { %v97_v9 = vand.u32 2139095040, %v527_v8  ;;  %v94_v11 = vand.u32 2147483647, %v527_v8  ;;  %vm96_vm7 = vcmp.lt.s32.totalorder %v527_v8, 0  ;;  %vm186_vm15 = vweird.f32 %v527_v8 }
  0x3f   :  { %v305_v3 = vstv %s335_s28  ;;  %p431_p9 = pnand %p430_p8, %p424_p5 }
  0x40   :  { %v98_v10 = vshrl.u32 %v97_v9, 23  ;;  %v101_v14 = vand.u32 8388607, %v94_v11  ;;  %v70_v9 = vstv %s332_s21  ;;  %vm95_vm8 = vcmp.le.f32.partialorder %v94_v11, 0.7853982 }
  0x42   :  { %v341_v12 = vadd.s32 4294967169, %v98_v10  ;;  %v102_v17 = vor.u32 8388608, %v101_v14 }
  0x44   :  { %v104_v13 = vadd.s32 1, %v341_v12  ;;  %v142_v37 = vshll.u32 %v102_v17, 8  ;;  %v80_v17 = vstv %s340_s22 }
  0x46   :  { %vm105_vm0 = vcmp.gt.s32.totalorder %v104_v13, 0 }
  0x47   :  { %v106_v15 = vsel %vm105_vm0, %v104_v13, 0  ;;  %v71_v13 = vadd.f32 %v70_v9, %v69_v7 }
  0x48   :  { %v108_v16 = vand.u32 31, %v106_v15  ;;  %v107_v18 = vshrl.u32 %v106_v15, 5 }
  0x4a   :  { %v109_v19 = vsub.s32 32, %v108_v16  ;;  %v111_v21 = vshll.u32 %v456_v20, %v108_v16  ;;  %v114_v23 = vshll.u32 %v457_v22, %v108_v16  ;;  %v117_v25 = vshll.u32 %v458_v24, %v108_v16 }
  0x4b   :  { %v120_v27 = vshll.u32 %v459_v26, %v108_v16  ;;  %v123_v29 = vshll.u32 %v460_v28, %v108_v16  ;;  %vm126_vm1 = vcmp.lt.s32.totalorder %v107_v18, 1  ;;  %vm127_vm2 = vcmp.lt.s32.totalorder %v107_v18, 2 }
  0x4c   :  { %v110_v30 = vshrl.u32 %v456_v20, %v109_v19  ;;  %v112_v31 = vshrl.u32 %v457_v22, %v109_v19  ;;  %v115_v32 = vshrl.u32 %v458_v24, %v109_v19  ;;  %v118_v33 = vshrl.u32 %v459_v26, %v109_v19 }
  0x4d   :  { %v121_v34 = vshrl.u32 %v460_v28, %v109_v19  ;;  %v124_v36 = vshrl.u32 %v461_v35, %v109_v19  ;;  %vm128_vm3 = vcmp.lt.s32.totalorder %v107_v18, 3  ;;  %vm129_vm4 = vcmp.lt.s32.totalorder %v107_v18, 4 }
  0x4e   :  { %v113_v38 = vor.u32 %v112_v31, %v111_v21  ;;  %v116_v39 = vor.u32 %v115_v32, %v114_v23  ;;  %v119_v40 = vor.u32 %v118_v33, %v117_v25  ;;  %v79_v16 = vmul.f32 %v71_v13, %v71_v13 }
  0x4f   :  { %v122_v41 = vor.u32 %v121_v34, %v120_v27  ;;  %v125_v42 = vor.u32 %v124_v36, %v123_v29  ;;  %v85_v31 = vstv %s338_s24 }
  0x50   :  { %v130_v43 = vsel %vm126_vm1, %v110_v30, %v113_v38  ;;  %v131_v44 = vsel %vm129_vm4, %v119_v40, 2102212464  ;;  %v134_v45 = vsel %vm126_vm1, %v113_v38, %v116_v39  ;;  %v138_v46 = vsel %vm126_vm1, %v116_v39, %v119_v40 }
  0x51   :  { %v132_v47 = vsel %vm128_vm3, %v116_v39, %v131_v44  ;;  %v135_v48 = vsel %vm129_vm4, %v122_v41, 920167782  ;;  %v139_v49 = vsel %vm129_vm4, %v125_v42, 1326507024  ;;  %v81_v20 = vmul.f32 %v80_v17, %v79_v16 }
  0x52   :  { %v136_v50 = vsel %vm128_vm3, %v119_v40, %v135_v48  ;;  %v140_v51 = vsel %vm128_vm3, %v122_v41, %v139_v49  ;;  %v133_v52 = vsel %vm127_vm2, %v130_v43, %v132_v47  ;;  %v88_v41 = vstv %s337_s25 }
  0x53   :  { %v137_v53 = vsel %vm127_vm2, %v134_v45, %v136_v50  ;;  %v141_v54 = vsel %vm127_vm2, %v138_v46, %v140_v51  ;;  %v149_v59 = vmul.u32 %v142_v37, %v133_v52  ;;  %v83_v25 = vadd.f32 %v82_v0, %v81_v20 }
  0x54   :  { %v536_v55 = vmul.u32.u64.low %v142_v37, %v141_v54  ;;  %v537_v56 = vmul.u32.u64.high %v142_v37, %v141_v54, %v536_v55  ;;  %v539_v57 = vmul.u32.u64.low %v142_v37, %v137_v53  ;;  %v540_v58 = vmul.u32.u64.high %v142_v37, %v137_v53, %v539_v57 }
  0x55   :  { %v84_v30 = vmul.f32 %v83_v25, %v79_v16  ;;  %v91_v48 = vstv %s336_s26 }
  0x56   :  { %vm151_vm5 = vc.u32 %v537_v56, %v539_v57  ;;  %v152_v60 = vadd.s32 1, %v540_v58  ;;  %v150_v1 = vadd.s32 %v539_v57, %v537_v56 }
  0x57   :  { %v86_v36 = vadd.f32 %v85_v31, %v84_v30 }
  0x58   :  { %v153_v63 = vsel %vm151_vm5, %v152_v60, %v540_v58 }
  0x59   :  { %v154_v2 = vadd.s32 %v153_v63, %v149_v59  ;;  %v87_v40 = vmul.f32 %v86_v36, %v79_v16  ;;  %v198_v63 = vstv %s334_s27 }
  0x5b   :  { %v155_v5 = vadd.s32 536870912, %v154_v2  ;;  %v89_v45 = vadd.f32 %v88_v41, %v87_v40 }
  0x5d   :  { %v156_v6 = vshrl.u32 %v155_v5, 30  ;;  %v90_v47 = vmul.f32 %v89_v45, %v79_v16 }
  0x5f   :  { %v157_v10 = vshll.u32 %v156_v6, 30  ;;  %v180_v35 = vsub.s32 4, %v156_v6  ;;  %v92_v11 = vadd.f32 %v91_v48, %v90_v47 }
  0x61   :  { %v158_v12 = vsub.s32 %v154_v2, %v157_v10  ;;  %v181_v39 = vsel %vm96_vm7, %v180_v35, %v156_v6  ;;  %v93_v55 = vmul.f32 %v92_v11, %v71_v13 }
  0x62   :  { %v183_v44 = vsel %vm95_vm8, 0, %v181_v39 }
  0x63   :  { %v160_v14 = vsub.s32 0, %v158_v12  ;;  %v293_v46 = vadd.s32 3, %v183_v44  ;;  %v187_v49 = vand.u32 3, %v183_v44 }
  0x65   :  { %v342_v15 = vmin.u32 %v160_v14, %v158_v12  ;;  %v294_v50 = vand.u32 3, %v293_v46  ;;  %vm192_vm9 = vcmp.eq.s32.totalorder %v187_v49, 2  ;;  %vm189_vm11 = vcmp.eq.s32.totalorder %v187_v49, 0 }
  0x66   :  { %vm188_vm13 = vcmp.lt.s32.totalorder %v187_v49, 2 }
  0x67   :  { %v162_v18 = vclz %v342_v15  ;;  %vm299_vm10 = vcmp.eq.s32.totalorder %v294_v50, 2  ;;  %vm296_vm12 = vcmp.eq.s32.totalorder %v294_v50, 0  ;;  %vm295_vm14 = vcmp.lt.s32.totalorder %v294_v50, 2 }
  0x69   :  { %v343_v19 = vadd.s32 4294967294, %v162_v18 }
  0x6b   :  { %vm344_vm6 = vcmp.lt.s32.totalorder %v343_v19, 0 }
  0x6c   :  { %v165_v21 = vsel %vm344_vm6, 0, %v343_v19 }
  0x6d   :  { %v166_v22 = vsub.s32 32, %v165_v21  ;;  %v167_v23 = vshll.u32 %v158_v12, %v165_v21  ;;  %v170_v24 = vsub.s32 4294967266, %v165_v21 }
  0x6f   :  { %v168_v26 = vshrl.u32 %v150_v1, %v166_v22  ;;  %v171_v27 = vadd.s32 127, %v170_v24 }
  0x71   :  { %v169_v28 = vor.u32 %v168_v26, %v167_v23  ;;  %v172_v29 = vshll.u32 %v171_v27, 23 }
  0x73   :  { %v173_v32 = vor.u32 4788187, %v172_v29  ;;  %v176_v33 = vcvt.s32.f32 %v169_v28 }
  0x75   :  { %v174_v34 = vand.u32 2147483647, %v173_v32 }
  0x77   :  { %v177_v37 = vmul.f32 %v176_v33, %v174_v34 }
  0x79   :  { %v178_v38 = vxor.u32 2147483648, %v177_v37 }
  0x7b   :  { %v179_v42 = vsel %vm96_vm7, %v178_v38, %v177_v37 }
  0x7c   :  { %v182_v43 = vsel %vm95_vm8, %v527_v8, %v179_v42 }
  0x7d   :  { %365 = vcosq.f32 %v182_v43 }
  0x7e   :  { %367 = vsinq.f32 %v182_v43 }
  0x87   :  { %v366_v51 = vpop.eup %365 }
  0x88   :  { %v368_v52 = vpop.eup %367  ;;  %v193_v53 = vxor.u32 2147483648, %v366_v51 }
  0x89   :  { %v190_v54 = vxor.u32 2147483648, %v368_v52 }
  0x8a   :  { %v194_v56 = vsel %vm192_vm9, %v193_v53, %v368_v52  ;;  %v301_v57 = vsel %vm299_vm10, %v193_v53, %v368_v52 }
  0x8b   :  { %v191_v58 = vsel %vm189_vm11, %v366_v51, %v190_v54  ;;  %v298_v59 = vsel %vm296_vm12, %v366_v51, %v190_v54 }
  0x8c   :  { %v195_v60 = vsel %vm188_vm13, %v191_v58, %v194_v56  ;;  %v302_v61 = vsel %vm295_vm14, %v298_v59, %v301_v57 }
  0x8d   :  { %v196_v62 = vsel %vm186_vm15, nan, %v195_v60  ;;  %v303_v2 = vsel %vm186_vm15, nan, %v302_v61 }
  0x8e   :  { %v197_v4 = vmul.f32 %v196_v62, %v93_v55  ;;  %v304_v5 = vmul.f32 %v303_v2, %v93_v55 }
  0x90   :  { %v199_v6 = vadd.f32 %v198_v63, %v197_v4  ;;  %v306_v7 = vadd.f32 %v305_v3, %v304_v5 }
  0x92   :  { %307 = vst [vmem:[#allocation9] sm:$0xff] %v199_v6  ;;  %309 = vst [vmem:[#allocation9 + $0x8] sm:$0xff] %v306_v7 }
  0x93   :  { %434 = shalt.err (!%p431_p9)
}
  0x94   :  { %s435_s6 = scalar_lea.hbm %s568_s3, 256 }
  0x95   :  { %p436_p10 = scmp.ne.s32.totalorder %s568_s3, %s435_s6  ;;  %p439_p11 = scmp.lt.u32.totalorder %s435_s6, %s568_s3 }
  0x97   :  { %p441_p12 = pnand %p439_p11, %p436_p10 }
  0x99   :  { %444 = shalt.err (!%p441_p12)
}
  0x9a   :  { %s463_s11 = smov 128   ;;  %s464_s12 = smov 8  }
  0x9b   :  { %321 = dma.vmem_to_hbm [thread:$0]  %s316_s30, 256, %s568_s3, [#allocation4], %s463_s11, %s463_s11, %s464_s12  }
  0x9c   :  { %451 = dma.done.wait [#allocation4], 256  }
  0x9d   :  { %452 = vsyncadd [#allocation4], 4294967040 }
  0x9e   :  { %325 = vsyncpa [#allocation3], 1 }
  0x9f   :  { %326 = vsyncpa [#allocation8], 1 }
  0xa0   :  { %327 = vsyncpa [#allocation4], 1 }
  0xa1   :  { %328 = vsyncpa [#allocation5], 1 }

</bundles_post_ra>
